<compile_context>
chip_gen: v7x
topology: tpu7x:2x2x1
jax: 0.10.0
libtpu: 0.0.40
codegen_flags: <defaults>
</compile_context>

<pallas_src>
import functools

import numpy as np

import jax
import jax.numpy as jnp
from jax import lax
from jax.experimental import pallas as pl
from jax.experimental.pallas import tpu as pltpu


# ----------------------------------------------------------------------------
# Fused network kernel: conv1 -> conv2 -> conv3 -> fc1 -> fc2, per batch block
# ----------------------------------------------------------------------------

def _net_kernel(xp_ref, w1_ref, b1_ref, s2_ref, w2_ref, b2_ref,
                s3_ref, w3_ref, b3_ref, wa_ref, ba_ref, wb_ref, bb_ref, o_ref):
    f32 = jnp.float32
    bf16 = jnp.bfloat16

    # conv1 (8x8 / stride 4) as ONE matmul against a block-diagonal weight:
    #   rows = (image-in-block, out-row p), lanes = (out-col q, channel).
    y1 = jnp.dot(xp_ref[...], w1_ref[...], preferred_element_type=f32)
    y1 = jnp.maximum(y1 + b1_ref[...], 0.0).astype(bf16)          # (BB*8, 256)

    # conv2 (4x4 / stride 2): sum over the 4 kernel-row offsets.  Each term is
    # a tiny 0/1 row-selection matmul followed by a zero-expanded weight matmul.
    acc2 = jnp.zeros((s2_ref.shape[1], w2_ref.shape[-1]), f32)
    for i2 in range(4):
        sel = jnp.dot(s2_ref[i2], y1, preferred_element_type=f32).astype(bf16)
        acc2 = acc2 + jnp.dot(sel, w2_ref[i2], preferred_element_type=f32)
    y2 = jnp.maximum(acc2 + b2_ref[...], 0.0).astype(bf16)        # (BB*3, 256)

    # conv3 (3x3 on the 3x3 map -> 1x1 output): sum over the 3 kernel rows.
    acc3 = jnp.zeros((s3_ref.shape[1], w3_ref.shape[-1]), f32)
    for po in range(3):
        sel = jnp.dot(s3_ref[po], y2, preferred_element_type=f32).astype(bf16)
        acc3 = acc3 + jnp.dot(sel, w3_ref[po], preferred_element_type=f32)
    feat = jnp.maximum(acc3 + b3_ref[...], 0.0).astype(bf16)      # (BB, 128)

    # Fused FC heads: first layers of both heads concatenated (lane-dense),
    # second layers block-diagonal and padded to 128 output lanes.
    h = jnp.dot(feat, wa_ref[...], preferred_element_type=f32) + ba_ref[...]
    h = jnp.maximum(h, 0.0).astype(bf16)                          # (BB, 512/1024)
    out2 = jnp.dot(h, wb_ref[...], preferred_element_type=f32) + bb_ref[...]
    o_ref[...] = out2.astype(o_ref.dtype)                         # (BB, 128)


def _net_pallas(xp, prep, s2, s3, *, bb):
    rows = xp.shape[0]
    assert rows % (8 * bb) == 0
    bp = rows // 8
    grid = (bp // bb,)

    return pl.pallas_call(
        _net_kernel,
        out_shape=jax.ShapeDtypeStruct((bp, 128), jnp.float32),
        grid=grid,
        in_specs=[
            pl.BlockSpec((bb * 8, xp.shape[1]), lambda i: (i, 0)),
            pl.BlockSpec(prep["w1bd"].shape, lambda i: (0, 0)),
            pl.BlockSpec(prep["b1"].shape, lambda i: (0, 0)),
            pl.BlockSpec(s2.shape, lambda i: (0, 0, 0)),
            pl.BlockSpec(prep["w2eff"].shape, lambda i: (0, 0, 0)),
            pl.BlockSpec(prep["b2"].shape, lambda i: (0, 0)),
            pl.BlockSpec(s3.shape, lambda i: (0, 0, 0)),
            pl.BlockSpec(prep["w3eff"].shape, lambda i: (0, 0, 0)),
            pl.BlockSpec(prep["b3"].shape, lambda i: (0, 0)),
            pl.BlockSpec(prep["wa"].shape, lambda i: (0, 0)),
            pl.BlockSpec(prep["ba"].shape, lambda i: (0, 0)),
            pl.BlockSpec(prep["wb"].shape, lambda i: (0, 0)),
            pl.BlockSpec(prep["bb"].shape, lambda i: (0, 0)),
        ],
        out_specs=pl.BlockSpec((bb, 128), lambda i: (i, 0)),
        compiler_params=pltpu.CompilerParams(dimension_semantics=("parallel",)),
    )(xp, prep["w1bd"], prep["b1"], s2, prep["w2eff"], prep["b2"],
      s3, prep["w3eff"], prep["b3"], prep["wa"], prep["ba"], prep["wb"], prep["bb"])


# ----------------------------------------------------------------------------
# Constant 0/1 row-selection matrices (kernel-row offsets), built per BB
# ----------------------------------------------------------------------------

def _sel_mats(bb):
    s2 = np.zeros((4, bb * 3, bb * 8), np.float32)     # conv2: row 2*po + i2
    for i2 in range(4):
        for b in range(bb):
            for po in range(3):
                s2[i2, b * 3 + po, b * 8 + 2 * po + i2] = 1.0
    s3 = np.zeros((3, bb, bb * 3), np.float32)         # conv3: row po
    for po in range(3):
        for b in range(bb):
            s3[po, b, b * 3 + po] = 1.0
    return jnp.asarray(s2, jnp.bfloat16), jnp.asarray(s3, jnp.bfloat16)


# ----------------------------------------------------------------------------
# Parameters (PyTorch-style raw layout) + one-time kernel-ready re-layout
# ----------------------------------------------------------------------------

def _conv_out(size, k, s):
    return (size - (k - 1) - 1) // s + 1


def init_params(key, channel, num_outputs, height, width, mode):
    feature_dim = 512
    convw = _conv_out(_conv_out(_conv_out(width, 8, 4), 4, 2), 3, 1)
    convh = _conv_out(_conv_out(_conv_out(height, 8, 4), 4, 2), 3, 1)
    linear_input = convw * convh * 64

    keys = iter(jax.random.split(key, 16))
    p = {}

    def u(shape, fan_in):
        bound = 1.0 / (float(fan_in) ** 0.5)
        return jax.random.uniform(next(keys), shape, jnp.float32, -bound, bound)

    def conv_p(name, oc, ic, k):
        p[name + "_w"] = u((oc, ic, k, k), ic * k * k)
        p[name + "_b"] = u((oc,), ic * k * k)

    def lin_p(name, din, dout):
        p[name + "_w"] = u((din, dout), din)     # stored (K, N)
        p[name + "_b"] = u((dout,), din)

    conv_p("conv1", 32, channel, 8)
    conv_p("conv2", 64, 32, 4)
    conv_p("conv3", 64, 64, 3)

    if mode == "dueling":
        lin_p("adv1", linear_input, feature_dim); lin_p("adv2", feature_dim, num_outputs)
        lin_p("val1", linear_input, feature_dim); lin_p("val2", feature_dim, 1)
    elif mode == "preference":
        lin_p("act1", linear_input, feature_dim); lin_p("act2", feature_dim, num_outputs)
        lin_p("q1", linear_input, feature_dim);   lin_p("q2", feature_dim, num_outputs)
    else:
        lin_p("fc1", linear_input, feature_dim);  lin_p("fc2", feature_dim, num_outputs)

    return p, linear_input


def prepare_params(raw, channel, num_actions, mode):
    """One-time re-layout: fold all im2col gathers into constant matrices."""
    C = channel
    f32 = np.float32

    # conv1: im2col weight (j = (di, dj, ir, jr, c)), block-diagonal over the
    # 8 output columns q so y1 comes out with lanes = (q, out-channel).
    w1 = np.asarray(raw["conv1_w"], f32)                         # (32, C, 8, 8)
    w1m = (w1.reshape(32, C, 2, 4, 2, 4)
             .transpose(2, 4, 3, 5, 1, 0).reshape(64 * C, 32))
    w1bd = np.kron(np.eye(8, dtype=f32), w1m)                    # (512*C, 256)
    b1 = np.tile(np.asarray(raw["conv1_b"], f32), 8).reshape(1, 256)

    # conv2: zero-expanded over the (q -> qo) column window, one matrix per
    # kernel-row offset i2.  Output lanes = (qo, out-channel), padded to 256.
    w2 = np.asarray(raw["conv2_w"], f32)                         # (64, 32, 4, 4)
    w2eff = np.zeros((4, 256, 256), f32)
    for i2 in range(4):
        for qo in range(3):
            for j2 in range(4):
                q = 2 * qo + j2
                w2eff[i2, q * 32:(q + 1) * 32, qo * 64:(qo + 1) * 64] = w2[:, :, i2, j2].T
    b2 = np.zeros((1, 256), f32)
    b2[0, :192] = np.tile(np.asarray(raw["conv2_b"], f32), 3)

    # conv3 (3x3 map -> 1x1): one matrix per kernel row, features padded to 128.
    w3 = np.asarray(raw["conv3_w"], f32)                         # (64, 64, 3, 3)
    w3eff = np.zeros((3, 256, 128), f32)
    for po in range(3):
        for qo in range(3):
            w3eff[po, qo * 64:(qo + 1) * 64, :64] = w3[:, :, po, qo].T
    b3 = np.zeros((1, 128), f32)
    b3[0, :64] = np.asarray(raw["conv3_b"], f32)

    A = num_actions

    def pad_wa(w):                                               # (64,N1)->(128,N1)
        w = np.asarray(w, f32)
        return np.concatenate([w, np.zeros((64, w.shape[1]), f32)], axis=0)

    if mode == "dueling":
        wa = pad_wa(np.concatenate([np.asarray(raw["adv1_w"]),
                                    np.asarray(raw["val1_w"])], axis=1))
        ba = np.concatenate([np.asarray(raw["adv1_b"]),
                             np.asarray(raw["val1_b"])]).reshape(1, -1).astype(f32)
        wb = np.zeros((1024, 128), f32)
        wb[:512, :A] = np.asarray(raw["adv2_w"])
        wb[512:, A:A + 1] = np.asarray(raw["val2_w"])
        bb = np.zeros((1, 128), f32)
        bb[0, :A] = np.asarray(raw["adv2_b"])
        bb[0, A:A + 1] = np.asarray(raw["val2_b"])
    elif mode == "preference":
        wa = pad_wa(np.concatenate([np.asarray(raw["act1_w"]),
                                    np.asarray(raw["q1_w"])], axis=1))
        ba = np.concatenate([np.asarray(raw["act1_b"]),
                             np.asarray(raw["q1_b"])]).reshape(1, -1).astype(f32)
        wb = np.zeros((1024, 128), f32)
        wb[:512, :A] = np.asarray(raw["act2_w"])
        wb[512:, A:2 * A] = np.asarray(raw["q2_w"])
        bb = np.zeros((1, 128), f32)
        bb[0, :A] = np.asarray(raw["act2_b"])
        bb[0, A:2 * A] = np.asarray(raw["q2_b"])
    else:
        wa = pad_wa(raw["fc1_w"])
        ba = np.asarray(raw["fc1_b"], f32).reshape(1, -1)
        wb = np.zeros((512, 128), f32)
        wb[:, :A] = np.asarray(raw["fc2_w"])
        bb = np.zeros((1, 128), f32)
        bb[0, :A] = np.asarray(raw["fc2_b"])

    bf = jnp.bfloat16
    return {
        "w1bd": jnp.asarray(w1bd, bf), "b1": jnp.asarray(b1),
        "w2eff": jnp.asarray(w2eff, bf), "b2": jnp.asarray(b2),
        "w3eff": jnp.asarray(w3eff, bf), "b3": jnp.asarray(b3),
        "wa": jnp.asarray(wa, bf), "ba": jnp.asarray(ba),
        "wb": jnp.asarray(wb, bf), "bb": jnp.asarray(bb),
    }


# ----------------------------------------------------------------------------
# Forward pass (ONE pallas_call + tiny XLA epilogue on the sliced (B, A) output)
# ----------------------------------------------------------------------------

@functools.partial(jax.jit, static_argnames=("mode", "num_actions", "batch_block"))
def net_forward(prep, x, *, mode, num_actions, batch_block=8):
    B, C, H, W = x.shape
    # TODO(synk): conv-stack lowering is specialised to 36x36 inputs (the size
    # where conv3's output is 1x1 and linear_input == 64).
    assert H == 36 and W == 36, "kernel specialised to 36x36 inputs"
    assert batch_block % 8 == 0, "batch_block must be a multiple of 8"

    BB = batch_block
    Bp = max(BB, ((B + BB - 1) // BB) * BB)

    # XLA-side layout plumbing on the tiny (20 KiB/image) input: conv1 im2col
    # patches with rows = (image, out-row p) and lanes = (out-col q, di, dj, ir, jr, c).
    xs = (x.astype(jnp.float32)
            .reshape(B, C, 9, 4, 9, 4)
            .transpose(0, 2, 4, 3, 5, 1))                        # (B, hb, wb, ir, jr, C)
    pats = jnp.stack([xs[:, di:di + 8, dj:dj + 8]
                      for di in range(2) for dj in range(2)], axis=3)
    xp = pats.reshape(B * 8, 8 * 64 * C)                         # (B*8, 512*C)
    if Bp != B:
        xp = jnp.concatenate(
            [xp, jnp.zeros(((Bp - B) * 8, xp.shape[1]), xp.dtype)], axis=0)
    xp = xp.astype(jnp.bfloat16)

    s2, s3 = _sel_mats(BB)
    out = _net_pallas(xp, prep, s2, s3, bb=BB)[:B]               # (B, 128) raw slab

    A = num_actions
    if mode == "dueling":
        adv = out[:, :A]
        val = out[:, A:A + 1]
        return val + adv - jnp.mean(adv)                         # mean over all B*A
    if mode == "preference":
        dist = jax.nn.softmax(out[:, :A], axis=1)                # per-row softmax
        return dist, out[:, A:2 * A]
    return out[:, :A]


# ----------------------------------------------------------------------------
# Pure-JAX reference (mirrors the PyTorch module) for correctness checking
# ----------------------------------------------------------------------------

def _ref_forward(raw, x, *, mode):
    hp = lax.Precision.HIGHEST

    def conv(z, w, b, s):
        z = lax.conv_general_dilated(z, w, (s, s), "VALID",
                                     dimension_numbers=("NCHW", "OIHW", "NCHW"),
                                     precision=hp)
        return jax.nn.relu(z + b[None, :, None, None])

    y = conv(x, raw["conv1_w"], raw["conv1_b"], 4)
    y = conv(y, raw["conv2_w"], raw["conv2_b"], 2)
    y = conv(y, raw["conv3_w"], raw["conv3_b"], 1)
    f = y.reshape(y.shape[0], -1)

    def lin(name, z):
        return jnp.dot(z, raw[name + "_w"], precision=hp) + raw[name + "_b"]

    if mode == "dueling":
        adv = lin("adv2", jax.nn.relu(lin("adv1", f)))
        val = lin("val2", jax.nn.relu(lin("val1", f)))
        return val + adv - jnp.mean(adv)
    if mode == "preference":
        q = lin("q2", jax.nn.relu(lin("q1", f)))
        logits = lin("act2", jax.nn.relu(lin("act1", f)))
        return jax.nn.softmax(logits, axis=1), q
    return lin("fc2", jax.nn.relu(lin("fc1", f)))


# ----------------------------------------------------------------------------
# main
# ----------------------------------------------------------------------------

if __name__ == "__main__":
    # 36 is the smallest spatial size keeping all three convs valid (36->8->3->1).
    # B=12 exercises both batch padding (-> 16) and a 2-step "parallel" grid.
    B, C, H, W = 12, 4, 36, 36
    A = 6

    key = jax.random.PRNGKey(0)
    kx, kp = jax.random.split(key)
    x = jax.random.normal(kx, (B, C, H, W), jnp.float32)

    for mode in ("dueling", "preference", "plain"):
        raw, linear_input = init_params(kp, C, A, H, W, mode)
        assert linear_input == 64
        prep = prepare_params(raw, C, A, mode)

        out = net_forward(prep, x, mode=mode, num_actions=A, batch_block=8)
        out = jax.block_until_ready(out)
        ref = _ref_forward(raw, x, mode=mode)

        if mode == "preference":
            assert out[0].shape == (B, A) and out[1].shape == (B, A)
            np.testing.assert_allclose(np.asarray(out[0]), np.asarray(ref[0]),
                                       rtol=2e-2, atol=3e-3)
            np.testing.assert_allclose(np.asarray(out[1]), np.asarray(ref[1]),
                                       rtol=2e-2, atol=3e-3)
        else:
            assert out.shape == (B, A)
            np.testing.assert_allclose(np.asarray(out), np.asarray(ref),
                                       rtol=2e-2, atol=3e-3)

    print("KERNEL_OK")
</pallas_src>

<mosaic_0001>
module attributes {stable_mosaic.version = 11 : i64} {
  func.func @_net_kernel(%arg0: i32, %arg1: memref<64x2048xbf16, #tpu.memory_space<vmem>>, %arg2: memref<2048x256xbf16, #tpu.memory_space<vmem>>, %arg3: memref<1x256xf32, #tpu.memory_space<vmem>>, %arg4: memref<4x24x64xbf16, #tpu.memory_space<vmem>>, %arg5: memref<4x256x256xbf16, #tpu.memory_space<vmem>>, %arg6: memref<1x256xf32, #tpu.memory_space<vmem>>, %arg7: memref<3x8x24xbf16, #tpu.memory_space<vmem>>, %arg8: memref<3x256x128xbf16, #tpu.memory_space<vmem>>, %arg9: memref<1x128xf32, #tpu.memory_space<vmem>>, %arg10: memref<128x1024xbf16, #tpu.memory_space<vmem>>, %arg11: memref<1x1024xf32, #tpu.memory_space<vmem>>, %arg12: memref<1024x128xbf16, #tpu.memory_space<vmem>>, %arg13: memref<1x128xf32, #tpu.memory_space<vmem>>, %arg14: memref<8x128xf32, #tpu.memory_space<vmem>>) attributes {dimension_semantics = [#tpu.dimension_semantics<parallel>], iteration_bounds = array<i64: 2>, scalar_prefetch = 0 : i64, scratch_operands = 0 : i64, tpu.core_type = #tpu.core_type<tc>, window_params = [{transform_indices = @transform_0, window_bounds = array<i64: 64, 2048>}, {pipeline_mode = #tpu.pipeline_mode<synchronous>, transform_indices = @transform_1, window_bounds = array<i64: 2048, 256>}, {pipeline_mode = #tpu.pipeline_mode<synchronous>, transform_indices = @transform_2, window_bounds = array<i64: 1, 256>}, {pipeline_mode = #tpu.pipeline_mode<synchronous>, transform_indices = @transform_3, window_bounds = array<i64: 4, 24, 64>}, {pipeline_mode = #tpu.pipeline_mode<synchronous>, transform_indices = @transform_4, window_bounds = array<i64: 4, 256, 256>}, {pipeline_mode = #tpu.pipeline_mode<synchronous>, transform_indices = @transform_5, window_bounds = array<i64: 1, 256>}, {pipeline_mode = #tpu.pipeline_mode<synchronous>, transform_indices = @transform_6, window_bounds = array<i64: 3, 8, 24>}, {pipeline_mode = #tpu.pipeline_mode<synchronous>, transform_indices = @transform_7, window_bounds = array<i64: 3, 256, 128>}, {pipeline_mode = #tpu.pipeline_mode<synchronous>, transform_indices = @transform_8, window_bounds = array<i64: 1, 128>}, {pipeline_mode = #tpu.pipeline_mode<synchronous>, transform_indices = @transform_9, window_bounds = array<i64: 128, 1024>}, {pipeline_mode = #tpu.pipeline_mode<synchronous>, transform_indices = @transform_10, window_bounds = array<i64: 1, 1024>}, {pipeline_mode = #tpu.pipeline_mode<synchronous>, transform_indices = @transform_11, window_bounds = array<i64: 1024, 128>}, {pipeline_mode = #tpu.pipeline_mode<synchronous>, transform_indices = @transform_12, window_bounds = array<i64: 1, 128>}, {transform_indices = @transform_13, window_bounds = array<i64: 8, 128>}]} {
    %c0 = arith.constant 0 : index
    %c0_0 = arith.constant 0 : index
    %0 = vector.load %arg1[%c0, %c0_0] : memref<64x2048xbf16, #tpu.memory_space<vmem>>, vector<64x2048xbf16>
    %c0_1 = arith.constant 0 : index
    %c0_2 = arith.constant 0 : index
    %1 = vector.load %arg2[%c0_1, %c0_2] : memref<2048x256xbf16, #tpu.memory_space<vmem>>, vector<2048x256xbf16>
    %cst = arith.constant dense<0.000000e+00> : vector<64x256xf32>
    %2 = tpu.matmul %0, %1, %cst {dimension_numbers = #tpu.dot_dimension_numbers<[1], [0], [0], [1], [0, 0, 1, 1], [], []>} : vector<64x2048xbf16>, vector<2048x256xbf16>, vector<64x256xf32> -> vector<64x256xf32>
    %c0_3 = arith.constant 0 : index
    %c0_4 = arith.constant 0 : index
    %3 = vector.load %arg3[%c0_3, %c0_4] : memref<1x256xf32, #tpu.memory_space<vmem>>, vector<1x256xf32>
    %4 = vector.broadcast %3 : vector<1x256xf32> to vector<64x256xf32>
    %5 = arith.addf %2, %4 : vector<64x256xf32>
    %cst_5 = arith.constant 0.000000e+00 : f32
    %6 = vector.broadcast %cst_5 : f32 to vector<64x256xf32>
    %7 = arith.maximumf %5, %6 : vector<64x256xf32>
    %8 = arith.truncf %7 : vector<64x256xf32> to vector<64x256xbf16>
    %cst_6 = arith.constant 0.000000e+00 : f32
    %9 = vector.broadcast %cst_6 : f32 to vector<24x256xf32>
    %c0_7 = arith.constant 0 : index
    %c0_8 = arith.constant 0 : index
    %c0_9 = arith.constant 0 : index
    %10 = vector.load %arg4[%c0_7, %c0_8, %c0_9] : memref<4x24x64xbf16, #tpu.memory_space<vmem>>, vector<1x24x64xbf16>
    %11 = vector.shape_cast %10 : vector<1x24x64xbf16> to vector<24x64xbf16>
    %cst_10 = arith.constant dense<0.000000e+00> : vector<24x256xf32>
    %12 = tpu.matmul %11, %8, %cst_10 {dimension_numbers = #tpu.dot_dimension_numbers<[1], [0], [0], [1], [0, 0, 1, 1], [], []>} : vector<24x64xbf16>, vector<64x256xbf16>, vector<24x256xf32> -> vector<24x256xf32>
    %13 = arith.truncf %12 : vector<24x256xf32> to vector<24x256xbf16>
    %c0_11 = arith.constant 0 : index
    %c0_12 = arith.constant 0 : index
    %c0_13 = arith.constant 0 : index
    %14 = vector.load %arg5[%c0_11, %c0_12, %c0_13] : memref<4x256x256xbf16, #tpu.memory_space<vmem>>, vector<1x256x256xbf16>
    %15 = vector.shape_cast %14 : vector<1x256x256xbf16> to vector<256x256xbf16>
    %cst_14 = arith.constant dense<0.000000e+00> : vector<24x256xf32>
    %16 = tpu.matmul %13, %15, %cst_14 {dimension_numbers = #tpu.dot_dimension_numbers<[1], [0], [0], [1], [0, 0, 1, 1], [], []>} : vector<24x256xbf16>, vector<256x256xbf16>, vector<24x256xf32> -> vector<24x256xf32>
    %17 = arith.addf %9, %16 : vector<24x256xf32>
    %c1 = arith.constant 1 : index
    %c0_15 = arith.constant 0 : index
    %c0_16 = arith.constant 0 : index
    %18 = vector.load %arg4[%c1, %c0_15, %c0_16] : memref<4x24x64xbf16, #tpu.memory_space<vmem>>, vector<1x24x64xbf16>
    %19 = vector.shape_cast %18 : vector<1x24x64xbf16> to vector<24x64xbf16>
    %cst_17 = arith.constant dense<0.000000e+00> : vector<24x256xf32>
    %20 = tpu.matmul %19, %8, %cst_17 {dimension_numbers = #tpu.dot_dimension_numbers<[1], [0], [0], [1], [0, 0, 1, 1], [], []>} : vector<24x64xbf16>, vector<64x256xbf16>, vector<24x256xf32> -> vector<24x256xf32>
    %21 = arith.truncf %20 : vector<24x256xf32> to vector<24x256xbf16>
    %c1_18 = arith.constant 1 : index
    %c0_19 = arith.constant 0 : index
    %c0_20 = arith.constant 0 : index
    %22 = vector.load %arg5[%c1_18, %c0_19, %c0_20] : memref<4x256x256xbf16, #tpu.memory_space<vmem>>, vector<1x256x256xbf16>
    %23 = vector.shape_cast %22 : vector<1x256x256xbf16> to vector<256x256xbf16>
    %cst_21 = arith.constant dense<0.000000e+00> : vector<24x256xf32>
    %24 = tpu.matmul %21, %23, %cst_21 {dimension_numbers = #tpu.dot_dimension_numbers<[1], [0], [0], [1], [0, 0, 1, 1], [], []>} : vector<24x256xbf16>, vector<256x256xbf16>, vector<24x256xf32> -> vector<24x256xf32>
    %25 = arith.addf %17, %24 : vector<24x256xf32>
    %c2 = arith.constant 2 : index
    %c0_22 = arith.constant 0 : index
    %c0_23 = arith.constant 0 : index
    %26 = vector.load %arg4[%c2, %c0_22, %c0_23] : memref<4x24x64xbf16, #tpu.memory_space<vmem>>, vector<1x24x64xbf16>
    %27 = vector.shape_cast %26 : vector<1x24x64xbf16> to vector<24x64xbf16>
    %cst_24 = arith.constant dense<0.000000e+00> : vector<24x256xf32>
    %28 = tpu.matmul %27, %8, %cst_24 {dimension_numbers = #tpu.dot_dimension_numbers<[1], [0], [0], [1], [0, 0, 1, 1], [], []>} : vector<24x64xbf16>, vector<64x256xbf16>, vector<24x256xf32> -> vector<24x256xf32>
    %29 = arith.truncf %28 : vector<24x256xf32> to vector<24x256xbf16>
    %c2_25 = arith.constant 2 : index
    %c0_26 = arith.constant 0 : index
    %c0_27 = arith.constant 0 : index
    %30 = vector.load %arg5[%c2_25, %c0_26, %c0_27] : memref<4x256x256xbf16, #tpu.memory_space<vmem>>, vector<1x256x256xbf16>
    %31 = vector.shape_cast %30 : vector<1x256x256xbf16> to vector<256x256xbf16>
    %cst_28 = arith.constant dense<0.000000e+00> : vector<24x256xf32>
    %32 = tpu.matmul %29, %31, %cst_28 {dimension_numbers = #tpu.dot_dimension_numbers<[1], [0], [0], [1], [0, 0, 1, 1], [], []>} : vector<24x256xbf16>, vector<256x256xbf16>, vector<24x256xf32> -> vector<24x256xf32>
    %33 = arith.addf %25, %32 : vector<24x256xf32>
    %c3 = arith.constant 3 : index
    %c0_29 = arith.constant 0 : index
    %c0_30 = arith.constant 0 : index
    %34 = vector.load %arg4[%c3, %c0_29, %c0_30] : memref<4x24x64xbf16, #tpu.memory_space<vmem>>, vector<1x24x64xbf16>
    %35 = vector.shape_cast %34 : vector<1x24x64xbf16> to vector<24x64xbf16>
    %cst_31 = arith.constant dense<0.000000e+00> : vector<24x256xf32>
    %36 = tpu.matmul %35, %8, %cst_31 {dimension_numbers = #tpu.dot_dimension_numbers<[1], [0], [0], [1], [0, 0, 1, 1], [], []>} : vector<24x64xbf16>, vector<64x256xbf16>, vector<24x256xf32> -> vector<24x256xf32>
    %37 = arith.truncf %36 : vector<24x256xf32> to vector<24x256xbf16>
    %c3_32 = arith.constant 3 : index
    %c0_33 = arith.constant 0 : index
    %c0_34 = arith.constant 0 : index
    %38 = vector.load %arg5[%c3_32, %c0_33, %c0_34] : memref<4x256x256xbf16, #tpu.memory_space<vmem>>, vector<1x256x256xbf16>
    %39 = vector.shape_cast %38 : vector<1x256x256xbf16> to vector<256x256xbf16>
    %cst_35 = arith.constant dense<0.000000e+00> : vector<24x256xf32>
    %40 = tpu.matmul %37, %39, %cst_35 {dimension_numbers = #tpu.dot_dimension_numbers<[1], [0], [0], [1], [0, 0, 1, 1], [], []>} : vector<24x256xbf16>, vector<256x256xbf16>, vector<24x256xf32> -> vector<24x256xf32>
    %41 = arith.addf %33, %40 : vector<24x256xf32>
    %c0_36 = arith.constant 0 : index
    %c0_37 = arith.constant 0 : index
    %42 = vector.load %arg6[%c0_36, %c0_37] : memref<1x256xf32, #tpu.memory_space<vmem>>, vector<1x256xf32>
    %43 = vector.broadcast %42 : vector<1x256xf32> to vector<24x256xf32>
    %44 = arith.addf %41, %43 : vector<24x256xf32>
    %cst_38 = arith.constant 0.000000e+00 : f32
    %45 = vector.broadcast %cst_38 : f32 to vector<24x256xf32>
    %46 = arith.maximumf %44, %45 : vector<24x256xf32>
    %47 = arith.truncf %46 : vector<24x256xf32> to vector<24x256xbf16>
    %cst_39 = arith.constant 0.000000e+00 : f32
    %48 = vector.broadcast %cst_39 : f32 to vector<8x128xf32>
    %c0_40 = arith.constant 0 : index
    %c0_41 = arith.constant 0 : index
    %c0_42 = arith.constant 0 : index
    %49 = vector.load %arg7[%c0_40, %c0_41, %c0_42] : memref<3x8x24xbf16, #tpu.memory_space<vmem>>, vector<1x8x24xbf16>
    %50 = vector.shape_cast %49 : vector<1x8x24xbf16> to vector<8x24xbf16>
    %cst_43 = arith.constant dense<0.000000e+00> : vector<8x256xf32>
    %51 = tpu.matmul %50, %47, %cst_43 {dimension_numbers = #tpu.dot_dimension_numbers<[1], [0], [0], [1], [0, 0, 1, 1], [], []>} : vector<8x24xbf16>, vector<24x256xbf16>, vector<8x256xf32> -> vector<8x256xf32>
    %52 = arith.truncf %51 : vector<8x256xf32> to vector<8x256xbf16>
    %c0_44 = arith.constant 0 : index
    %c0_45 = arith.constant 0 : index
    %c0_46 = arith.constant 0 : index
    %53 = vector.load %arg8[%c0_44, %c0_45, %c0_46] : memref<3x256x128xbf16, #tpu.memory_space<vmem>>, vector<1x256x128xbf16>
    %54 = vector.shape_cast %53 : vector<1x256x128xbf16> to vector<256x128xbf16>
    %cst_47 = arith.constant dense<0.000000e+00> : vector<8x128xf32>
    %55 = tpu.matmul %52, %54, %cst_47 {dimension_numbers = #tpu.dot_dimension_numbers<[1], [0], [0], [1], [0, 0, 1, 1], [], []>} : vector<8x256xbf16>, vector<256x128xbf16>, vector<8x128xf32> -> vector<8x128xf32>
    %56 = arith.addf %48, %55 : vector<8x128xf32>
    %c1_48 = arith.constant 1 : index
    %c0_49 = arith.constant 0 : index
    %c0_50 = arith.constant 0 : index
    %57 = vector.load %arg7[%c1_48, %c0_49, %c0_50] : memref<3x8x24xbf16, #tpu.memory_space<vmem>>, vector<1x8x24xbf16>
    %58 = vector.shape_cast %57 : vector<1x8x24xbf16> to vector<8x24xbf16>
    %cst_51 = arith.constant dense<0.000000e+00> : vector<8x256xf32>
    %59 = tpu.matmul %58, %47, %cst_51 {dimension_numbers = #tpu.dot_dimension_numbers<[1], [0], [0], [1], [0, 0, 1, 1], [], []>} : vector<8x24xbf16>, vector<24x256xbf16>, vector<8x256xf32> -> vector<8x256xf32>
    %60 = arith.truncf %59 : vector<8x256xf32> to vector<8x256xbf16>
    %c1_52 = arith.constant 1 : index
    %c0_53 = arith.constant 0 : index
    %c0_54 = arith.constant 0 : index
    %61 = vector.load %arg8[%c1_52, %c0_53, %c0_54] : memref<3x256x128xbf16, #tpu.memory_space<vmem>>, vector<1x256x128xbf16>
    %62 = vector.shape_cast %61 : vector<1x256x128xbf16> to vector<256x128xbf16>
    %cst_55 = arith.constant dense<0.000000e+00> : vector<8x128xf32>
    %63 = tpu.matmul %60, %62, %cst_55 {dimension_numbers = #tpu.dot_dimension_numbers<[1], [0], [0], [1], [0, 0, 1, 1], [], []>} : vector<8x256xbf16>, vector<256x128xbf16>, vector<8x128xf32> -> vector<8x128xf32>
    %64 = arith.addf %56, %63 : vector<8x128xf32>
    %c2_56 = arith.constant 2 : index
    %c0_57 = arith.constant 0 : index
    %c0_58 = arith.constant 0 : index
    %65 = vector.load %arg7[%c2_56, %c0_57, %c0_58] : memref<3x8x24xbf16, #tpu.memory_space<vmem>>, vector<1x8x24xbf16>
    %66 = vector.shape_cast %65 : vector<1x8x24xbf16> to vector<8x24xbf16>
    %cst_59 = arith.constant dense<0.000000e+00> : vector<8x256xf32>
    %67 = tpu.matmul %66, %47, %cst_59 {dimension_numbers = #tpu.dot_dimension_numbers<[1], [0], [0], [1], [0, 0, 1, 1], [], []>} : vector<8x24xbf16>, vector<24x256xbf16>, vector<8x256xf32> -> vector<8x256xf32>
    %68 = arith.truncf %67 : vector<8x256xf32> to vector<8x256xbf16>
    %c2_60 = arith.constant 2 : index
    %c0_61 = arith.constant 0 : index
    %c0_62 = arith.constant 0 : index
    %69 = vector.load %arg8[%c2_60, %c0_61, %c0_62] : memref<3x256x128xbf16, #tpu.memory_space<vmem>>, vector<1x256x128xbf16>
    %70 = vector.shape_cast %69 : vector<1x256x128xbf16> to vector<256x128xbf16>
    %cst_63 = arith.constant dense<0.000000e+00> : vector<8x128xf32>
    %71 = tpu.matmul %68, %70, %cst_63 {dimension_numbers = #tpu.dot_dimension_numbers<[1], [0], [0], [1], [0, 0, 1, 1], [], []>} : vector<8x256xbf16>, vector<256x128xbf16>, vector<8x128xf32> -> vector<8x128xf32>
    %72 = arith.addf %64, %71 : vector<8x128xf32>
    %c0_64 = arith.constant 0 : index
    %c0_65 = arith.constant 0 : index
    %73 = vector.load %arg9[%c0_64, %c0_65] : memref<1x128xf32, #tpu.memory_space<vmem>>, vector<1x128xf32>
    %74 = vector.broadcast %73 : vector<1x128xf32> to vector<8x128xf32>
    %75 = arith.addf %72, %74 : vector<8x128xf32>
    %cst_66 = arith.constant 0.000000e+00 : f32
    %76 = vector.broadcast %cst_66 : f32 to vector<8x128xf32>
    %77 = arith.maximumf %75, %76 : vector<8x128xf32>
    %78 = arith.truncf %77 : vector<8x128xf32> to vector<8x128xbf16>
    %c0_67 = arith.constant 0 : index
    %c0_68 = arith.constant 0 : index
    %79 = vector.load %arg10[%c0_67, %c0_68] : memref<128x1024xbf16, #tpu.memory_space<vmem>>, vector<128x1024xbf16>
    %cst_69 = arith.constant dense<0.000000e+00> : vector<8x1024xf32>
    %80 = tpu.matmul %78, %79, %cst_69 {dimension_numbers = #tpu.dot_dimension_numbers<[1], [0], [0], [1], [0, 0, 1, 1], [], []>} : vector<8x128xbf16>, vector<128x1024xbf16>, vector<8x1024xf32> -> vector<8x1024xf32>
    %c0_70 = arith.constant 0 : index
    %c0_71 = arith.constant 0 : index
    %81 = vector.load %arg11[%c0_70, %c0_71] : memref<1x1024xf32, #tpu.memory_space<vmem>>, vector<1x1024xf32>
    %82 = vector.broadcast %81 : vector<1x1024xf32> to vector<8x1024xf32>
    %83 = arith.addf %80, %82 : vector<8x1024xf32>
    %cst_72 = arith.constant 0.000000e+00 : f32
    %84 = vector.broadcast %cst_72 : f32 to vector<8x1024xf32>
    %85 = arith.maximumf %83, %84 : vector<8x1024xf32>
    %86 = arith.truncf %85 : vector<8x1024xf32> to vector<8x1024xbf16>
    %c0_73 = arith.constant 0 : index
    %c0_74 = arith.constant 0 : index
    %87 = vector.load %arg12[%c0_73, %c0_74] : memref<1024x128xbf16, #tpu.memory_space<vmem>>, vector<1024x128xbf16>
    %cst_75 = arith.constant dense<0.000000e+00> : vector<8x128xf32>
    %88 = tpu.matmul %86, %87, %cst_75 {dimension_numbers = #tpu.dot_dimension_numbers<[1], [0], [0], [1], [0, 0, 1, 1], [], []>} : vector<8x1024xbf16>, vector<1024x128xbf16>, vector<8x128xf32> -> vector<8x128xf32>
    %c0_76 = arith.constant 0 : index
    %c0_77 = arith.constant 0 : index
    %89 = vector.load %arg13[%c0_76, %c0_77] : memref<1x128xf32, #tpu.memory_space<vmem>>, vector<1x128xf32>
    %90 = vector.broadcast %89 : vector<1x128xf32> to vector<8x128xf32>
    %91 = arith.addf %88, %90 : vector<8x128xf32>
    %c0_78 = arith.constant 0 : index
    %c0_79 = arith.constant 0 : index
    %92 = vector.load %arg14[%c0_78, %c0_79] : memref<8x128xf32, #tpu.memory_space<vmem>>, vector<8x128xf32>
    tpu.vector_store %arg14[%c0_78, %c0_79], %91 {strides = array<i32>} : memref<8x128xf32, #tpu.memory_space<vmem>>, vector<8x128xf32>,
    return
  }
  func.func @transform_0(%arg0: i32) -> (i32, i32) {
    %c0_i32 = arith.constant 0 : i32
    %c0_i32_0 = arith.constant 0 : i32
    return %arg0, %c0_i32 : i32, i32
  }
  func.func @transform_1(%arg0: i32) -> (i32, i32) {
    %c0_i32 = arith.constant 0 : i32
    %c0_i32_0 = arith.constant 0 : i32
    %c0_i32_1 = arith.constant 0 : i32
    return %c0_i32, %c0_i32_0 : i32, i32
  }
  func.func @transform_2(%arg0: i32) -> (i32, i32) {
    %c0_i32 = arith.constant 0 : i32
    %c0_i32_0 = arith.constant 0 : i32
    %c0_i32_1 = arith.constant 0 : i32
    return %c0_i32, %c0_i32_0 : i32, i32
  }
  func.func @transform_3(%arg0: i32) -> (i32, i32, i32) {
    %c0_i32 = arith.constant 0 : i32
    %c0_i32_0 = arith.constant 0 : i32
    %c0_i32_1 = arith.constant 0 : i32
    %c0_i32_2 = arith.constant 0 : i32
    return %c0_i32, %c0_i32_0, %c0_i32_1 : i32, i32, i32
  }
  func.func @transform_4(%arg0: i32) -> (i32, i32, i32) {
    %c0_i32 = arith.constant 0 : i32
    %c0_i32_0 = arith.constant 0 : i32
    %c0_i32_1 = arith.constant 0 : i32
    %c0_i32_2 = arith.constant 0 : i32
    return %c0_i32, %c0_i32_0, %c0_i32_1 : i32, i32, i32
  }
  func.func @transform_5(%arg0: i32) -> (i32, i32) {
    %c0_i32 = arith.constant 0 : i32
    %c0_i32_0 = arith.constant 0 : i32
    %c0_i32_1 = arith.constant 0 : i32
    return %c0_i32, %c0_i32_0 : i32, i32
  }
  func.func @transform_6(%arg0: i32) -> (i32, i32, i32) {
    %c0_i32 = arith.constant 0 : i32
    %c0_i32_0 = arith.constant 0 : i32
    %c0_i32_1 = arith.constant 0 : i32
    %c0_i32_2 = arith.constant 0 : i32
    return %c0_i32, %c0_i32_0, %c0_i32_1 : i32, i32, i32
  }
  func.func @transform_7(%arg0: i32) -> (i32, i32, i32) {
    %c0_i32 = arith.constant 0 : i32
    %c0_i32_0 = arith.constant 0 : i32
    %c0_i32_1 = arith.constant 0 : i32
    %c0_i32_2 = arith.constant 0 : i32
    return %c0_i32, %c0_i32_0, %c0_i32_1 : i32, i32, i32
  }
  func.func @transform_8(%arg0: i32) -> (i32, i32) {
    %c0_i32 = arith.constant 0 : i32
    %c0_i32_0 = arith.constant 0 : i32
    %c0_i32_1 = arith.constant 0 : i32
    return %c0_i32, %c0_i32_0 : i32, i32
  }
  func.func @transform_9(%arg0: i32) -> (i32, i32) {
    %c0_i32 = arith.constant 0 : i32
    %c0_i32_0 = arith.constant 0 : i32
    %c0_i32_1 = arith.constant 0 : i32
    return %c0_i32, %c0_i32_0 : i32, i32
  }
  func.func @transform_10(%arg0: i32) -> (i32, i32) {
    %c0_i32 = arith.constant 0 : i32
    %c0_i32_0 = arith.constant 0 : i32
    %c0_i32_1 = arith.constant 0 : i32
    return %c0_i32, %c0_i32_0 : i32, i32
  }
  func.func @transform_11(%arg0: i32) -> (i32, i32) {
    %c0_i32 = arith.constant 0 : i32
    %c0_i32_0 = arith.constant 0 : i32
    %c0_i32_1 = arith.constant 0 : i32
    return %c0_i32, %c0_i32_0 : i32, i32
  }
  func.func @transform_12(%arg0: i32) -> (i32, i32) {
    %c0_i32 = arith.constant 0 : i32
    %c0_i32_0 = arith.constant 0 : i32
    %c0_i32_1 = arith.constant 0 : i32
    return %c0_i32, %c0_i32_0 : i32, i32
  }
  func.func @transform_13(%arg0: i32) -> (i32, i32) {
    %c0_i32 = arith.constant 0 : i32
    %c0_i32_0 = arith.constant 0 : i32
    return %arg0, %c0_i32 : i32, i32
  }
}

</mosaic_0001>

<bundles_post_ra>
// kernel: net_forward.1
= control target key start
LH: loop header
LB: loop body
LE: loop exit
PB: predicated region body
PF: predicated region fallthrough
CT: control target
= control target key end

     0   :  { %s8208_s25 = smov 0   ;;  %s10184_s0 = inlined_call_operand.vmem [shape: bf16[128,2048], index: 0, kind: input, shape index: {}]   ;;  %s10185_s1 = inlined_call_operand.vmem [shape: bf16[2048,256], index: 1, kind: input, shape index: {}]   ;;  %s10186_s2 = inlined_call_operand.vmem [shape: f32[1,256], index: 2, kind: input, shape index: {}]   ;;  %s10187_s3 = inlined_call_operand.vmem [shape: bf16[4,24,64], index: 3, kind: input, shape index: {}]   ;;  %s10188_s4 = inlined_call_operand.vmem [shape: bf16[4,256,256], index: 4, kind: input, shape index: {}]   ;;  %s10189_s5 = inlined_call_operand.vmem [shape: f32[1,256], index: 5, kind: input, shape index: {}]   ;;  %s10190_s6 = inlined_call_operand.vmem [shape: bf16[3,8,24], index: 6, kind: input, shape index: {}]   ;;  %s10191_s7 = inlined_call_operand.vmem [shape: bf16[3,256,128], index: 7, kind: input, shape index: {}]   ;;  %s10192_s8 = inlined_call_operand.vmem [shape: f32[1,128], index: 8, kind: input, shape index: {}]   ;;  %s10193_s9 = inlined_call_operand.vmem [shape: bf16[128,1024], index: 9, kind: input, shape index: {}]   ;;  %s10194_s10 = inlined_call_operand.vmem [shape: f32[1,1024], index: 10, kind: input, shape index: {}]   ;;  %s10195_s11 = inlined_call_operand.vmem [shape: bf16[1024,128], index: 11, kind: input, shape index: {}]   ;;  %s10196_s12 = inlined_call_operand.vmem [shape: f32[1,128], index: 12, kind: input, shape index: {}]   ;;  %s10197_s13 = inlined_call_operand.vmem [shape: f32[16,128], index: 13, kind: output, shape index: {}]  }
   0x1 LB: > { %s8214_s26 = sadd.s32 4294967295, %s8135_s25   ;;  %p6303_p0 = scmp.ge.s32.totalorder %s8135_s25, 1  ;;  %s8135_s25 = sphi %s8208_s25, %s23_s25  }
   0x2   : > { %p389_p1 = scmp.lt.s32.totalorder %s8135_s25, 3 }
   0x4   : > { %p390_p2 = pnand %p6303_p0, %p389_p1 }
   0x5   : > { %v7433_v0 = vld [vmem:[%s10185_s1 + $0x4] ss:$8 sps:$4 sm:$0xff] (!%p390_p2)   ;;  %v7435_v1 = vld [vmem:[%s10185_s1] ss:$8 sps:$4 sm:$0xff] (!%p390_p2)   ;;  %v7436_v2 = vld [vmem:[%s10185_s1 + $0x14] ss:$8 sps:$4 sm:$0xff] (!%p390_p2)  }
   0x6   : > { %393 = sbr.rel (%p390_p2) target bundleno = 2971 (0xb9b), region = 72  ;;  %2377 = vmatprep.subr.bf16.mxu0 (!%p390_p2), %v7433_v0  ;;  %v7438_v3 = vld [vmem:[%s10185_s1 + $0x10] ss:$8 sps:$4 sm:$0xff] (!%p390_p2)   ;;  %v7439_v4 = vld [vmem:[%s10185_s1 + $0x24] ss:$8 sps:$4 sm:$0xff] (!%p390_p2)   ;;  %s6304_s20 = sshll.u32 (!%p390_p2), %s8214_s26, 3 }
   0x7   : > { %2378 = vmatpush1.bf16.msra.mxu0 (!%p390_p2), %v7435_v1  ;;  %v7441_v5 = vld [vmem:[%s10185_s1 + $0x20] ss:$8 sps:$4 sm:$0xff] (!%p390_p2)   ;;  %p434_p3 = scmp.lt.s32.totalorder (!%p390_p2), %s6304_s20, 15  ;;  %v7442_v6 = vld [vmem:[%s10185_s1 + $0x34] ss:$8 sps:$4 sm:$0xff] (!%p390_p2)   ;;  %vm2996_vm0 = vcmask (!%p390_p2), 523264  }
   0x8   : > { %2379 = vmatprep.subr.bf16.mxu0 (!%p390_p2), %v7436_v2  ;;  %v7444_v7 = vld [vmem:[%s10185_s1 + $0x30] ss:$8 sps:$4 sm:$0xff] (!%p390_p2)   ;;  %v7445_v8 = vld [vmem:[%s10185_s1 + $0x44] ss:$8 sps:$4 sm:$0xff] (!%p390_p2)   ;;  %v7447_v9 = vld [vmem:[%s10185_s1 + $0x40] ss:$8 sps:$4 sm:$0xff] (!%p390_p2)  }
   0x9   : > { %v7448_v10 = vld [vmem:[%s10185_s1 + $0x54] ss:$8 sps:$4 sm:$0xff] (!%p390_p2)   ;;  %v7450_v11 = vld [vmem:[%s10185_s1 + $0x50] ss:$8 sps:$4 sm:$0xff] (!%p390_p2)   ;;  %v7451_v12 = vld [vmem:[%s10185_s1 + $0x64] ss:$8 sps:$4 sm:$0xff] (!%p390_p2)  }
   0xa   : > { %v7453_v16 = vld [vmem:[%s10185_s1 + $0x60] ss:$8 sps:$4 sm:$0xff] (!%p390_p2)   ;;  %v7454_v17 = vld [vmem:[%s10185_s1 + $0x74] ss:$8 sps:$4 sm:$0xff] (!%p390_p2)   ;;  %v7456_v18 = vld [vmem:[%s10185_s1 + $0x70] ss:$8 sps:$4 sm:$0xff] (!%p390_p2)  }
   0xb   : > { %2380 = vmatpush1.bf16.msra.mxu0 (!%p390_p2), %v7438_v3  ;;  %v7457_v19 = vld [vmem:[%s10185_s1 + $0x84] ss:$8 sps:$4 sm:$0xff] (!%p390_p2)   ;;  %v7459_v20 = vld [vmem:[%s10185_s1 + $0x80] ss:$8 sps:$4 sm:$0xff] (!%p390_p2)   ;;  %v7460_v21 = vld [vmem:[%s10185_s1 + $0x94] ss:$8 sps:$4 sm:$0xff] (!%p390_p2)  }
   0xc   : > { %2381 = vmatprep.subr.bf16.mxu0 (!%p390_p2), %v7439_v4  ;;  %v7462_v22 = vld [vmem:[%s10185_s1 + $0x90] ss:$8 sps:$4 sm:$0xff] (!%p390_p2)   ;;  %v7463_v23 = vld [vmem:[%s10185_s1 + $0xa4] ss:$8 sps:$4 sm:$0xff] (!%p390_p2)   ;;  %v7465_v24 = vld [vmem:[%s10185_s1 + $0xa0] ss:$8 sps:$4 sm:$0xff] (!%p390_p2)  }
   0xd   : > { %s10199_s20 = smov (!%p434_p3, %s6304_s20), 15  ;;  %v7466_v25 = vld [vmem:[%s10185_s1 + $0xb4] ss:$8 sps:$4 sm:$0xff]   ;;  %v7468_v26 = vld [vmem:[%s10185_s1 + $0xb0] ss:$8 sps:$4 sm:$0xff]   ;;  %vm4297_vm1 = vcmask 1043456  }
   0xe   : > { %s7129_s16 = sshll.u32 %s10199_s20, 6  ;;  %v7469_v27 = vld [vmem:[%s10185_s1 + $0xc4] ss:$8 sps:$4 sm:$0xff]   ;;  %v7471_v28 = vld [vmem:[%s10185_s1 + $0xc0] ss:$8 sps:$4 sm:$0xff]   ;;  %vm4293_vm2 = vcmask 195584  }
   0xf   : > { %2382 = vmatpush1.bf16.msra.mxu0 %v7441_v5  ;;  %s8255_s22 = scalar_lea.vmem %s10184_s0, %s7129_s16  ;;  %v7472_v29 = vld [vmem:[%s10185_s1 + $0xd4] ss:$8 sps:$4 sm:$0xff]   ;;  %v7474_v30 = vld [vmem:[%s10185_s1 + $0xd0] ss:$8 sps:$4 sm:$0xff]   ;;  %v7475_v31 = vld [vmem:[%s10185_s1 + $0xe4] ss:$8 sps:$4 sm:$0xff]  }
  0x10   : > { %2383 = vmatprep.subr.bf16.mxu0 %v7442_v6  ;;  %v445_v13 = vld [vmem:[%s8255_s22] sm:$0xff]  ;;  %v7478_v33 = vld [vmem:[%s10185_s1 + $0xf4] ss:$8 sps:$4 sm:$0xff]   ;;  %v7480_v34 = vld [vmem:[%s10185_s1 + $0xf0] ss:$8 sps:$4 sm:$0xff]   ;;  %p440_p4 = scmp.lt.s32.totalorder %s8214_s26, 1 }
  0x11   : > { %v453_v14 = vld [vmem:[%s8255_s22 + $0x40] sm:$0xff]  ;;  %v7486_v41 = vld [vmem:[%s10185_s1 + $0x114] ss:$8 sps:$4 sm:$0xff]   ;;  %v7484_v42 = vld [vmem:[%s10185_s1 + $0x110] ss:$8 sps:$4 sm:$0xff]  }
  0x12   : > { %v6309_v15 = vcombine.high %v445_v13, %v453_v14  ;;  %v7477_v32 = vld [vmem:[%s10185_s1 + $0xe0] ss:$8 sps:$4 sm:$0xff]   ;;  %v7483_v35 = vld [vmem:[%s10185_s1 + $0x104] ss:$8 sps:$4 sm:$0xff]   ;;  %v6308_v38 = vcombine.low %v445_v13, %v453_v14  ;;  %v7492_v49 = vld [vmem:[%s10185_s1 + $0x134] ss:$8 sps:$4 sm:$0xff]  }
  0x13   : > { %2384 = vmatpush1.bf16.msra.mxu0 %v7444_v7  ;;  %v461_v36 = vld [vmem:[%s8255_s22 + $0x80] sm:$0xff]  ;;  %v7490_v50 = vld [vmem:[%s10185_s1 + $0x130] ss:$8 sps:$4 sm:$0xff]   ;;  %v7498_v56 = vld [vmem:[%s10185_s1 + $0x154] ss:$8 sps:$4 sm:$0xff]   ;;  %s10201_s26 = smov (!%p440_p4, %s8214_s26), 1 }
  0x14   : > { %2385 = vmatprep.subr.bf16.mxu0 %v7445_v8  ;;  %2409 = vmatprep.mubr.bf16.mxu0 %v6309_v15  ;;  %v469_v37 = vld [vmem:[%s8255_s22 + $0xc0] sm:$0xff]  ;;  %v7496_v58 = vld [vmem:[%s10185_s1 + $0x150] ss:$8 sps:$4 sm:$0xff]   ;;  %v446_v60 = vld [vmem:[%s8255_s22 + $0x8] sm:$0xff]  ;;  %s6307_s16 = sshll.u32 %s10201_s26, 3 }
  0x15   : > { %v7481_v39 = vld [vmem:[%s10185_s1 + $0x100] ss:$8 sps:$4 sm:$0xff]   ;;  %v6325_v40 = vcombine.high %v461_v36, %v469_v37  ;;  %v7489_v43 = vld [vmem:[%s10185_s1 + $0x124] ss:$8 sps:$4 sm:$0xff]   ;;  %v6324_v46 = vcombine.low %v461_v36, %v469_v37  ;;  %v7504_v0 = vld [vmem:[%s10185_s1 + $0x174] ss:$8 sps:$4 sm:$0xff]   ;;  %s443_s19 = scalar_lea.vmem %s10197_s13, %s6307_s16 }
  0x16   : > { %v477_v44 = vld [vmem:[%s8255_s22 + $0x100] sm:$0xff]  ;;  %v454_v61 = vld [vmem:[%s8255_s22 + $0x48] sm:$0xff]  ;;  %v7502_v2 = vld [vmem:[%s10185_s1 + $0x170] ss:$8 sps:$4 sm:$0xff]  }
  0x17   : > { %2386 = vmatpush1.bf16.msra.mxu0 %v7447_v9  ;;  %v485_v45 = vld [vmem:[%s8255_s22 + $0x140] sm:$0xff]  ;;  %v6311_v1 = vcombine.high %v446_v60, %v454_v61  ;;  %v7510_v5 = vld [vmem:[%s10185_s1 + $0x194] ss:$8 sps:$4 sm:$0xff]   ;;  %v7508_v6 = vld [vmem:[%s10185_s1 + $0x190] ss:$8 sps:$4 sm:$0xff]  }
  0x18   : > { %2387 = vmatprep.subr.bf16.mxu0 %v7448_v10  ;;  %v7487_v47 = vld [vmem:[%s10185_s1 + $0x120] ss:$8 sps:$4 sm:$0xff]   ;;  %v6341_v48 = vcombine.high %v477_v44, %v485_v45  ;;  %v7495_v51 = vld [vmem:[%s10185_s1 + $0x144] ss:$8 sps:$4 sm:$0xff]   ;;  %v6340_v54 = vcombine.low %v477_v44, %v485_v45  ;;  %v7516_v9 = vld [vmem:[%s10185_s1 + $0x1b4] ss:$8 sps:$4 sm:$0xff]  }
  0x19   : > { %v493_v52 = vld [vmem:[%s8255_s22 + $0x180] sm:$0xff]  ;;  %v7514_v10 = vld [vmem:[%s10185_s1 + $0x1b0] ss:$8 sps:$4 sm:$0xff]   ;;  %v7522_v13 = vld [vmem:[%s10185_s1 + $0x1d4] ss:$8 sps:$4 sm:$0xff]  }
  0x1a   : > { %v501_v53 = vld [vmem:[%s8255_s22 + $0x1c0] sm:$0xff]  ;;  %v7520_v14 = vld [vmem:[%s10185_s1 + $0x1d0] ss:$8 sps:$4 sm:$0xff]   ;;  %v494_v36 = vld [vmem:[%s8255_s22 + $0x188] sm:$0xff] }
  0x1b   : > { %2388 = vmatpush1.bf16.msra.mxu0 %v7450_v11  ;;  %v7493_v55 = vld [vmem:[%s10185_s1 + $0x140] ss:$8 sps:$4 sm:$0xff]   ;;  %v6357_v57 = vcombine.high %v493_v52, %v501_v53  ;;  %v7501_v59 = vld [vmem:[%s10185_s1 + $0x164] ss:$8 sps:$4 sm:$0xff]   ;;  %v6356_v62 = vcombine.low %v493_v52, %v501_v53  ;;  %v447_v44 = vld [vmem:[%s8255_s22 + $0x10] sm:$0xff] }
  0x1c   : > { %2389 = vmatprep.subr.bf16.mxu0 %v7451_v12  ;;  %v7499_v63 = vld [vmem:[%s10185_s1 + $0x160] ss:$8 sps:$4 sm:$0xff]   ;;  %v7507_v3 = vld [vmem:[%s10185_s1 + $0x184] ss:$8 sps:$4 sm:$0xff]   ;;  %v455_v45 = vld [vmem:[%s8255_s22 + $0x50] sm:$0xff] }
  0x1d   : > { %v7505_v4 = vld [vmem:[%s10185_s1 + $0x180] ss:$8 sps:$4 sm:$0xff]   ;;  %v7513_v7 = vld [vmem:[%s10185_s1 + $0x1a4] ss:$8 sps:$4 sm:$0xff]   ;;  %v7558_v53 = vld [vmem:[%s10185_s1 + $0x294] ss:$8 sps:$4 sm:$0xff]  }
  0x1e   : > { %v7511_v8 = vld [vmem:[%s10185_s1 + $0x1a0] ss:$8 sps:$4 sm:$0xff]   ;;  %v7519_v11 = vld [vmem:[%s10185_s1 + $0x1c4] ss:$8 sps:$4 sm:$0xff]  }
  0x1f   : > { %2390 = vmatpush1.bf16.msra.mxu0 %v7453_v16  ;;  %v7517_v12 = vld [vmem:[%s10185_s1 + $0x1c0] ss:$8 sps:$4 sm:$0xff]   ;;  %v7525_v15 = vld [vmem:[%s10185_s1 + $0x1e4] ss:$8 sps:$4 sm:$0xff]  }
  0x20   : > { %2391 = vmatprep.subr.bf16.mxu0 %v7454_v17  ;;  %v7523_v16 = vld [vmem:[%s10185_s1 + $0x1e0] ss:$8 sps:$4 sm:$0xff]   ;;  %v7528_v17 = vld [vmem:[%s10185_s1 + $0x1f4] ss:$8 sps:$4 sm:$0xff]  }
  0x21   : > { %v502_v37 = vld [vmem:[%s8255_s22 + $0x1c8] sm:$0xff] }
  0x22   : > { %v7553_v52 = vld [vmem:[%s10185_s1 + $0x280] ss:$8 sps:$4 sm:$0xff]  }
  0x23   : > { %2392 = vmatpush1.bf16.msra.mxu0 %v7456_v18  ;;  %v7526_v18 = vld [vmem:[%s10185_s1 + $0x1f0] ss:$8 sps:$4 sm:$0xff]  }
  0x24   : > { %2393 = vmatprep.subr.bf16.mxu0 %v7457_v19  ;;  %v7531_v19 = vld [vmem:[%s10185_s1 + $0x204] ss:$8 sps:$4 sm:$0xff]  }
  0x27   : > { %2394 = vmatpush1.bf16.msra.mxu0 %v7459_v20  ;;  %v462_v20 = vld [vmem:[%s8255_s22 + $0x88] sm:$0xff] }
  0x28   : > { %2395 = vmatprep.subr.bf16.mxu0 %v7460_v21  ;;  %v470_v21 = vld [vmem:[%s8255_s22 + $0xc8] sm:$0xff] }
  0x2b   : > { %2396 = vmatpush1.bf16.msra.mxu0 %v7462_v22  ;;  %v6310_v22 = vcombine.low %v446_v60, %v454_v61  ;;  %v7565_v60 = vld [vmem:[%s10185_s1 + $0x2c0] ss:$8 sps:$4 sm:$0xff]   ;;  %v7570_v61 = vld [vmem:[%s10185_s1 + $0x2d4] ss:$8 sps:$4 sm:$0xff]  }
  0x2c   : > { %2397 = vmatprep.subr.bf16.mxu0 %v7463_v23  ;;  %v7529_v23 = vld [vmem:[%s10185_s1 + $0x200] ss:$8 sps:$4 sm:$0xff]  }
  0x2f   : > { %2398 = vmatpush1.bf16.msra.mxu0 %v7465_v24  ;;  %v6327_v24 = vcombine.high %v462_v20, %v470_v21 }
  0x30   : > { %2399 = vmatprep.subr.bf16.mxu0 %v7466_v25  ;;  %v7534_v25 = vld [vmem:[%s10185_s1 + $0x214] ss:$8 sps:$4 sm:$0xff]  }
  0x33   : > { %2400 = vmatpush1.bf16.msra.mxu0 %v7468_v26  ;;  %v7532_v26 = vld [vmem:[%s10185_s1 + $0x210] ss:$8 sps:$4 sm:$0xff]  }
  0x34   : > { %2401 = vmatprep.subr.bf16.mxu0 %v7469_v27  ;;  %v7537_v27 = vld [vmem:[%s10185_s1 + $0x224] ss:$8 sps:$4 sm:$0xff]  }
  0x37   : > { %2402 = vmatpush1.bf16.msra.mxu0 %v7471_v28  ;;  %v478_v28 = vld [vmem:[%s8255_s22 + $0x108] sm:$0xff] }
  0x38   : > { %2403 = vmatprep.subr.bf16.mxu0 %v7472_v29  ;;  %v486_v29 = vld [vmem:[%s8255_s22 + $0x148] sm:$0xff] }
  0x3b   : > { %2404 = vmatpush1.bf16.msra.mxu0 %v7474_v30  ;;  %v6326_v30 = vcombine.low %v462_v20, %v470_v21  ;;  %v495_v20 = vld [vmem:[%s8255_s22 + $0x190] sm:$0xff] }
  0x3c   : > { %2405 = vmatprep.subr.bf16.mxu0 %v7475_v31  ;;  %v7535_v31 = vld [vmem:[%s10185_s1 + $0x220] ss:$8 sps:$4 sm:$0xff]   ;;  %v503_v21 = vld [vmem:[%s8255_s22 + $0x1d0] sm:$0xff] }
  0x3f   : > { %2406 = vmatpush1.bf16.msra.mxu0 %v7477_v32  ;;  %v7540_v32 = vld [vmem:[%s10185_s1 + $0x234] ss:$8 sps:$4 sm:$0xff]  }
  0x40   : > { %2407 = vmatprep.subr.bf16.mxu0 %v7478_v33  ;;  %v6343_v33 = vcombine.high %v478_v28, %v486_v29 }
  0x43   : > { %2408 = vmatpush1.bf16.msra.mxu0 %v7480_v34  ;;  %v7538_v34 = vld [vmem:[%s10185_s1 + $0x230] ss:$8 sps:$4 sm:$0xff]  }
  0x44   : > { %2450 = vmatprep.subr.bf16.mxu0 %v7483_v35  ;;  %v7543_v35 = vld [vmem:[%s10185_s1 + $0x244] ss:$8 sps:$4 sm:$0xff]  }
  0x46   : > { %2410 = vmatmul.mubr.bf16.vlgmr.msra.gmra.mrb[0].mxu0 %v6308_v38  ;;  %v6342_v38 = vcombine.low %v478_v28, %v486_v29  ;;  %v448_v28 = vld [vmem:[%s8255_s22 + $0x18] sm:$0xff] }
  0x47   : > { %2451 = vmatpush1.bf16.msra.mxu0 %v7481_v39  ;;  %2419 = vmatprep.mubr.bf16.mxu0 %v6325_v40  ;;  %v7541_v39 = vld [vmem:[%s10185_s1 + $0x240] ss:$8 sps:$4 sm:$0xff]   ;;  %v7546_v40 = vld [vmem:[%s10185_s1 + $0x254] ss:$8 sps:$4 sm:$0xff]  }
  0x48   : > { %2452 = vmatprep.subr.bf16.mxu0 %v7486_v41  ;;  %v6359_v41 = vcombine.high %v494_v36, %v502_v37  ;;  %v456_v29 = vld [vmem:[%s8255_s22 + $0x58] sm:$0xff] }
  0x4b   : > { %2453 = vmatpush1.bf16.msra.mxu0 %v7484_v42  ;;  %v7544_v42 = vld [vmem:[%s10185_s1 + $0x250] ss:$8 sps:$4 sm:$0xff]  }
  0x4c   : > { %2454 = vmatprep.subr.bf16.mxu0 %v7489_v43  ;;  %v7549_v43 = vld [vmem:[%s10185_s1 + $0x264] ss:$8 sps:$4 sm:$0xff]  }
  0x4e   : > { %2420 = vmatmul.mubr.bf16.gmra.mrb[4].mxu0 %v6324_v46  ;;  %v6358_v46 = vcombine.low %v494_v36, %v502_v37  ;;  %v7601_v36 = vld [vmem:[%s10185_s1 + $0x380] ss:$8 sps:$4 sm:$0xff]   ;;  %v7606_v37 = vld [vmem:[%s10185_s1 + $0x394] ss:$8 sps:$4 sm:$0xff]  }
  0x4f   : > { %2455 = vmatpush1.bf16.msra.mxu0 %v7487_v47  ;;  %2429 = vmatprep.mubr.bf16.mxu0 %v6341_v48  ;;  %v7547_v47 = vld [vmem:[%s10185_s1 + $0x260] ss:$8 sps:$4 sm:$0xff]   ;;  %v7552_v48 = vld [vmem:[%s10185_s1 + $0x274] ss:$8 sps:$4 sm:$0xff]  }
  0x50   : > { %2456 = vmatprep.subr.bf16.mxu0 %v7492_v49  ;;  %v6313_v49 = vcombine.high %v447_v44, %v455_v45 }
  0x53   : > { %2457 = vmatpush1.bf16.msra.mxu0 %v7490_v50  ;;  %v7550_v50 = vld [vmem:[%s10185_s1 + $0x270] ss:$8 sps:$4 sm:$0xff]  }
  0x54   : > { %2458 = vmatprep.subr.bf16.mxu0 %v7495_v51  ;;  %v7555_v51 = vld [vmem:[%s10185_s1 + $0x284] ss:$8 sps:$4 sm:$0xff]  }
  0x56   : > { %2430 = vmatmul.mubr.bf16.gmra.mrb[8].mxu0 %v6340_v54  ;;  %v7556_v54 = vld [vmem:[%s10185_s1 + $0x290] ss:$8 sps:$4 sm:$0xff]  }
  0x57   : > { %2459 = vmatpush1.bf16.msra.mxu0 %v7493_v55  ;;  %2439 = vmatprep.mubr.bf16.mxu0 %v6357_v57  ;;  %v7561_v55 = vld [vmem:[%s10185_s1 + $0x2a4] ss:$8 sps:$4 sm:$0xff]   ;;  %v7564_v57 = vld [vmem:[%s10185_s1 + $0x2b4] ss:$8 sps:$4 sm:$0xff]  }
  0x58   : > { %2460 = vmatprep.subr.bf16.mxu0 %v7498_v56  ;;  %v7559_v56 = vld [vmem:[%s10185_s1 + $0x2a0] ss:$8 sps:$4 sm:$0xff]  }
  0x5b   : > { %2461 = vmatpush1.bf16.msra.mxu0 %v7496_v58  ;;  %v7562_v58 = vld [vmem:[%s10185_s1 + $0x2b0] ss:$8 sps:$4 sm:$0xff]  }
  0x5c   : > { %2462 = vmatprep.subr.bf16.mxu0 %v7501_v59  ;;  %v7567_v59 = vld [vmem:[%s10185_s1 + $0x2c4] ss:$8 sps:$4 sm:$0xff]  }
  0x5e   : > { %2440 = vmatmul.mubr.bf16.gmra.mrb[12].mxu0 %v6356_v62  ;;  %v7568_v62 = vld [vmem:[%s10185_s1 + $0x2d0] ss:$8 sps:$4 sm:$0xff]  }
  0x5f   : > { %2463 = vmatpush1.bf16.msra.mxu0 %v7499_v63  ;;  %2482 = vmatprep.mubr.bf16.mxu0 %v6311_v1  ;;  %v7573_v63 = vld [vmem:[%s10185_s1 + $0x2e4] ss:$8 sps:$4 sm:$0xff]   ;;  %v7576_v1 = vld [vmem:[%s10185_s1 + $0x2f4] ss:$8 sps:$4 sm:$0xff]  }
  0x60   : > { %2464 = vmatprep.subr.bf16.mxu0 %v7504_v0  ;;  %v7571_v0 = vld [vmem:[%s10185_s1 + $0x2e0] ss:$8 sps:$4 sm:$0xff]  }
  0x63   : > { %2465 = vmatpush1.bf16.msra.mxu0 %v7502_v2  ;;  %v7574_v2 = vld [vmem:[%s10185_s1 + $0x2f0] ss:$8 sps:$4 sm:$0xff]  }
  0x64   : > { %2466 = vmatprep.subr.bf16.mxu0 %v7507_v3  ;;  %v7579_v3 = vld [vmem:[%s10185_s1 + $0x304] ss:$8 sps:$4 sm:$0xff]  }
  0x67   : > { %2467 = vmatpush1.bf16.msra.mxu0 %v7505_v4  ;;  %v463_v4 = vld [vmem:[%s8255_s22 + $0x90] sm:$0xff] }
  0x68   : > { %2468 = vmatprep.subr.bf16.mxu0 %v7510_v5  ;;  %v471_v5 = vld [vmem:[%s8255_s22 + $0xd0] sm:$0xff] }
  0x6b   : > { %2469 = vmatpush1.bf16.msra.mxu0 %v7508_v6  ;;  %v6312_v6 = vcombine.low %v447_v44, %v455_v45  ;;  %v7613_v44 = vld [vmem:[%s10185_s1 + $0x3c0] ss:$8 sps:$4 sm:$0xff]   ;;  %v7618_v45 = vld [vmem:[%s10185_s1 + $0x3d4] ss:$8 sps:$4 sm:$0xff]  }
  0x6c   : > { %2470 = vmatprep.subr.bf16.mxu0 %v7513_v7  ;;  %v7577_v7 = vld [vmem:[%s10185_s1 + $0x300] ss:$8 sps:$4 sm:$0xff]  }
  0x6f   : > { %2471 = vmatpush1.bf16.msra.mxu0 %v7511_v8  ;;  %v6329_v8 = vcombine.high %v463_v4, %v471_v5 }
  0x70   : > { %2472 = vmatprep.subr.bf16.mxu0 %v7516_v9  ;;  %v7582_v9 = vld [vmem:[%s10185_s1 + $0x314] ss:$8 sps:$4 sm:$0xff]  }
  0x73   : > { %2473 = vmatpush1.bf16.msra.mxu0 %v7514_v10  ;;  %v7580_v10 = vld [vmem:[%s10185_s1 + $0x310] ss:$8 sps:$4 sm:$0xff]  }
  0x74   : > { %2474 = vmatprep.subr.bf16.mxu0 %v7519_v11  ;;  %v7585_v11 = vld [vmem:[%s10185_s1 + $0x324] ss:$8 sps:$4 sm:$0xff]  }
  0x77   : > { %2475 = vmatpush1.bf16.msra.mxu0 %v7517_v12  ;;  %v479_v12 = vld [vmem:[%s8255_s22 + $0x110] sm:$0xff] }
  0x78   : > { %2476 = vmatprep.subr.bf16.mxu0 %v7522_v13  ;;  %v487_v13 = vld [vmem:[%s8255_s22 + $0x150] sm:$0xff] }
  0x7b   : > { %2477 = vmatpush1.bf16.msra.mxu0 %v7520_v14  ;;  %v6328_v14 = vcombine.low %v463_v4, %v471_v5  ;;  %v496_v4 = vld [vmem:[%s8255_s22 + $0x198] sm:$0xff] }
  0x7c   : > { %2478 = vmatprep.subr.bf16.mxu0 %v7525_v15  ;;  %v7583_v15 = vld [vmem:[%s10185_s1 + $0x320] ss:$8 sps:$4 sm:$0xff]   ;;  %v504_v5 = vld [vmem:[%s8255_s22 + $0x1d8] sm:$0xff] }
  0x7f   : > { %2479 = vmatpush1.bf16.msra.mxu0 %v7523_v16  ;;  %v7588_v16 = vld [vmem:[%s10185_s1 + $0x334] ss:$8 sps:$4 sm:$0xff]  }
  0x80   : > { %2480 = vmatprep.subr.bf16.mxu0 %v7528_v17  ;;  %v6345_v17 = vcombine.high %v479_v12, %v487_v13 }
  0x83   : > { %2481 = vmatpush1.bf16.msra.mxu0 %v7526_v18  ;;  %v7586_v18 = vld [vmem:[%s10185_s1 + $0x330] ss:$8 sps:$4 sm:$0xff]  }
  0x84   : > { %2523 = vmatprep.subr.bf16.mxu0 %v7531_v19  ;;  %v7591_v19 = vld [vmem:[%s10185_s1 + $0x344] ss:$8 sps:$4 sm:$0xff]  }
  0x86   : > { %2483 = vmatmul.mubr.bf16.vlgmr.msra.gmra.mrb[0].mxu0 %v6310_v22  ;;  %v6344_v22 = vcombine.low %v479_v12, %v487_v13  ;;  %v449_v12 = vld [vmem:[%s8255_s22 + $0x20] sm:$0xff] }
  0x87   : > { %2524 = vmatpush1.bf16.msra.mxu0 %v7529_v23  ;;  %2492 = vmatprep.mubr.bf16.mxu0 %v6327_v24  ;;  %v7589_v23 = vld [vmem:[%s10185_s1 + $0x340] ss:$8 sps:$4 sm:$0xff]   ;;  %v7594_v24 = vld [vmem:[%s10185_s1 + $0x354] ss:$8 sps:$4 sm:$0xff]  }
  0x88   : > { %2525 = vmatprep.subr.bf16.mxu0 %v7534_v25  ;;  %v6361_v25 = vcombine.high %v495_v20, %v503_v21  ;;  %v457_v13 = vld [vmem:[%s8255_s22 + $0x60] sm:$0xff] }
  0x8b   : > { %2526 = vmatpush1.bf16.msra.mxu0 %v7532_v26  ;;  %v7592_v26 = vld [vmem:[%s10185_s1 + $0x350] ss:$8 sps:$4 sm:$0xff]  }
  0x8c   : > { %2527 = vmatprep.subr.bf16.mxu0 %v7537_v27  ;;  %v7597_v27 = vld [vmem:[%s10185_s1 + $0x364] ss:$8 sps:$4 sm:$0xff]  }
  0x8e   : > { %2493 = vmatmul.mubr.bf16.gmra.mrb[4].mxu0 %v6326_v30  ;;  %v6360_v30 = vcombine.low %v495_v20, %v503_v21  ;;  %v7649_v20 = vld [vmem:[%s10185_s1 + $0x480] ss:$8 sps:$4 sm:$0xff]   ;;  %v7654_v21 = vld [vmem:[%s10185_s1 + $0x494] ss:$8 sps:$4 sm:$0xff]  }
  0x8f   : > { %2528 = vmatpush1.bf16.msra.mxu0 %v7535_v31  ;;  %2502 = vmatprep.mubr.bf16.mxu0 %v6343_v33  ;;  %v7595_v31 = vld [vmem:[%s10185_s1 + $0x360] ss:$8 sps:$4 sm:$0xff]   ;;  %v6315_v33 = vcombine.high %v448_v28, %v456_v29 }
  0x90   : > { %2529 = vmatprep.subr.bf16.mxu0 %v7540_v32  ;;  %v7600_v32 = vld [vmem:[%s10185_s1 + $0x374] ss:$8 sps:$4 sm:$0xff]  }
  0x93   : > { %2530 = vmatpush1.bf16.msra.mxu0 %v7538_v34  ;;  %v7598_v34 = vld [vmem:[%s10185_s1 + $0x370] ss:$8 sps:$4 sm:$0xff]  }
  0x94   : > { %2531 = vmatprep.subr.bf16.mxu0 %v7543_v35  ;;  %v7603_v35 = vld [vmem:[%s10185_s1 + $0x384] ss:$8 sps:$4 sm:$0xff]  }
  0x96   : > { %2503 = vmatmul.mubr.bf16.gmra.mrb[8].mxu0 %v6342_v38  ;;  %v7604_v38 = vld [vmem:[%s10185_s1 + $0x390] ss:$8 sps:$4 sm:$0xff]  }
  0x97   : > { %2532 = vmatpush1.bf16.msra.mxu0 %v7541_v39  ;;  %2512 = vmatprep.mubr.bf16.mxu0 %v6359_v41  ;;  %v7609_v39 = vld [vmem:[%s10185_s1 + $0x3a4] ss:$8 sps:$4 sm:$0xff]   ;;  %v7612_v41 = vld [vmem:[%s10185_s1 + $0x3b4] ss:$8 sps:$4 sm:$0xff]  }
  0x98   : > { %2533 = vmatprep.subr.bf16.mxu0 %v7546_v40  ;;  %v7607_v40 = vld [vmem:[%s10185_s1 + $0x3a0] ss:$8 sps:$4 sm:$0xff]  }
  0x9b   : > { %2534 = vmatpush1.bf16.msra.mxu0 %v7544_v42  ;;  %v7610_v42 = vld [vmem:[%s10185_s1 + $0x3b0] ss:$8 sps:$4 sm:$0xff]  }
  0x9c   : > { %2535 = vmatprep.subr.bf16.mxu0 %v7549_v43  ;;  %v7615_v43 = vld [vmem:[%s10185_s1 + $0x3c4] ss:$8 sps:$4 sm:$0xff]  }
  0x9e   : > { %2513 = vmatmul.mubr.bf16.gmra.mrb[12].mxu0 %v6358_v46  ;;  %v7616_v46 = vld [vmem:[%s10185_s1 + $0x3d0] ss:$8 sps:$4 sm:$0xff]  }
  0x9f   : > { %2536 = vmatpush1.bf16.msra.mxu0 %v7547_v47  ;;  %2555 = vmatprep.mubr.bf16.mxu0 %v6313_v49  ;;  %v7621_v47 = vld [vmem:[%s10185_s1 + $0x3e4] ss:$8 sps:$4 sm:$0xff]   ;;  %v7624_v49 = vld [vmem:[%s10185_s1 + $0x3f4] ss:$8 sps:$4 sm:$0xff]  }
  0xa0   : > { %2537 = vmatprep.subr.bf16.mxu0 %v7552_v48  ;;  %v7619_v48 = vld [vmem:[%s10185_s1 + $0x3e0] ss:$8 sps:$4 sm:$0xff]  }
  0xa3   : > { %2538 = vmatpush1.bf16.msra.mxu0 %v7550_v50  ;;  %v7622_v50 = vld [vmem:[%s10185_s1 + $0x3f0] ss:$8 sps:$4 sm:$0xff]  }
  0xa4   : > { %2539 = vmatprep.subr.bf16.mxu0 %v7555_v51  ;;  %v7627_v51 = vld [vmem:[%s10185_s1 + $0x404] ss:$8 sps:$4 sm:$0xff]  }
  0xa7   : > { %2540 = vmatpush1.bf16.msra.mxu0 %v7553_v52  ;;  %v464_v52 = vld [vmem:[%s8255_s22 + $0x98] sm:$0xff] }
  0xa8   : > { %2541 = vmatprep.subr.bf16.mxu0 %v7558_v53  ;;  %v472_v53 = vld [vmem:[%s8255_s22 + $0xd8] sm:$0xff] }
  0xab   : > { %2542 = vmatpush1.bf16.msra.mxu0 %v7556_v54  ;;  %v6314_v54 = vcombine.low %v448_v28, %v456_v29  ;;  %v7661_v28 = vld [vmem:[%s10185_s1 + $0x4c0] ss:$8 sps:$4 sm:$0xff]   ;;  %v7666_v29 = vld [vmem:[%s10185_s1 + $0x4d4] ss:$8 sps:$4 sm:$0xff]  }
  0xac   : > { %2543 = vmatprep.subr.bf16.mxu0 %v7561_v55  ;;  %v7625_v55 = vld [vmem:[%s10185_s1 + $0x400] ss:$8 sps:$4 sm:$0xff]  }
  0xaf   : > { %2544 = vmatpush1.bf16.msra.mxu0 %v7559_v56  ;;  %v6331_v56 = vcombine.high %v464_v52, %v472_v53 }
  0xb0   : > { %2545 = vmatprep.subr.bf16.mxu0 %v7564_v57  ;;  %v7630_v57 = vld [vmem:[%s10185_s1 + $0x414] ss:$8 sps:$4 sm:$0xff]  }
  0xb3   : > { %2546 = vmatpush1.bf16.msra.mxu0 %v7562_v58  ;;  %v7628_v58 = vld [vmem:[%s10185_s1 + $0x410] ss:$8 sps:$4 sm:$0xff]  }
  0xb4   : > { %2547 = vmatprep.subr.bf16.mxu0 %v7567_v59  ;;  %v7633_v59 = vld [vmem:[%s10185_s1 + $0x424] ss:$8 sps:$4 sm:$0xff]  }
  0xb7   : > { %2548 = vmatpush1.bf16.msra.mxu0 %v7565_v60  ;;  %v480_v60 = vld [vmem:[%s8255_s22 + $0x118] sm:$0xff] }
  0xb8   : > { %2549 = vmatprep.subr.bf16.mxu0 %v7570_v61  ;;  %v488_v61 = vld [vmem:[%s8255_s22 + $0x158] sm:$0xff] }
  0xbb   : > { %2550 = vmatpush1.bf16.msra.mxu0 %v7568_v62  ;;  %v6330_v62 = vcombine.low %v464_v52, %v472_v53  ;;  %v497_v52 = vld [vmem:[%s8255_s22 + $0x1a0] sm:$0xff] }
  0xbc   : > { %2551 = vmatprep.subr.bf16.mxu0 %v7573_v63  ;;  %v7631_v63 = vld [vmem:[%s10185_s1 + $0x420] ss:$8 sps:$4 sm:$0xff]  }
  0xbd   : > { %v505_v53 = vld [vmem:[%s8255_s22 + $0x1e0] sm:$0xff] }
  0xbf   : > { %2552 = vmatpush1.bf16.msra.mxu0 %v7571_v0  ;;  %v7636_v0 = vld [vmem:[%s10185_s1 + $0x434] ss:$8 sps:$4 sm:$0xff]  }
  0xc0   : > { %2553 = vmatprep.subr.bf16.mxu0 %v7576_v1  ;;  %v6347_v1 = vcombine.high %v480_v60, %v488_v61 }
  0xc3   : > { %2554 = vmatpush1.bf16.msra.mxu0 %v7574_v2  ;;  %v7634_v2 = vld [vmem:[%s10185_s1 + $0x430] ss:$8 sps:$4 sm:$0xff]  }
  0xc4   : > { %2596 = vmatprep.subr.bf16.mxu0 %v7579_v3  ;;  %v7639_v3 = vld [vmem:[%s10185_s1 + $0x444] ss:$8 sps:$4 sm:$0xff]  }
  0xc6   : > { %2556 = vmatmul.mubr.bf16.vlgmr.msra.gmra.mrb[0].mxu0 %v6312_v6  ;;  %v6346_v6 = vcombine.low %v480_v60, %v488_v61  ;;  %v450_v60 = vld [vmem:[%s8255_s22 + $0x28] sm:$0xff] }
  0xc7   : > { %2597 = vmatpush1.bf16.msra.mxu0 %v7577_v7  ;;  %2565 = vmatprep.mubr.bf16.mxu0 %v6329_v8  ;;  %v7637_v7 = vld [vmem:[%s10185_s1 + $0x440] ss:$8 sps:$4 sm:$0xff]   ;;  %v7642_v8 = vld [vmem:[%s10185_s1 + $0x454] ss:$8 sps:$4 sm:$0xff]  }
  0xc8   : > { %2598 = vmatprep.subr.bf16.mxu0 %v7582_v9  ;;  %v6363_v9 = vcombine.high %v496_v4, %v504_v5  ;;  %v458_v61 = vld [vmem:[%s8255_s22 + $0x68] sm:$0xff] }
  0xcb   : > { %2599 = vmatpush1.bf16.msra.mxu0 %v7580_v10  ;;  %v7640_v10 = vld [vmem:[%s10185_s1 + $0x450] ss:$8 sps:$4 sm:$0xff]  }
  0xcc   : > { %2600 = vmatprep.subr.bf16.mxu0 %v7585_v11  ;;  %v7645_v11 = vld [vmem:[%s10185_s1 + $0x464] ss:$8 sps:$4 sm:$0xff]  }
  0xce   : > { %2566 = vmatmul.mubr.bf16.gmra.mrb[4].mxu0 %v6328_v14  ;;  %v6362_v14 = vcombine.low %v496_v4, %v504_v5  ;;  %v7697_v4 = vld [vmem:[%s10185_s1 + $0x580] ss:$8 sps:$4 sm:$0xff]   ;;  %v7702_v5 = vld [vmem:[%s10185_s1 + $0x594] ss:$8 sps:$4 sm:$0xff]  }
  0xcf   : > { %2601 = vmatpush1.bf16.msra.mxu0 %v7583_v15  ;;  %2575 = vmatprep.mubr.bf16.mxu0 %v6345_v17  ;;  %v7643_v15 = vld [vmem:[%s10185_s1 + $0x460] ss:$8 sps:$4 sm:$0xff]   ;;  %v6317_v17 = vcombine.high %v449_v12, %v457_v13 }
  0xd0   : > { %2602 = vmatprep.subr.bf16.mxu0 %v7588_v16  ;;  %v7648_v16 = vld [vmem:[%s10185_s1 + $0x474] ss:$8 sps:$4 sm:$0xff]  }
  0xd3   : > { %2603 = vmatpush1.bf16.msra.mxu0 %v7586_v18  ;;  %v7646_v18 = vld [vmem:[%s10185_s1 + $0x470] ss:$8 sps:$4 sm:$0xff]  }
  0xd4   : > { %2604 = vmatprep.subr.bf16.mxu0 %v7591_v19  ;;  %v7651_v19 = vld [vmem:[%s10185_s1 + $0x484] ss:$8 sps:$4 sm:$0xff]  }
  0xd6   : > { %2576 = vmatmul.mubr.bf16.gmra.mrb[8].mxu0 %v6344_v22  ;;  %v7652_v22 = vld [vmem:[%s10185_s1 + $0x490] ss:$8 sps:$4 sm:$0xff]  }
  0xd7   : > { %2605 = vmatpush1.bf16.msra.mxu0 %v7589_v23  ;;  %2585 = vmatprep.mubr.bf16.mxu0 %v6361_v25  ;;  %v7657_v23 = vld [vmem:[%s10185_s1 + $0x4a4] ss:$8 sps:$4 sm:$0xff]   ;;  %v7660_v25 = vld [vmem:[%s10185_s1 + $0x4b4] ss:$8 sps:$4 sm:$0xff]  }
  0xd8   : > { %2606 = vmatprep.subr.bf16.mxu0 %v7594_v24  ;;  %v7655_v24 = vld [vmem:[%s10185_s1 + $0x4a0] ss:$8 sps:$4 sm:$0xff]  }
  0xdb   : > { %2607 = vmatpush1.bf16.msra.mxu0 %v7592_v26  ;;  %v7658_v26 = vld [vmem:[%s10185_s1 + $0x4b0] ss:$8 sps:$4 sm:$0xff]  }
  0xdc   : > { %2608 = vmatprep.subr.bf16.mxu0 %v7597_v27  ;;  %v7663_v27 = vld [vmem:[%s10185_s1 + $0x4c4] ss:$8 sps:$4 sm:$0xff]  }
  0xde   : > { %2586 = vmatmul.mubr.bf16.gmra.mrb[12].mxu0 %v6360_v30  ;;  %v7664_v30 = vld [vmem:[%s10185_s1 + $0x4d0] ss:$8 sps:$4 sm:$0xff]  }
  0xdf   : > { %2609 = vmatpush1.bf16.msra.mxu0 %v7595_v31  ;;  %2628 = vmatprep.mubr.bf16.mxu0 %v6315_v33  ;;  %v7669_v31 = vld [vmem:[%s10185_s1 + $0x4e4] ss:$8 sps:$4 sm:$0xff]   ;;  %v7672_v33 = vld [vmem:[%s10185_s1 + $0x4f4] ss:$8 sps:$4 sm:$0xff]  }
  0xe0   : > { %2610 = vmatprep.subr.bf16.mxu0 %v7600_v32  ;;  %v7667_v32 = vld [vmem:[%s10185_s1 + $0x4e0] ss:$8 sps:$4 sm:$0xff]  }
  0xe3   : > { %2611 = vmatpush1.bf16.msra.mxu0 %v7598_v34  ;;  %v7670_v34 = vld [vmem:[%s10185_s1 + $0x4f0] ss:$8 sps:$4 sm:$0xff]  }
  0xe4   : > { %2612 = vmatprep.subr.bf16.mxu0 %v7603_v35  ;;  %v7675_v35 = vld [vmem:[%s10185_s1 + $0x504] ss:$8 sps:$4 sm:$0xff]  }
  0xe7   : > { %2613 = vmatpush1.bf16.msra.mxu0 %v7601_v36  ;;  %v465_v36 = vld [vmem:[%s8255_s22 + $0xa0] sm:$0xff] }
  0xe8   : > { %2614 = vmatprep.subr.bf16.mxu0 %v7606_v37  ;;  %v473_v37 = vld [vmem:[%s8255_s22 + $0xe0] sm:$0xff] }
  0xeb   : > { %2615 = vmatpush1.bf16.msra.mxu0 %v7604_v38  ;;  %v6316_v38 = vcombine.low %v449_v12, %v457_v13  ;;  %v7709_v12 = vld [vmem:[%s10185_s1 + $0x5c0] ss:$8 sps:$4 sm:$0xff]   ;;  %v7714_v13 = vld [vmem:[%s10185_s1 + $0x5d4] ss:$8 sps:$4 sm:$0xff]  }
  0xec   : > { %2616 = vmatprep.subr.bf16.mxu0 %v7609_v39  ;;  %v7673_v39 = vld [vmem:[%s10185_s1 + $0x500] ss:$8 sps:$4 sm:$0xff]  }
  0xef   : > { %2617 = vmatpush1.bf16.msra.mxu0 %v7607_v40  ;;  %v6333_v40 = vcombine.high %v465_v36, %v473_v37 }
  0xf0   : > { %2618 = vmatprep.subr.bf16.mxu0 %v7612_v41  ;;  %v7678_v41 = vld [vmem:[%s10185_s1 + $0x514] ss:$8 sps:$4 sm:$0xff]  }
  0xf3   : > { %2619 = vmatpush1.bf16.msra.mxu0 %v7610_v42  ;;  %v7676_v42 = vld [vmem:[%s10185_s1 + $0x510] ss:$8 sps:$4 sm:$0xff]  }
  0xf4   : > { %2620 = vmatprep.subr.bf16.mxu0 %v7615_v43  ;;  %v7681_v43 = vld [vmem:[%s10185_s1 + $0x524] ss:$8 sps:$4 sm:$0xff]  }
  0xf7   : > { %2621 = vmatpush1.bf16.msra.mxu0 %v7613_v44  ;;  %v481_v44 = vld [vmem:[%s8255_s22 + $0x120] sm:$0xff] }
  0xf8   : > { %2622 = vmatprep.subr.bf16.mxu0 %v7618_v45  ;;  %v489_v45 = vld [vmem:[%s8255_s22 + $0x160] sm:$0xff] }
  0xfb   : > { %2623 = vmatpush1.bf16.msra.mxu0 %v7616_v46  ;;  %v6332_v46 = vcombine.low %v465_v36, %v473_v37  ;;  %v498_v36 = vld [vmem:[%s8255_s22 + $0x1a8] sm:$0xff] }
  0xfc   : > { %2624 = vmatprep.subr.bf16.mxu0 %v7621_v47  ;;  %v7679_v47 = vld [vmem:[%s10185_s1 + $0x520] ss:$8 sps:$4 sm:$0xff]  }
  0xfd   : > { %v506_v37 = vld [vmem:[%s8255_s22 + $0x1e8] sm:$0xff] }
  0xff   : > { %2625 = vmatpush1.bf16.msra.mxu0 %v7619_v48  ;;  %v6349_v48 = vcombine.high %v481_v44, %v489_v45 }
 0x100   : > { %2626 = vmatprep.subr.bf16.mxu0 %v7624_v49  ;;  %v7684_v49 = vld [vmem:[%s10185_s1 + $0x534] ss:$8 sps:$4 sm:$0xff]  }
 0x103   : > { %2627 = vmatpush1.bf16.msra.mxu0 %v7622_v50  ;;  %v7682_v50 = vld [vmem:[%s10185_s1 + $0x530] ss:$8 sps:$4 sm:$0xff]  }
 0x104   : > { %2669 = vmatprep.subr.bf16.mxu0 %v7627_v51  ;;  %v7687_v51 = vld [vmem:[%s10185_s1 + $0x544] ss:$8 sps:$4 sm:$0xff]  }
 0x106   : > { %2629 = vmatmul.mubr.bf16.vlgmr.msra.gmra.mrb[0].mxu0 %v6314_v54  ;;  %v6348_v54 = vcombine.low %v481_v44, %v489_v45  ;;  %v451_v44 = vld [vmem:[%s8255_s22 + $0x30] sm:$0xff] }
 0x107   : > { %2670 = vmatpush1.bf16.msra.mxu0 %v7625_v55  ;;  %2638 = vmatprep.mubr.bf16.mxu0 %v6331_v56  ;;  %v7685_v55 = vld [vmem:[%s10185_s1 + $0x540] ss:$8 sps:$4 sm:$0xff]   ;;  %v6365_v56 = vcombine.high %v497_v52, %v505_v53  ;;  %v459_v45 = vld [vmem:[%s8255_s22 + $0x70] sm:$0xff] }
 0x108   : > { %2671 = vmatprep.subr.bf16.mxu0 %v7630_v57  ;;  %v7690_v57 = vld [vmem:[%s10185_s1 + $0x554] ss:$8 sps:$4 sm:$0xff]  }
 0x10b   : > { %2672 = vmatpush1.bf16.msra.mxu0 %v7628_v58  ;;  %v7688_v58 = vld [vmem:[%s10185_s1 + $0x550] ss:$8 sps:$4 sm:$0xff]  }
 0x10c   : > { %2673 = vmatprep.subr.bf16.mxu0 %v7633_v59  ;;  %v7693_v59 = vld [vmem:[%s10185_s1 + $0x564] ss:$8 sps:$4 sm:$0xff]  }
 0x10e   : > { %2639 = vmatmul.mubr.bf16.gmra.mrb[4].mxu0 %v6330_v62  ;;  %v6364_v62 = vcombine.low %v497_v52, %v505_v53  ;;  %v7745_v52 = vld [vmem:[%s10185_s1 + $0x680] ss:$8 sps:$4 sm:$0xff]   ;;  %v7750_v53 = vld [vmem:[%s10185_s1 + $0x694] ss:$8 sps:$4 sm:$0xff]  }
 0x10f   : > { %2674 = vmatpush1.bf16.msra.mxu0 %v7631_v63  ;;  %2648 = vmatprep.mubr.bf16.mxu0 %v6347_v1  ;;  %v7691_v63 = vld [vmem:[%s10185_s1 + $0x560] ss:$8 sps:$4 sm:$0xff]   ;;  %v7696_v1 = vld [vmem:[%s10185_s1 + $0x574] ss:$8 sps:$4 sm:$0xff]  }
 0x110   : > { %2675 = vmatprep.subr.bf16.mxu0 %v7636_v0  ;;  %v6319_v0 = vcombine.high %v450_v60, %v458_v61 }
 0x113   : > { %2676 = vmatpush1.bf16.msra.mxu0 %v7634_v2  ;;  %v7694_v2 = vld [vmem:[%s10185_s1 + $0x570] ss:$8 sps:$4 sm:$0xff]  }
 0x114   : > { %2677 = vmatprep.subr.bf16.mxu0 %v7639_v3  ;;  %v7699_v3 = vld [vmem:[%s10185_s1 + $0x584] ss:$8 sps:$4 sm:$0xff]  }
 0x116   : > { %2649 = vmatmul.mubr.bf16.gmra.mrb[8].mxu0 %v6346_v6  ;;  %v7700_v6 = vld [vmem:[%s10185_s1 + $0x590] ss:$8 sps:$4 sm:$0xff]  }
 0x117   : > { %2678 = vmatpush1.bf16.msra.mxu0 %v7637_v7  ;;  %2658 = vmatprep.mubr.bf16.mxu0 %v6363_v9  ;;  %v7705_v7 = vld [vmem:[%s10185_s1 + $0x5a4] ss:$8 sps:$4 sm:$0xff]   ;;  %v7708_v9 = vld [vmem:[%s10185_s1 + $0x5b4] ss:$8 sps:$4 sm:$0xff]  }
 0x118   : > { %2679 = vmatprep.subr.bf16.mxu0 %v7642_v8  ;;  %v7703_v8 = vld [vmem:[%s10185_s1 + $0x5a0] ss:$8 sps:$4 sm:$0xff]  }
 0x11b   : > { %2680 = vmatpush1.bf16.msra.mxu0 %v7640_v10  ;;  %v7706_v10 = vld [vmem:[%s10185_s1 + $0x5b0] ss:$8 sps:$4 sm:$0xff]  }
 0x11c   : > { %2681 = vmatprep.subr.bf16.mxu0 %v7645_v11  ;;  %v7711_v11 = vld [vmem:[%s10185_s1 + $0x5c4] ss:$8 sps:$4 sm:$0xff]  }
 0x11e   : > { %2659 = vmatmul.mubr.bf16.gmra.mrb[12].mxu0 %v6362_v14  ;;  %v7712_v14 = vld [vmem:[%s10185_s1 + $0x5d0] ss:$8 sps:$4 sm:$0xff]  }
 0x11f   : > { %2682 = vmatpush1.bf16.msra.mxu0 %v7643_v15  ;;  %2701 = vmatprep.mubr.bf16.mxu0 %v6317_v17  ;;  %v7717_v15 = vld [vmem:[%s10185_s1 + $0x5e4] ss:$8 sps:$4 sm:$0xff]   ;;  %v7720_v17 = vld [vmem:[%s10185_s1 + $0x5f4] ss:$8 sps:$4 sm:$0xff]  }
 0x120   : > { %2683 = vmatprep.subr.bf16.mxu0 %v7648_v16  ;;  %v7715_v16 = vld [vmem:[%s10185_s1 + $0x5e0] ss:$8 sps:$4 sm:$0xff]  }
 0x123   : > { %2684 = vmatpush1.bf16.msra.mxu0 %v7646_v18  ;;  %v7718_v18 = vld [vmem:[%s10185_s1 + $0x5f0] ss:$8 sps:$4 sm:$0xff]  }
 0x124   : > { %2685 = vmatprep.subr.bf16.mxu0 %v7651_v19  ;;  %v7723_v19 = vld [vmem:[%s10185_s1 + $0x604] ss:$8 sps:$4 sm:$0xff]  }
 0x127   : > { %2686 = vmatpush1.bf16.msra.mxu0 %v7649_v20  ;;  %v466_v20 = vld [vmem:[%s8255_s22 + $0xa8] sm:$0xff] }
 0x128   : > { %2687 = vmatprep.subr.bf16.mxu0 %v7654_v21  ;;  %v474_v21 = vld [vmem:[%s8255_s22 + $0xe8] sm:$0xff] }
 0x12b   : > { %2688 = vmatpush1.bf16.msra.mxu0 %v7652_v22  ;;  %v6318_v22 = vcombine.low %v450_v60, %v458_v61  ;;  %v7757_v60 = vld [vmem:[%s10185_s1 + $0x6c0] ss:$8 sps:$4 sm:$0xff]   ;;  %v7762_v61 = vld [vmem:[%s10185_s1 + $0x6d4] ss:$8 sps:$4 sm:$0xff]  }
 0x12c   : > { %2689 = vmatprep.subr.bf16.mxu0 %v7657_v23  ;;  %v7721_v23 = vld [vmem:[%s10185_s1 + $0x600] ss:$8 sps:$4 sm:$0xff]  }
 0x12f   : > { %2690 = vmatpush1.bf16.msra.mxu0 %v7655_v24  ;;  %v6335_v24 = vcombine.high %v466_v20, %v474_v21 }
 0x130   : > { %2691 = vmatprep.subr.bf16.mxu0 %v7660_v25  ;;  %v7726_v25 = vld [vmem:[%s10185_s1 + $0x614] ss:$8 sps:$4 sm:$0xff]  }
 0x133   : > { %2692 = vmatpush1.bf16.msra.mxu0 %v7658_v26  ;;  %v7724_v26 = vld [vmem:[%s10185_s1 + $0x610] ss:$8 sps:$4 sm:$0xff]  }
 0x134   : > { %2693 = vmatprep.subr.bf16.mxu0 %v7663_v27  ;;  %v7729_v27 = vld [vmem:[%s10185_s1 + $0x624] ss:$8 sps:$4 sm:$0xff]  }
 0x137   : > { %2694 = vmatpush1.bf16.msra.mxu0 %v7661_v28  ;;  %v482_v28 = vld [vmem:[%s8255_s22 + $0x128] sm:$0xff] }
 0x138   : > { %2695 = vmatprep.subr.bf16.mxu0 %v7666_v29  ;;  %v490_v29 = vld [vmem:[%s8255_s22 + $0x168] sm:$0xff] }
 0x13b   : > { %2696 = vmatpush1.bf16.msra.mxu0 %v7664_v30  ;;  %v6334_v30 = vcombine.low %v466_v20, %v474_v21  ;;  %v499_v20 = vld [vmem:[%s8255_s22 + $0x1b0] sm:$0xff] }
 0x13c   : > { %2697 = vmatprep.subr.bf16.mxu0 %v7669_v31  ;;  %v7727_v31 = vld [vmem:[%s10185_s1 + $0x620] ss:$8 sps:$4 sm:$0xff]   ;;  %v507_v21 = vld [vmem:[%s8255_s22 + $0x1f0] sm:$0xff] }
 0x13f   : > { %2698 = vmatpush1.bf16.msra.mxu0 %v7667_v32  ;;  %v6351_v32 = vcombine.high %v482_v28, %v490_v29 }
 0x140   : > { %2699 = vmatprep.subr.bf16.mxu0 %v7672_v33  ;;  %v7732_v33 = vld [vmem:[%s10185_s1 + $0x634] ss:$8 sps:$4 sm:$0xff]  }
 0x143   : > { %2700 = vmatpush1.bf16.msra.mxu0 %v7670_v34  ;;  %v7730_v34 = vld [vmem:[%s10185_s1 + $0x630] ss:$8 sps:$4 sm:$0xff]  }
 0x144   : > { %2742 = vmatprep.subr.bf16.mxu0 %v7675_v35  ;;  %v7735_v35 = vld [vmem:[%s10185_s1 + $0x644] ss:$8 sps:$4 sm:$0xff]  }
 0x146   : > { %2702 = vmatmul.mubr.bf16.vlgmr.msra.gmra.mrb[0].mxu0 %v6316_v38  ;;  %v6350_v38 = vcombine.low %v482_v28, %v490_v29  ;;  %v452_v28 = vld [vmem:[%s8255_s22 + $0x38] sm:$0xff] }
 0x147   : > { %2743 = vmatpush1.bf16.msra.mxu0 %v7673_v39  ;;  %2711 = vmatprep.mubr.bf16.mxu0 %v6333_v40  ;;  %v7733_v39 = vld [vmem:[%s10185_s1 + $0x640] ss:$8 sps:$4 sm:$0xff]   ;;  %v6367_v40 = vcombine.high %v498_v36, %v506_v37  ;;  %v460_v29 = vld [vmem:[%s8255_s22 + $0x78] sm:$0xff] }
 0x148   : > { %2744 = vmatprep.subr.bf16.mxu0 %v7678_v41  ;;  %v7738_v41 = vld [vmem:[%s10185_s1 + $0x654] ss:$8 sps:$4 sm:$0xff]  }
 0x14b   : > { %2745 = vmatpush1.bf16.msra.mxu0 %v7676_v42  ;;  %v7736_v42 = vld [vmem:[%s10185_s1 + $0x650] ss:$8 sps:$4 sm:$0xff]  }
 0x14c   : > { %2746 = vmatprep.subr.bf16.mxu0 %v7681_v43  ;;  %v7741_v43 = vld [vmem:[%s10185_s1 + $0x664] ss:$8 sps:$4 sm:$0xff]  }
 0x14e   : > { %2712 = vmatmul.mubr.bf16.gmra.mrb[4].mxu0 %v6332_v46  ;;  %v6366_v46 = vcombine.low %v498_v36, %v506_v37  ;;  %v7793_v36 = vld [vmem:[%s10185_s1 + $0x780] ss:$8 sps:$4 sm:$0xff]   ;;  %v7798_v37 = vld [vmem:[%s10185_s1 + $0x794] ss:$8 sps:$4 sm:$0xff]  }
 0x14f   : > { %2747 = vmatpush1.bf16.msra.mxu0 %v7679_v47  ;;  %2721 = vmatprep.mubr.bf16.mxu0 %v6349_v48  ;;  %v7739_v47 = vld [vmem:[%s10185_s1 + $0x660] ss:$8 sps:$4 sm:$0xff]   ;;  %v6321_v48 = vcombine.high %v451_v44, %v459_v45 }
 0x150   : > { %2748 = vmatprep.subr.bf16.mxu0 %v7684_v49  ;;  %v7744_v49 = vld [vmem:[%s10185_s1 + $0x674] ss:$8 sps:$4 sm:$0xff]  }
 0x153   : > { %2749 = vmatpush1.bf16.msra.mxu0 %v7682_v50  ;;  %v7742_v50 = vld [vmem:[%s10185_s1 + $0x670] ss:$8 sps:$4 sm:$0xff]  }
 0x154   : > { %2750 = vmatprep.subr.bf16.mxu0 %v7687_v51  ;;  %v7747_v51 = vld [vmem:[%s10185_s1 + $0x684] ss:$8 sps:$4 sm:$0xff]  }
 0x156   : > { %2722 = vmatmul.mubr.bf16.gmra.mrb[8].mxu0 %v6348_v54  ;;  %v7748_v54 = vld [vmem:[%s10185_s1 + $0x690] ss:$8 sps:$4 sm:$0xff]  }
 0x157   : > { %2751 = vmatpush1.bf16.msra.mxu0 %v7685_v55  ;;  %2731 = vmatprep.mubr.bf16.mxu0 %v6365_v56  ;;  %v7753_v55 = vld [vmem:[%s10185_s1 + $0x6a4] ss:$8 sps:$4 sm:$0xff]   ;;  %v7751_v56 = vld [vmem:[%s10185_s1 + $0x6a0] ss:$8 sps:$4 sm:$0xff]  }
 0x158   : > { %2752 = vmatprep.subr.bf16.mxu0 %v7690_v57  ;;  %v7756_v57 = vld [vmem:[%s10185_s1 + $0x6b4] ss:$8 sps:$4 sm:$0xff]  }
 0x15b   : > { %2753 = vmatpush1.bf16.msra.mxu0 %v7688_v58  ;;  %v7754_v58 = vld [vmem:[%s10185_s1 + $0x6b0] ss:$8 sps:$4 sm:$0xff]  }
 0x15c   : > { %2754 = vmatprep.subr.bf16.mxu0 %v7693_v59  ;;  %v7759_v59 = vld [vmem:[%s10185_s1 + $0x6c4] ss:$8 sps:$4 sm:$0xff]  }
 0x15e   : > { %2732 = vmatmul.mubr.bf16.gmra.mrb[12].mxu0 %v6364_v62  ;;  %v7760_v62 = vld [vmem:[%s10185_s1 + $0x6d0] ss:$8 sps:$4 sm:$0xff]  }
 0x15f   : > { %2755 = vmatpush1.bf16.msra.mxu0 %v7691_v63  ;;  %2774 = vmatprep.mubr.bf16.mxu0 %v6319_v0  ;;  %v7765_v63 = vld [vmem:[%s10185_s1 + $0x6e4] ss:$8 sps:$4 sm:$0xff]   ;;  %v7763_v0 = vld [vmem:[%s10185_s1 + $0x6e0] ss:$8 sps:$4 sm:$0xff]  }
 0x160   : > { %2756 = vmatprep.subr.bf16.mxu0 %v7696_v1  ;;  %v7768_v1 = vld [vmem:[%s10185_s1 + $0x6f4] ss:$8 sps:$4 sm:$0xff]  }
 0x163   : > { %2757 = vmatpush1.bf16.msra.mxu0 %v7694_v2  ;;  %v7766_v2 = vld [vmem:[%s10185_s1 + $0x6f0] ss:$8 sps:$4 sm:$0xff]  }
 0x164   : > { %2758 = vmatprep.subr.bf16.mxu0 %v7699_v3  ;;  %v7771_v3 = vld [vmem:[%s10185_s1 + $0x704] ss:$8 sps:$4 sm:$0xff]  }
 0x167   : > { %2759 = vmatpush1.bf16.msra.mxu0 %v7697_v4  ;;  %v467_v4 = vld [vmem:[%s8255_s22 + $0xb0] sm:$0xff] }
 0x168   : > { %2760 = vmatprep.subr.bf16.mxu0 %v7702_v5  ;;  %v475_v5 = vld [vmem:[%s8255_s22 + $0xf0] sm:$0xff] }
 0x16b   : > { %2761 = vmatpush1.bf16.msra.mxu0 %v7700_v6  ;;  %v6320_v6 = vcombine.low %v451_v44, %v459_v45  ;;  %v7805_v44 = vld [vmem:[%s10185_s1 + $0x7c0] ss:$8 sps:$4 sm:$0xff]   ;;  %v7810_v45 = vld [vmem:[%s10185_s1 + $0x7d4] ss:$8 sps:$4 sm:$0xff]  }
 0x16c   : > { %2762 = vmatprep.subr.bf16.mxu0 %v7705_v7  ;;  %v7769_v7 = vld [vmem:[%s10185_s1 + $0x700] ss:$8 sps:$4 sm:$0xff]  }
 0x16f   : > { %2763 = vmatpush1.bf16.msra.mxu0 %v7703_v8  ;;  %v6337_v8 = vcombine.high %v467_v4, %v475_v5 }
 0x170   : > { %2764 = vmatprep.subr.bf16.mxu0 %v7708_v9  ;;  %v7774_v9 = vld [vmem:[%s10185_s1 + $0x714] ss:$8 sps:$4 sm:$0xff]  }
 0x173   : > { %2765 = vmatpush1.bf16.msra.mxu0 %v7706_v10  ;;  %v7772_v10 = vld [vmem:[%s10185_s1 + $0x710] ss:$8 sps:$4 sm:$0xff]  }
 0x174   : > { %2766 = vmatprep.subr.bf16.mxu0 %v7711_v11  ;;  %v7777_v11 = vld [vmem:[%s10185_s1 + $0x724] ss:$8 sps:$4 sm:$0xff]  }
 0x177   : > { %2767 = vmatpush1.bf16.msra.mxu0 %v7709_v12  ;;  %v483_v12 = vld [vmem:[%s8255_s22 + $0x130] sm:$0xff] }
 0x178   : > { %2768 = vmatprep.subr.bf16.mxu0 %v7714_v13  ;;  %v491_v13 = vld [vmem:[%s8255_s22 + $0x170] sm:$0xff] }
 0x17b   : > { %2769 = vmatpush1.bf16.msra.mxu0 %v7712_v14  ;;  %v6336_v14 = vcombine.low %v467_v4, %v475_v5  ;;  %v765_v4 = vld [vmem:[%s10186_s2] sm:$0x3] }
 0x17c   : > { %2770 = vmatprep.subr.bf16.mxu0 %v7717_v15  ;;  %v7775_v15 = vld [vmem:[%s10185_s1 + $0x720] ss:$8 sps:$4 sm:$0xff]  }
 0x17f   : > { %2771 = vmatpush1.bf16.msra.mxu0 %v7715_v16  ;;  %v6353_v16 = vcombine.high %v483_v12, %v491_v13 }
 0x180   : > { %2772 = vmatprep.subr.bf16.mxu0 %v7720_v17  ;;  %v7780_v17 = vld [vmem:[%s10185_s1 + $0x734] ss:$8 sps:$4 sm:$0xff]  }
 0x183   : > { %2773 = vmatpush1.bf16.msra.mxu0 %v7718_v18  ;;  %v7778_v18 = vld [vmem:[%s10185_s1 + $0x730] ss:$8 sps:$4 sm:$0xff]  }
 0x184   : > { %2815 = vmatprep.subr.bf16.mxu0 %v7723_v19  ;;  %v7783_v19 = vld [vmem:[%s10185_s1 + $0x744] ss:$8 sps:$4 sm:$0xff]  }
 0x186   : > { %2775 = vmatmul.mubr.bf16.vlgmr.msra.gmra.mrb[0].mxu0 %v6318_v22  ;;  %v6352_v22 = vcombine.low %v483_v12, %v491_v13 }
 0x187   : > { %2816 = vmatpush1.bf16.msra.mxu0 %v7721_v23  ;;  %2784 = vmatprep.mubr.bf16.mxu0 %v6335_v24  ;;  %v7781_v23 = vld [vmem:[%s10185_s1 + $0x740] ss:$8 sps:$4 sm:$0xff]   ;;  %v6369_v24 = vcombine.high %v499_v20, %v507_v21 }
 0x188   : > { %2817 = vmatprep.subr.bf16.mxu0 %v7726_v25  ;;  %v7786_v25 = vld [vmem:[%s10185_s1 + $0x754] ss:$8 sps:$4 sm:$0xff]  }
 0x18b   : > { %2818 = vmatpush1.bf16.msra.mxu0 %v7724_v26  ;;  %v7784_v26 = vld [vmem:[%s10185_s1 + $0x750] ss:$8 sps:$4 sm:$0xff]  }
 0x18c   : > { %2819 = vmatprep.subr.bf16.mxu0 %v7729_v27  ;;  %v7789_v27 = vld [vmem:[%s10185_s1 + $0x764] ss:$8 sps:$4 sm:$0xff]  }
 0x18e   : > { %2785 = vmatmul.mubr.bf16.gmra.mrb[4].mxu0 %v6334_v30  ;;  %v6368_v30 = vcombine.low %v499_v20, %v507_v21 }
 0x18f   : > { %2820 = vmatpush1.bf16.msra.mxu0 %v7727_v31  ;;  %2794 = vmatprep.mubr.bf16.mxu0 %v6351_v32  ;;  %v7787_v31 = vld [vmem:[%s10185_s1 + $0x760] ss:$8 sps:$4 sm:$0xff]   ;;  %v6323_v32 = vcombine.high %v452_v28, %v460_v29 }
 0x190   : > { %2821 = vmatprep.subr.bf16.mxu0 %v7732_v33  ;;  %v7792_v33 = vld [vmem:[%s10185_s1 + $0x774] ss:$8 sps:$4 sm:$0xff]  }
 0x193   : > { %2822 = vmatpush1.bf16.msra.mxu0 %v7730_v34  ;;  %v7790_v34 = vld [vmem:[%s10185_s1 + $0x770] ss:$8 sps:$4 sm:$0xff]  }
 0x194   : > { %2823 = vmatprep.subr.bf16.mxu0 %v7735_v35  ;;  %v7795_v35 = vld [vmem:[%s10185_s1 + $0x784] ss:$8 sps:$4 sm:$0xff]  }
 0x196   : > { %2795 = vmatmul.mubr.bf16.gmra.mrb[8].mxu0 %v6350_v38  ;;  %v7796_v38 = vld [vmem:[%s10185_s1 + $0x790] ss:$8 sps:$4 sm:$0xff]  }
 0x197   : > { %2824 = vmatpush1.bf16.msra.mxu0 %v7733_v39  ;;  %2804 = vmatprep.mubr.bf16.mxu0 %v6367_v40  ;;  %v7801_v39 = vld [vmem:[%s10185_s1 + $0x7a4] ss:$8 sps:$4 sm:$0xff]   ;;  %v7799_v40 = vld [vmem:[%s10185_s1 + $0x7a0] ss:$8 sps:$4 sm:$0xff]  }
 0x198   : > { %2825 = vmatprep.subr.bf16.mxu0 %v7738_v41  ;;  %v7804_v41 = vld [vmem:[%s10185_s1 + $0x7b4] ss:$8 sps:$4 sm:$0xff]  }
 0x19b   : > { %2826 = vmatpush1.bf16.msra.mxu0 %v7736_v42  ;;  %v7802_v42 = vld [vmem:[%s10185_s1 + $0x7b0] ss:$8 sps:$4 sm:$0xff]  }
 0x19c   : > { %2827 = vmatprep.subr.bf16.mxu0 %v7741_v43  ;;  %v7807_v43 = vld [vmem:[%s10185_s1 + $0x7c4] ss:$8 sps:$4 sm:$0xff]  }
 0x19e   : > { %2805 = vmatmul.mubr.bf16.gmra.mrb[12].mxu0 %v6366_v46  ;;  %v7808_v46 = vld [vmem:[%s10185_s1 + $0x7d0] ss:$8 sps:$4 sm:$0xff]  }
 0x19f   : > { %2828 = vmatpush1.bf16.msra.mxu0 %v7739_v47  ;;  %2847 = vmatprep.mubr.bf16.mxu0 %v6321_v48  ;;  %v7813_v47 = vld [vmem:[%s10185_s1 + $0x7e4] ss:$8 sps:$4 sm:$0xff]   ;;  %v7811_v48 = vld [vmem:[%s10185_s1 + $0x7e0] ss:$8 sps:$4 sm:$0xff]  }
 0x1a0   : > { %2829 = vmatprep.subr.bf16.mxu0 %v7744_v49  ;;  %v7816_v49 = vld [vmem:[%s10185_s1 + $0x7f4] ss:$8 sps:$4 sm:$0xff]  }
 0x1a3   : > { %2830 = vmatpush1.bf16.msra.mxu0 %v7742_v50  ;;  %v7814_v50 = vld [vmem:[%s10185_s1 + $0x7f0] ss:$8 sps:$4 sm:$0xff]  }
 0x1a4   : > { %2831 = vmatprep.subr.bf16.mxu0 %v7747_v51  ;;  %v468_v51 = vld [vmem:[%s8255_s22 + $0xb8] sm:$0xff] }
 0x1a7   : > { %2832 = vmatpush1.bf16.msra.mxu0 %v7745_v52  ;;  %v476_v52 = vld [vmem:[%s8255_s22 + $0xf8] sm:$0xff] }
 0x1a8   : > { %2833 = vmatprep.subr.bf16.mxu0 %v7750_v53  ;;  %v6322_v53 = vcombine.low %v452_v28, %v460_v29 }
 0x1ab   : > { %2834 = vmatpush1.bf16.msra.mxu0 %v7748_v54  ;;  %v6339_v54 = vcombine.high %v468_v51, %v476_v52 }
 0x1ac   : > { %2835 = vmatprep.subr.bf16.mxu0 %v7753_v55  ;;  %v484_v55 = vld [vmem:[%s8255_s22 + $0x138] sm:$0xff] }
 0x1af   : > { %2836 = vmatpush1.bf16.msra.mxu0 %v7751_v56  ;;  %v492_v56 = vld [vmem:[%s8255_s22 + $0x178] sm:$0xff] }
 0x1b0   : > { %2837 = vmatprep.subr.bf16.mxu0 %v7756_v57  ;;  %v6338_v57 = vcombine.low %v468_v51, %v476_v52 }
 0x1b3   : > { %2838 = vmatpush1.bf16.msra.mxu0 %v7754_v58  ;;  %v6355_v58 = vcombine.high %v484_v55, %v492_v56 }
 0x1b4   : > { %2839 = vmatprep.subr.bf16.mxu0 %v7759_v59  ;;  %v500_v59 = vld [vmem:[%s8255_s22 + $0x1b8] sm:$0xff] }
 0x1b7   : > { %2840 = vmatpush1.bf16.msra.mxu0 %v7757_v60  ;;  %v508_v60 = vld [vmem:[%s8255_s22 + $0x1f8] sm:$0xff] }
 0x1b8   : > { %2841 = vmatprep.subr.bf16.mxu0 %v7762_v61  ;;  %v6354_v61 = vcombine.low %v484_v55, %v492_v56 }
 0x1bb   : > { %2842 = vmatpush1.bf16.msra.mxu0 %v7760_v62  ;;  %v6371_v62 = vcombine.high %v500_v59, %v508_v60 }
 0x1bc   : > { %2843 = vmatprep.subr.bf16.mxu0 %v7765_v63  ;;  %v6370_v63 = vcombine.low %v500_v59, %v508_v60 }
 0x1bf   : > { %2844 = vmatpush1.bf16.msra.mxu0 %v7763_v0  ;;  %v8137_v0 = vmov 0  }
 0x1c0   : > { %2845 = vmatprep.subr.bf16.mxu0 %v7768_v1  ;;  %3035 = vmatprep.mubr.bf16.mxu1 %v8137_v0  ;;  %v767_v1 = vlaneseq }
 0x1c3   : > { %2846 = vmatpush1.bf16.msra.mxu0 %v7766_v2  ;;  %v9058_v2 = vshrl.u32 %v767_v1, 7  ;;  %v7817_v1 = vld [vmem:[%s10187_s3] sm:$0xff]  }
 0x1c4   : > { %2888 = vmatprep.subr.bf16.mxu0 %v7771_v3 }
 0x1c5   : > { %v9061_v3 = vsub.s32 0, %v9058_v2  ;;  %v9067_v5 = vsub.s32 1, %v9058_v2 }
 0x1c6   : > { %2848 = vmatmul.mubr.bf16.vlgmr.msra.gmra.mrb[0].mxu0 %v6320_v6 }
 0x1c7   : > { %2889 = vmatpush1.bf16.msra.mxu0 %v7769_v7  ;;  %2857 = vmatprep.mubr.bf16.mxu0 %v6337_v8  ;;  %v770_v6 = vrot.slane %v765_v4, %v9061_v3  ;;  %v774_v7 = vrot.slane %v765_v4, %v9067_v5  ;;  %v7818_v4 = vld [vmem:[%s10187_s3 + $0x8] ss:$0 sps:$4 sm:$0xff]  }
 0x1c8   : > { %2890 = vmatprep.subr.bf16.mxu0 %v7774_v9 }
 0x1cb   : > { %2891 = vmatpush1.bf16.msra.mxu0 %v7772_v10 }
 0x1cc   : > { %2892 = vmatprep.subr.bf16.mxu0 %v7777_v11 }
 0x1ce   : > { %2858 = vmatmul.mubr.bf16.gmra.mrb[4].mxu0 %v6336_v14 }
 0x1cf   : > { %2893 = vmatpush1.bf16.msra.mxu0 %v7775_v15  ;;  %2867 = vmatprep.mubr.bf16.mxu0 %v6353_v16 }
 0x1d0   : > { %2894 = vmatprep.subr.bf16.mxu0 %v7780_v17 }
 0x1d3   : > { %2895 = vmatpush1.bf16.msra.mxu0 %v7778_v18 }
 0x1d4   : > { %2896 = vmatprep.subr.bf16.mxu0 %v7783_v19 }
 0x1d6   : > { %2868 = vmatmul.mubr.bf16.gmra.mrb[8].mxu0 %v6352_v22 }
 0x1d7   : > { %2897 = vmatpush1.bf16.msra.mxu0 %v7781_v23  ;;  %2877 = vmatprep.mubr.bf16.mxu0 %v6369_v24 }
 0x1d8   : > { %2898 = vmatprep.subr.bf16.mxu0 %v7786_v25 }
 0x1db   : > { %2899 = vmatpush1.bf16.msra.mxu0 %v7784_v26 }
 0x1dc   : > { %2900 = vmatprep.subr.bf16.mxu0 %v7789_v27 }
 0x1de   : > { %2878 = vmatmul.mubr.bf16.gmra.mrb[12].mxu0 %v6368_v30 }
 0x1df   : > { %2901 = vmatpush1.bf16.msra.mxu0 %v7787_v31  ;;  %2920 = vmatprep.mubr.bf16.mxu0 %v6323_v32 }
 0x1e0   : > { %2902 = vmatprep.subr.bf16.mxu0 %v7792_v33 }
 0x1e3   : > { %2903 = vmatpush1.bf16.msra.mxu0 %v7790_v34 }
 0x1e4   : > { %2904 = vmatprep.subr.bf16.mxu0 %v7795_v35 }
 0x1e7   : > { %2905 = vmatpush1.bf16.msra.mxu0 %v7793_v36 }
 0x1e8   : > { %2906 = vmatprep.subr.bf16.mxu0 %v7798_v37 }
 0x1eb   : > { %2907 = vmatpush1.bf16.msra.mxu0 %v7796_v38 }
 0x1ec   : > { %2908 = vmatprep.subr.bf16.mxu0 %v7801_v39 }
 0x1ef   : > { %2909 = vmatpush1.bf16.msra.mxu0 %v7799_v40 }
 0x1f0   : > { %2910 = vmatprep.subr.bf16.mxu0 %v7804_v41 }
 0x1f3   : > { %2911 = vmatpush1.bf16.msra.mxu0 %v7802_v42 }
 0x1f4   : > { %2912 = vmatprep.subr.bf16.mxu0 %v7807_v43 }
 0x1f7   : > { %2913 = vmatpush1.bf16.msra.mxu0 %v7805_v44 }
 0x1f8   : > { %2914 = vmatprep.subr.bf16.mxu0 %v7810_v45 }
 0x1fb   : > { %2915 = vmatpush1.bf16.msra.mxu0 %v7808_v46 }
 0x1fc   : > { %2916 = vmatprep.subr.bf16.mxu0 %v7813_v47 }
 0x1ff   : > { %2917 = vmatpush1.bf16.msra.mxu0 %v7811_v48 }
 0x200   : > { %2918 = vmatprep.subr.bf16.mxu0 %v7816_v49 }
 0x203   : > { %2919 = vmatpush1.bf16.msra.mxu0 %v7814_v50 }
 0x206   : > { %2921 = vmatmul.mubr.bf16.vlgmr.msra.gmra.mrb[0].mxu0 %v6322_v53 }
 0x207   : > { %2930 = vmatprep.mubr.bf16.mxu0 %v6339_v54 }
 0x20e   : > { %2931 = vmatmul.mubr.bf16.gmra.mrb[4].mxu0 %v6338_v57 }
 0x20f   : > { %2940 = vmatprep.mubr.bf16.mxu0 %v6355_v58 }
 0x216   : > { %2941 = vmatmul.mubr.bf16.gmra.mrb[8].mxu0 %v6354_v61 }
 0x217   : > { %2950 = vmatprep.mubr.bf16.mxu0 %v6371_v62 }
 0x21e   : > { %2951 = vmatmul.mubr.bf16.gmra.mrb[12].mxu0 %v6370_v63 }
 0x21f   : > { %5500 = vmatprep.mubr.bf16.mxu0 %v8137_v0 }
 0x2d9   : > { %v2922_v8 = vpop.f32.mrb[0].mxu0 }
 0x2da   : > { %v7284_v9 = vadd.f32 %v2922_v8, %v770_v6  ;;  %v2924_v10 = vpop.f32.mrb[1].mxu0  ;;  %v7821_v8 = vld [vmem:[%s10188_s4 + $0x100] ss:$8 sps:$4 sm:$0xff]  }
 0x2db   : > { %v7285_v11 = vadd.f32 %v2924_v10, %v774_v7  ;;  %v2926_v12 = vpop.f32.mrb[2].mxu0  ;;  %v7824_v10 = vld [vmem:[%s10188_s4 + $0x110] ss:$8 sps:$4 sm:$0xff]  }
 0x2dc   : > { %v7286_v13 = vadd.f32 %v2926_v12, %v770_v6  ;;  %v2928_v14 = vpop.f32.mrb[3].mxu0  ;;  %v2961_v16 = vmax.f32 %v7284_v9, 0.0  ;;  %v7826_v9 = vld [vmem:[%s10188_s4 + $0x114] ss:$8 sps:$4 sm:$0xff]  }
 0x2dd   : > { %v7287_v15 = vadd.f32 %v2928_v14, %v774_v7  ;;  %v2962_v18 = vmax.f32 %v7285_v11, 0.0  ;;  %v7829_v11 = vld [vmem:[%s10188_s4 + $0x124] ss:$8 sps:$4 sm:$0xff]   ;;  %v7820_v12 = vld [vmem:[%s10187_s3 + $0x14] ss:$0 sps:$4 sm:$0xff]  }
 0x2de   : > { %v2963_v17 = vmax.f32 %v7286_v13, 0.0  ;;  %v7827_v13 = vld [vmem:[%s10188_s4 + $0x120] ss:$8 sps:$4 sm:$0xff]   ;;  %v7832_v14 = vld [vmem:[%s10188_s4 + $0x134] ss:$8 sps:$4 sm:$0xff]  }
 0x2df   : > { %v2964_v19 = vmax.f32 %v7287_v15, 0.0  ;;  %v7830_v15 = vld [vmem:[%s10188_s4 + $0x130] ss:$8 sps:$4 sm:$0xff]  }
 0x2e0   : > { %v9071_v20 = vpack.c.bf16 %v2963_v17, %v2961_v16  ;;  %v7835_v16 = vld [vmem:[%s10188_s4 + $0x144] ss:$8 sps:$4 sm:$0xff]   ;;  %v7833_v17 = vld [vmem:[%s10188_s4 + $0x140] ss:$8 sps:$4 sm:$0xff]  }
 0x2e1   : > { %v9073_v21 = vpack.c.bf16 %v2964_v19, %v2962_v18  ;;  %v2932_v22 = vpop.f32.mrb[4].mxu0  ;;  %v7838_v18 = vld [vmem:[%s10188_s4 + $0x154] ss:$8 sps:$4 sm:$0xff]   ;;  %v7836_v19 = vld [vmem:[%s10188_s4 + $0x150] ss:$8 sps:$4 sm:$0xff]  }
 0x2e2   : > { %v7288_v23 = vadd.f32 %v2932_v22, %v770_v6  ;;  %v2934_v24 = vpop.f32.mrb[5].mxu0  ;;  %v7841_v22 = vld [vmem:[%s10188_s4 + $0x164] ss:$8 sps:$4 sm:$0xff]  }
 0x2e3   : > { %v7289_v25 = vadd.f32 %v2934_v24, %v774_v7  ;;  %v2936_v26 = vpop.f32.mrb[6].mxu0  ;;  %3003 = vmatprep.subr.bf16.mxu1 %v9073_v21  ;;  %v7844_v24 = vld [vmem:[%s10188_s4 + $0x174] ss:$8 sps:$4 sm:$0xff]  }
 0x2e4   : > { %v7290_v27 = vadd.f32 %v2936_v26, %v770_v6  ;;  %v2938_v28 = vpop.f32.mrb[7].mxu0  ;;  %3004 = vmatpush1.bf16.msra.mxu1 %v9071_v20  ;;  %v2965_v30 = vmax.f32 %v7288_v23, 0.0  ;;  %v7839_v23 = vld [vmem:[%s10188_s4 + $0x160] ss:$8 sps:$4 sm:$0xff]   ;;  %v7847_v26 = vld [vmem:[%s10188_s4 + $0x184] ss:$8 sps:$4 sm:$0xff]  }
 0x2e5   : > { %v7291_v29 = vadd.f32 %v2938_v28, %v774_v7  ;;  %v2966_v32 = vmax.f32 %v7289_v25, 0.0  ;;  %v7842_v25 = vld [vmem:[%s10188_s4 + $0x170] ss:$8 sps:$4 sm:$0xff]   ;;  %v7850_v28 = vld [vmem:[%s10188_s4 + $0x194] ss:$8 sps:$4 sm:$0xff]  }
 0x2e6   : > { %v2967_v31 = vmax.f32 %v7290_v27, 0.0  ;;  %v7845_v27 = vld [vmem:[%s10188_s4 + $0x180] ss:$8 sps:$4 sm:$0xff]  }
 0x2e7   : > { %v2968_v33 = vmax.f32 %v7291_v29, 0.0  ;;  %v7848_v29 = vld [vmem:[%s10188_s4 + $0x190] ss:$8 sps:$4 sm:$0xff]  }
 0x2e8   : > { %v9077_v34 = vpack.c.bf16 %v2967_v31, %v2965_v30  ;;  %v7853_v30 = vld [vmem:[%s10188_s4 + $0x1a4] ss:$8 sps:$4 sm:$0xff]   ;;  %v7851_v31 = vld [vmem:[%s10188_s4 + $0x1a0] ss:$8 sps:$4 sm:$0xff]  }
 0x2e9   : > { %v9079_v35 = vpack.c.bf16 %v2968_v33, %v2966_v32  ;;  %v2942_v36 = vpop.f32.mrb[8].mxu0  ;;  %v7856_v32 = vld [vmem:[%s10188_s4 + $0x1b4] ss:$8 sps:$4 sm:$0xff]   ;;  %v7854_v33 = vld [vmem:[%s10188_s4 + $0x1b0] ss:$8 sps:$4 sm:$0xff]  }
 0x2ea   : > { %v7292_v37 = vadd.f32 %v2942_v36, %v770_v6  ;;  %v2944_v38 = vpop.f32.mrb[9].mxu0  ;;  %v7857_v36 = vld [vmem:[%s10188_s4 + $0x1c0] ss:$8 sps:$4 sm:$0xff]  }
 0x2eb   : > { %v7293_v39 = vadd.f32 %v2944_v38, %v774_v7  ;;  %v2946_v40 = vpop.f32.mrb[10].mxu0  ;;  %3005 = vmatprep.subr.bf16.mxu1 %v9079_v35  ;;  %v7862_v38 = vld [vmem:[%s10188_s4 + $0x1d4] ss:$8 sps:$4 sm:$0xff]  }
 0x2ec   : > { %v7294_v41 = vadd.f32 %v2946_v40, %v770_v6  ;;  %v2948_v42 = vpop.f32.mrb[11].mxu0  ;;  %3006 = vmatpush1.bf16.msra.mxu1 %v9077_v34  ;;  %v2969_v44 = vmax.f32 %v7292_v37, 0.0  ;;  %v7859_v37 = vld [vmem:[%s10188_s4 + $0x1c4] ss:$8 sps:$4 sm:$0xff]   ;;  %v7863_v40 = vld [vmem:[%s10188_s4 + $0x1e0] ss:$8 sps:$4 sm:$0xff]  }
 0x2ed   : > { %v7295_v43 = vadd.f32 %v2948_v42, %v774_v7  ;;  %v2970_v46 = vmax.f32 %v7293_v39, 0.0  ;;  %v7860_v39 = vld [vmem:[%s10188_s4 + $0x1d0] ss:$8 sps:$4 sm:$0xff]   ;;  %v7868_v42 = vld [vmem:[%s10188_s4 + $0x1f4] ss:$8 sps:$4 sm:$0xff]  }
 0x2ee   : > { %v2971_v45 = vmax.f32 %v7294_v41, 0.0  ;;  %v7865_v41 = vld [vmem:[%s10188_s4 + $0x1e4] ss:$8 sps:$4 sm:$0xff]  }
 0x2ef   : > { %v2972_v47 = vmax.f32 %v7295_v43, 0.0  ;;  %v7866_v43 = vld [vmem:[%s10188_s4 + $0x1f0] ss:$8 sps:$4 sm:$0xff]  }
 0x2f0   : > { %v9083_v48 = vpack.c.bf16 %v2971_v45, %v2969_v44  ;;  %v7871_v44 = vld [vmem:[%s10188_s4 + $0x4] ss:$8 sps:$4 sm:$0xff]  }
 0x2f1   : > { %v9085_v49 = vpack.c.bf16 %v2972_v47, %v2970_v46  ;;  %v2952_v50 = vpop.f32.mrb[12].mxu0 }
 0x2f2   : > { %v7296_v51 = vadd.f32 %v2952_v50, %v770_v6  ;;  %v2954_v52 = vpop.f32.mrb[13].mxu0 }
 0x2f3   : > { %v7297_v53 = vadd.f32 %v2954_v52, %v774_v7  ;;  %v2956_v54 = vpop.f32.mrb[14].mxu0  ;;  %3007 = vmatprep.subr.bf16.mxu1 %v9085_v49 }
 0x2f4   : > { %v7298_v55 = vadd.f32 %v2956_v54, %v770_v6  ;;  %v2958_v56 = vpop.f32.mrb[15].mxu0  ;;  %3008 = vmatpush1.bf16.msra.mxu1 %v9083_v48  ;;  %v2973_v58 = vmax.f32 %v7296_v51, 0.0  ;;  %v7823_v6 = vld [vmem:[%s10188_s4 + $0x104] ss:$8 sps:$4 sm:$0xff]  }
 0x2f5   : > { %v7299_v57 = vadd.f32 %v2958_v56, %v774_v7  ;;  %v2974_v60 = vmax.f32 %v7297_v53, 0.0  ;;  %v7819_v7 = vld [vmem:[%s10187_s3 + $0xc] sm:$0xff]  }
 0x2f6   : > { %v2975_v59 = vmax.f32 %v7298_v55, 0.0 }
 0x2f7   : > { %v2976_v61 = vmax.f32 %v7299_v57, 0.0 }
 0x2f8   : > { %v9089_v62 = vpack.c.bf16 %v2975_v59, %v2973_v58 }
 0x2f9   : > { %v9091_v63 = vpack.c.bf16 %v2976_v61, %v2974_v60 }
 0x2fb   : > { %3009 = vmatprep.subr.bf16.mxu1 %v9091_v63 }
 0x2fc   : > { %3010 = vmatpush1.bf16.msra.mxu1 %v9089_v62 }
 0x2fd   : > { %3108 = vmatprep.subr.bf16.mxu1 %v9073_v21 }
 0x2ff   : > { %6630 = vmatmul.mubr.msk.bf16.vlgmr.msra.gmra.mrb[0].mxu1 %vm2996_vm0, %v7817_v1 }
 0x300   : > { %3109 = vmatpush1.bf16.msra.mxu1 %v9071_v20  ;;  %3045 = vmatprep.mubr.bf16.mxu1 %v8137_v0 }
 0x301   : > { %3110 = vmatprep.subr.bf16.mxu1 %v9079_v35 }
 0x304   : > { %3111 = vmatpush1.bf16.msra.mxu1 %v9077_v34 }
 0x305   : > { %3112 = vmatprep.subr.bf16.mxu1 %v9085_v49 }
 0x307   : > { %6631 = vmatmul.mubr.msk.bf16.gmra.mrb[4].mxu1 %vm2996_vm0, %v7818_v4  ;;  %v7869_v4 = vld [vmem:[%s10188_s4] ss:$8 sps:$4 sm:$0xff]  }
 0x308   : > { %3113 = vmatpush1.bf16.msra.mxu1 %v9083_v48  ;;  %3140 = vmatprep.mubr.bf16.mxu1 %v8137_v0 }
 0x309   : > { %3114 = vmatprep.subr.bf16.mxu1 %v9091_v63 }
 0x30c   : > { %3115 = vmatpush1.bf16.msra.mxu1 %v9089_v62 }
 0x30d   : > { %3356 = vmatprep.subr.bf16.mxu1 %v7823_v6  ;;  %v7874_v6 = vld [vmem:[%s10188_s4 + $0x14] ss:$8 sps:$4 sm:$0xff]  }
 0x30f   : > { %6637 = vmatmul.mubr.msk.bf16.vlgmr.msra.gmra.mrb[8].mxu1 %vm2996_vm0, %v7819_v7 }
 0x310   : > { %3150 = vmatprep.mubr.bf16.mxu1 %v8137_v0  ;;  %3357 = vmatpush1.bf16.msra.mxu1 %v7821_v8  ;;  %v7872_v8 = vld [vmem:[%s10188_s4 + $0x10] ss:$8 sps:$4 sm:$0xff]  }
 0x311   : > { %3358 = vmatprep.subr.bf16.mxu1 %v7826_v9 }
 0x314   : > { %3359 = vmatpush1.bf16.msra.mxu1 %v7824_v10  ;;  %v7877_v10 = vld [vmem:[%s10188_s4 + $0x24] ss:$8 sps:$4 sm:$0xff]  }
 0x315   : > { %3360 = vmatprep.subr.bf16.mxu1 %v7829_v11 }
 0x317   : > { %6638 = vmatmul.mubr.msk.bf16.gmra.mrb[12].mxu1 %vm2996_vm0, %v7820_v12 }
 0x318   : > { %3361 = vmatpush1.bf16.msra.mxu1 %v7827_v13 }
 0x319   : > { %3362 = vmatprep.subr.bf16.mxu1 %v7832_v14 }
 0x31c   : > { %3363 = vmatpush1.bf16.msra.mxu1 %v7830_v15  ;;  %v7875_v15 = vld [vmem:[%s10188_s4 + $0x20] ss:$8 sps:$4 sm:$0xff]  }
 0x31d   : > { %3364 = vmatprep.subr.bf16.mxu1 %v7835_v16  ;;  %v7880_v16 = vld [vmem:[%s10188_s4 + $0x34] ss:$8 sps:$4 sm:$0xff]  }
 0x320   : > { %3365 = vmatpush1.bf16.msra.mxu1 %v7833_v17  ;;  %v7878_v17 = vld [vmem:[%s10188_s4 + $0x30] ss:$8 sps:$4 sm:$0xff]  }
 0x321   : > { %3366 = vmatprep.subr.bf16.mxu1 %v7838_v18  ;;  %v7883_v18 = vld [vmem:[%s10188_s4 + $0x44] ss:$8 sps:$4 sm:$0xff]  }
 0x324   : > { %3367 = vmatpush1.bf16.msra.mxu1 %v7836_v19  ;;  %v7881_v19 = vld [vmem:[%s10188_s4 + $0x40] ss:$8 sps:$4 sm:$0xff]  }
 0x325   : > { %3368 = vmatprep.subr.bf16.mxu1 %v7841_v22  ;;  %v7886_v22 = vld [vmem:[%s10188_s4 + $0x54] ss:$8 sps:$4 sm:$0xff]  }
 0x328   : > { %3369 = vmatpush1.bf16.msra.mxu1 %v7839_v23  ;;  %v7884_v23 = vld [vmem:[%s10188_s4 + $0x50] ss:$8 sps:$4 sm:$0xff]  }
 0x329   : > { %3370 = vmatprep.subr.bf16.mxu1 %v7844_v24  ;;  %v7889_v24 = vld [vmem:[%s10188_s4 + $0x64] ss:$8 sps:$4 sm:$0xff]  }
 0x32c   : > { %3371 = vmatpush1.bf16.msra.mxu1 %v7842_v25  ;;  %v7887_v25 = vld [vmem:[%s10188_s4 + $0x60] ss:$8 sps:$4 sm:$0xff]  }
 0x32d   : > { %3372 = vmatprep.subr.bf16.mxu1 %v7847_v26  ;;  %v7892_v26 = vld [vmem:[%s10188_s4 + $0x74] ss:$8 sps:$4 sm:$0xff]  }
 0x330   : > { %3373 = vmatpush1.bf16.msra.mxu1 %v7845_v27  ;;  %v7890_v27 = vld [vmem:[%s10188_s4 + $0x70] ss:$8 sps:$4 sm:$0xff]  }
 0x331   : > { %3374 = vmatprep.subr.bf16.mxu1 %v7850_v28  ;;  %v7895_v28 = vld [vmem:[%s10188_s4 + $0x84] ss:$8 sps:$4 sm:$0xff]  }
 0x334   : > { %3375 = vmatpush1.bf16.msra.mxu1 %v7848_v29  ;;  %v7893_v29 = vld [vmem:[%s10188_s4 + $0x80] ss:$8 sps:$4 sm:$0xff]  }
 0x335   : > { %3376 = vmatprep.subr.bf16.mxu1 %v7853_v30  ;;  %v7898_v30 = vld [vmem:[%s10188_s4 + $0x94] ss:$8 sps:$4 sm:$0xff]  }
 0x338   : > { %3377 = vmatpush1.bf16.msra.mxu1 %v7851_v31  ;;  %v7896_v31 = vld [vmem:[%s10188_s4 + $0x90] ss:$8 sps:$4 sm:$0xff]  }
 0x339   : > { %3378 = vmatprep.subr.bf16.mxu1 %v7856_v32  ;;  %v7901_v32 = vld [vmem:[%s10188_s4 + $0xa4] ss:$8 sps:$4 sm:$0xff]  }
 0x33c   : > { %3379 = vmatpush1.bf16.msra.mxu1 %v7854_v33  ;;  %v7899_v33 = vld [vmem:[%s10188_s4 + $0xa0] ss:$8 sps:$4 sm:$0xff]  }
 0x33d   : > { %3380 = vmatprep.subr.bf16.mxu1 %v7859_v37  ;;  %v7902_v37 = vld [vmem:[%s10188_s4 + $0xb0] ss:$8 sps:$4 sm:$0xff]  }
 0x340   : > { %3381 = vmatpush1.bf16.msra.mxu1 %v7857_v36  ;;  %v7904_v36 = vld [vmem:[%s10188_s4 + $0xb4] ss:$8 sps:$4 sm:$0xff]  }
 0x341   : > { %3382 = vmatprep.subr.bf16.mxu1 %v7862_v38  ;;  %v7907_v38 = vld [vmem:[%s10188_s4 + $0xc4] ss:$8 sps:$4 sm:$0xff]  }
 0x344   : > { %3383 = vmatpush1.bf16.msra.mxu1 %v7860_v39  ;;  %v7905_v39 = vld [vmem:[%s10188_s4 + $0xc0] ss:$8 sps:$4 sm:$0xff]  }
 0x345   : > { %3384 = vmatprep.subr.bf16.mxu1 %v7865_v41  ;;  %v7908_v41 = vld [vmem:[%s10188_s4 + $0xd0] ss:$8 sps:$4 sm:$0xff]  }
 0x348   : > { %3385 = vmatpush1.bf16.msra.mxu1 %v7863_v40  ;;  %v7910_v40 = vld [vmem:[%s10188_s4 + $0xd4] ss:$8 sps:$4 sm:$0xff]  }
 0x349   : > { %3386 = vmatprep.subr.bf16.mxu1 %v7868_v42  ;;  %v7913_v42 = vld [vmem:[%s10188_s4 + $0xe4] ss:$8 sps:$4 sm:$0xff]  }
 0x34c   : > { %3387 = vmatpush1.bf16.msra.mxu1 %v7866_v43  ;;  %v7911_v43 = vld [vmem:[%s10188_s4 + $0xe0] ss:$8 sps:$4 sm:$0xff]  }
 0x34d   : > { %3567 = vmatprep.subr.bf16.mxu1 %v7871_v44  ;;  %v7916_v44 = vld [vmem:[%s10188_s4 + $0xf4] ss:$8 sps:$4 sm:$0xff]  }
 0x3d2   : > { %v9221_v45 = vpop.f32.mrb[0].mxu1 }
 0x3d3   : > { %v3039_v46 = vpop.f32.mrb[1].mxu1 }
 0x3d4   : > { %v9223_v47 = vpop.f32.mrb[2].mxu1 }
 0x3d5   : > { %v3054_v50 = vpack.c.bf16 %v9223_v47, %v9221_v45  ;;  %v3043_v51 = vpop.f32.mrb[3].mxu1  ;;  %v7920_v45 = vld [vmem:[%s10188_s4 + $0x204] ss:$8 sps:$4 sm:$0xff]   ;;  %v7917_v47 = vld [vmem:[%s10187_s3 + $0x18] sm:$0xff]  }
 0x3d6   : > { %v3055_v52 = vpack.c.bf16 %v3043_v51, %v3039_v46  ;;  %v7914_v46 = vld [vmem:[%s10188_s4 + $0xf0] ss:$8 sps:$4 sm:$0xff]  }
 0x3da   : > { %v9227_v53 = vpop.f32.mrb[4].mxu1 }
 0x3db   : > { %v9229_v54 = vpop.f32.mrb[5].mxu1 }
 0x3dc   : > { %v3051_v55 = vpop.f32.mrb[6].mxu1  ;;  %v3057_v51 = vpack.c.bf16 %v9229_v54, %v9229_v54  ;;  %v7921_v54 = vld [vmem:[%s10188_s4 + $0x210] ss:$8 sps:$4 sm:$0xff]  }
 0x3dd   : > { %v3052_v56 = vpop.f32.mrb[7].mxu1  ;;  %v7927_v55 = vld [vmem:[%s10188_s4 + $0x224] ss:$8 sps:$4 sm:$0xff]  }
 0x3de   : > { %v7924_v56 = vld [vmem:[%s10187_s3 + $0x20] ss:$0 sps:$4 sm:$0xff]  }
 0x3e2   : > { %v3142_v57 = vpop.f32.mrb[8].mxu1 }
 0x3e3   : > { %v3144_v58 = vpop.f32.mrb[9].mxu1 }
 0x3e4   : > { %v3146_v59 = vpop.f32.mrb[10].mxu1 }
 0x3e5   : > { %v3159_v60 = vpack.c.bf16 %v3146_v59, %v3142_v57  ;;  %v3148_v61 = vpop.f32.mrb[11].mxu1  ;;  %v7925_v57 = vld [vmem:[%s10188_s4 + $0x220] ss:$8 sps:$4 sm:$0xff]   ;;  %v7928_v59 = vld [vmem:[%s10188_s4 + $0x230] ss:$8 sps:$4 sm:$0xff]  }
 0x3e6   : > { %v3160_v1 = vpack.c.bf16 %v3148_v61, %v3144_v58  ;;  %v7930_v58 = vld [vmem:[%s10188_s4 + $0x234] ss:$8 sps:$4 sm:$0xff]   ;;  %v7931_v61 = vld [vmem:[%s10188_s4 + $0x240] ss:$8 sps:$4 sm:$0xff]  }
 0x3e8   : > { %3388 = vmatprep.mubr.bf16.mxu1 %v3160_v1  ;;  %v7936_v1 = vld [vmem:[%s10188_s4 + $0x254] ss:$8 sps:$4 sm:$0xff]  }
 0x3e9   : > { %3389 = vmatmul.mubr.bf16.vlgmr.msra.gmra.mrb[16].mxu1 %v3159_v60  ;;  %v7933_v60 = vld [vmem:[%s10188_s4 + $0x244] ss:$8 sps:$4 sm:$0xff]  }
 0x3ea   : > { %3568 = vmatpush1.bf16.msra.mxu1 %v7869_v4  ;;  %v3152_v7 = vpop.f32.mrb[12].mxu1  ;;  %v7934_v4 = vld [vmem:[%s10188_s4 + $0x250] ss:$8 sps:$4 sm:$0xff]  }
 0x3eb   : > { %3569 = vmatprep.subr.bf16.mxu1 %v7874_v6  ;;  %v3154_v9 = vpop.f32.mrb[13].mxu1  ;;  %v3161_v13 = vpack.c.bf16 %v3152_v7, %v3152_v7  ;;  %v7939_v6 = vld [vmem:[%s10188_s4 + $0x264] ss:$8 sps:$4 sm:$0xff]   ;;  %v7937_v7 = vld [vmem:[%s10188_s4 + $0x260] ss:$8 sps:$4 sm:$0xff]  }
 0x3ec   : > { %v3162_v11 = vpack.c.bf16 %v3154_v9, %v3154_v9  ;;  %v3156_v12 = vpop.f32.mrb[14].mxu1  ;;  %v7940_v9 = vld [vmem:[%s10188_s4 + $0x270] ss:$8 sps:$4 sm:$0xff]  }
 0x3ed   : > { %v3157_v14 = vpop.f32.mrb[15].mxu1  ;;  %v7948_v12 = vld [vmem:[%s10188_s4 + $0x294] ss:$8 sps:$4 sm:$0xff]  }
 0x3ee   : > { %3570 = vmatpush1.bf16.msra.mxu1 %v7872_v8  ;;  %3398 = vmatprep.mubr.bf16.mxu1 %v3162_v11  ;;  %v7942_v8 = vld [vmem:[%s10188_s4 + $0x274] ss:$8 sps:$4 sm:$0xff]   ;;  %v7943_v11 = vld [vmem:[%s10188_s4 + $0x280] ss:$8 sps:$4 sm:$0xff]   ;;  %v7951_v14 = vld [vmem:[%s10188_s4 + $0x2a4] ss:$8 sps:$4 sm:$0xff]  }
 0x3ef   : > { %3571 = vmatprep.subr.bf16.mxu1 %v7877_v10  ;;  %v7945_v10 = vld [vmem:[%s10188_s4 + $0x284] ss:$8 sps:$4 sm:$0xff]  }
 0x3f1   : > { %3399 = vmatmul.mubr.bf16.gmra.mrb[20].mxu1 %v3161_v13  ;;  %v7946_v13 = vld [vmem:[%s10188_s4 + $0x290] ss:$8 sps:$4 sm:$0xff]  }
 0x3f2   : > { %3572 = vmatpush1.bf16.msra.mxu1 %v7875_v15  ;;  %3599 = vmatprep.mubr.bf16.mxu1 %v3055_v52  ;;  %v3056_v52 = vpack.c.bf16 %v9227_v53, %v9227_v53  ;;  %v7923_v53 = vld [vmem:[%s10188_s4 + $0x214] ss:$8 sps:$4 sm:$0xff]   ;;  %v7949_v15 = vld [vmem:[%s10188_s4 + $0x2a0] ss:$8 sps:$4 sm:$0xff]  }
 0x3f3   : > { %3573 = vmatprep.subr.bf16.mxu1 %v7880_v16  ;;  %v7954_v16 = vld [vmem:[%s10188_s4 + $0x2b4] ss:$8 sps:$4 sm:$0xff]  }
 0x3f6   : > { %3574 = vmatpush1.bf16.msra.mxu1 %v7878_v17  ;;  %v7952_v17 = vld [vmem:[%s10188_s4 + $0x2b0] ss:$8 sps:$4 sm:$0xff]  }
 0x3f7   : > { %3575 = vmatprep.subr.bf16.mxu1 %v7883_v18  ;;  %v7957_v18 = vld [vmem:[%s10188_s4 + $0x2c4] ss:$8 sps:$4 sm:$0xff]  }
 0x3fa   : > { %3576 = vmatpush1.bf16.msra.mxu1 %v7881_v19  ;;  %v7955_v19 = vld [vmem:[%s10188_s4 + $0x2c0] ss:$8 sps:$4 sm:$0xff]  }
 0x3fb   : > { %3577 = vmatprep.subr.bf16.mxu1 %v7886_v22  ;;  %v7960_v22 = vld [vmem:[%s10188_s4 + $0x2d4] ss:$8 sps:$4 sm:$0xff]  }
 0x3fe   : > { %3578 = vmatpush1.bf16.msra.mxu1 %v7884_v23  ;;  %v7958_v23 = vld [vmem:[%s10188_s4 + $0x2d0] ss:$8 sps:$4 sm:$0xff]  }
 0x3ff   : > { %3579 = vmatprep.subr.bf16.mxu1 %v7889_v24  ;;  %v7963_v24 = vld [vmem:[%s10188_s4 + $0x2e4] ss:$8 sps:$4 sm:$0xff]  }
 0x402   : > { %3580 = vmatpush1.bf16.msra.mxu1 %v7887_v25  ;;  %v7961_v25 = vld [vmem:[%s10188_s4 + $0x2e0] ss:$8 sps:$4 sm:$0xff]  }
 0x403   : > { %3581 = vmatprep.subr.bf16.mxu1 %v7892_v26  ;;  %v7966_v26 = vld [vmem:[%s10188_s4 + $0x2f4] ss:$8 sps:$4 sm:$0xff]  }
 0x406   : > { %3582 = vmatpush1.bf16.msra.mxu1 %v7890_v27  ;;  %v7964_v27 = vld [vmem:[%s10188_s4 + $0x2f0] ss:$8 sps:$4 sm:$0xff]  }
 0x407   : > { %3583 = vmatprep.subr.bf16.mxu1 %v7895_v28 }
 0x40a   : > { %3584 = vmatpush1.bf16.msra.mxu1 %v7893_v29 }
 0x40b   : > { %3585 = vmatprep.subr.bf16.mxu1 %v7898_v30 }
 0x40e   : > { %3586 = vmatpush1.bf16.msra.mxu1 %v7896_v31 }
 0x40f   : > { %3587 = vmatprep.subr.bf16.mxu1 %v7901_v32 }
 0x412   : > { %3588 = vmatpush1.bf16.msra.mxu1 %v7899_v33 }
 0x413   : > { %3589 = vmatprep.subr.bf16.mxu1 %v7904_v36 }
 0x416   : > { %3590 = vmatpush1.bf16.msra.mxu1 %v7902_v37 }
 0x417   : > { %3591 = vmatprep.subr.bf16.mxu1 %v7907_v38 }
 0x41a   : > { %3592 = vmatpush1.bf16.msra.mxu1 %v7905_v39 }
 0x41b   : > { %3593 = vmatprep.subr.bf16.mxu1 %v7910_v40 }
 0x41e   : > { %3594 = vmatpush1.bf16.msra.mxu1 %v7908_v41 }
 0x41f   : > { %3595 = vmatprep.subr.bf16.mxu1 %v7913_v42 }
 0x422   : > { %3596 = vmatpush1.bf16.msra.mxu1 %v7911_v43 }
 0x423   : > { %3597 = vmatprep.subr.bf16.mxu1 %v7916_v44 }
 0x426   : > { %3598 = vmatpush1.bf16.msra.mxu1 %v7914_v46 }
 0x427   : > { %3636 = vmatprep.subr.bf16.mxu1 %v9073_v21 }
 0x429   : > { %3600 = vmatmul.mubr.bf16.vlgmr.msra.gmra.mrb[16].mxu1 %v3054_v50  ;;  %v7918_v50 = vld [vmem:[%s10188_s4 + $0x200] ss:$8 sps:$4 sm:$0xff]  }
 0x42a   : > { %3609 = vmatprep.mubr.bf16.mxu1 %v3057_v51  ;;  %3637 = vmatpush1.bf16.msra.mxu1 %v9071_v20 }
 0x42b   : > { %3638 = vmatprep.subr.bf16.mxu1 %v9079_v35 }
 0x42e   : > { %3639 = vmatpush1.bf16.msra.mxu1 %v9077_v34 }
 0x42f   : > { %3640 = vmatprep.subr.bf16.mxu1 %v9085_v49 }
 0x431   : > { %3610 = vmatmul.mubr.bf16.gmra.mrb[24].mxu1 %v3056_v52 }
 0x432   : > { %3641 = vmatpush1.bf16.msra.mxu1 %v9083_v48  ;;  %3668 = vmatprep.mubr.bf16.mxu1 %v8137_v0 }
 0x433   : > { %3642 = vmatprep.subr.bf16.mxu1 %v9091_v63 }
 0x436   : > { %3643 = vmatpush1.bf16.msra.mxu1 %v9089_v62 }
 0x437   : > { %3884 = vmatprep.subr.bf16.mxu1 %v7920_v45 }
 0x439   : > { %6740 = vmatmul.mubr.msk.bf16.vlgmr.msra.gmra.mrb[28].mxu1 %vm2996_vm0, %v7917_v47 }
 0x43a   : > { %3885 = vmatpush1.bf16.msra.mxu1 %v7918_v50  ;;  %3678 = vmatprep.mubr.bf16.mxu1 %v8137_v0 }
 0x43b   : > { %3886 = vmatprep.subr.bf16.mxu1 %v7923_v53  ;;  %v7975_v53 = vld [vmem:[%s10188_s4 + $0x320] ss:$8 sps:$4 sm:$0xff]  }
 0x43e   : > { %3887 = vmatpush1.bf16.msra.mxu1 %v7921_v54  ;;  %v7980_v54 = vld [vmem:[%s10188_s4 + $0x334] ss:$8 sps:$4 sm:$0xff]  }
 0x43f   : > { %3888 = vmatprep.subr.bf16.mxu1 %v7927_v55  ;;  %v7978_v55 = vld [vmem:[%s10188_s4 + $0x330] ss:$8 sps:$4 sm:$0xff]  }
 0x441   : > { %6741 = vmatmul.mubr.msk.bf16.gmra.mrb[32].mxu1 %vm2996_vm0, %v7924_v56  ;;  %v7983_v56 = vld [vmem:[%s10188_s4 + $0x344] ss:$8 sps:$4 sm:$0xff]  }
 0x442   : > { %3889 = vmatpush1.bf16.msra.mxu1 %v7925_v57  ;;  %v7981_v57 = vld [vmem:[%s10188_s4 + $0x340] ss:$8 sps:$4 sm:$0xff]  }
 0x443   : > { %3890 = vmatprep.subr.bf16.mxu1 %v7930_v58  ;;  %v7986_v58 = vld [vmem:[%s10188_s4 + $0x354] ss:$8 sps:$4 sm:$0xff]  }
 0x446   : > { %3891 = vmatpush1.bf16.msra.mxu1 %v7928_v59  ;;  %v7984_v59 = vld [vmem:[%s10188_s4 + $0x350] ss:$8 sps:$4 sm:$0xff]  }
 0x447   : > { %3892 = vmatprep.subr.bf16.mxu1 %v7933_v60  ;;  %v7989_v60 = vld [vmem:[%s10188_s4 + $0x364] ss:$8 sps:$4 sm:$0xff]  }
 0x44a   : > { %3893 = vmatpush1.bf16.msra.mxu1 %v7931_v61  ;;  %v7987_v61 = vld [vmem:[%s10188_s4 + $0x360] ss:$8 sps:$4 sm:$0xff]  }
 0x44b   : > { %3894 = vmatprep.subr.bf16.mxu1 %v7936_v1  ;;  %v7992_v1 = vld [vmem:[%s10188_s4 + $0x374] ss:$8 sps:$4 sm:$0xff]  }
 0x44e   : > { %3895 = vmatpush1.bf16.msra.mxu1 %v7934_v4  ;;  %v7990_v4 = vld [vmem:[%s10188_s4 + $0x370] ss:$8 sps:$4 sm:$0xff]  }
 0x44f   : > { %3896 = vmatprep.subr.bf16.mxu1 %v7939_v6  ;;  %v7995_v6 = vld [vmem:[%s10188_s4 + $0x384] ss:$8 sps:$4 sm:$0xff]  }
 0x452   : > { %3897 = vmatpush1.bf16.msra.mxu1 %v7937_v7  ;;  %v7993_v7 = vld [vmem:[%s10188_s4 + $0x380] ss:$8 sps:$4 sm:$0xff]  }
 0x453   : > { %3898 = vmatprep.subr.bf16.mxu1 %v7942_v8  ;;  %v7998_v8 = vld [vmem:[%s10188_s4 + $0x394] ss:$8 sps:$4 sm:$0xff]  }
 0x456   : > { %3899 = vmatpush1.bf16.msra.mxu1 %v7940_v9  ;;  %v7996_v9 = vld [vmem:[%s10188_s4 + $0x390] ss:$8 sps:$4 sm:$0xff]  }
 0x457   : > { %3900 = vmatprep.subr.bf16.mxu1 %v7945_v10  ;;  %v8001_v10 = vld [vmem:[%s10188_s4 + $0x3a4] ss:$8 sps:$4 sm:$0xff]  }
 0x45a   : > { %3901 = vmatpush1.bf16.msra.mxu1 %v7943_v11  ;;  %v7999_v11 = vld [vmem:[%s10188_s4 + $0x3a0] ss:$8 sps:$4 sm:$0xff]  }
 0x45b   : > { %3902 = vmatprep.subr.bf16.mxu1 %v7948_v12  ;;  %v8004_v12 = vld [vmem:[%s10188_s4 + $0x3b4] ss:$8 sps:$4 sm:$0xff]  }
 0x45e   : > { %3903 = vmatpush1.bf16.msra.mxu1 %v7946_v13  ;;  %v8002_v13 = vld [vmem:[%s10188_s4 + $0x3b0] ss:$8 sps:$4 sm:$0xff]  }
 0x45f   : > { %3904 = vmatprep.subr.bf16.mxu1 %v7951_v14  ;;  %v8007_v14 = vld [vmem:[%s10188_s4 + $0x3c4] ss:$8 sps:$4 sm:$0xff]  }
 0x462   : > { %3905 = vmatpush1.bf16.msra.mxu1 %v7949_v15  ;;  %v8005_v15 = vld [vmem:[%s10188_s4 + $0x3c0] ss:$8 sps:$4 sm:$0xff]  }
 0x463   : > { %3906 = vmatprep.subr.bf16.mxu1 %v7954_v16  ;;  %v8010_v16 = vld [vmem:[%s10188_s4 + $0x3d4] ss:$8 sps:$4 sm:$0xff]  }
 0x466   : > { %3907 = vmatpush1.bf16.msra.mxu1 %v7952_v17  ;;  %v8008_v17 = vld [vmem:[%s10188_s4 + $0x3d0] ss:$8 sps:$4 sm:$0xff]  }
 0x467   : > { %3908 = vmatprep.subr.bf16.mxu1 %v7957_v18  ;;  %v8013_v18 = vld [vmem:[%s10188_s4 + $0x3e4] ss:$8 sps:$4 sm:$0xff]  }
 0x46a   : > { %3909 = vmatpush1.bf16.msra.mxu1 %v7955_v19  ;;  %v8011_v19 = vld [vmem:[%s10188_s4 + $0x3e0] ss:$8 sps:$4 sm:$0xff]  }
 0x46b   : > { %3910 = vmatprep.subr.bf16.mxu1 %v7960_v22  ;;  %v8016_v22 = vld [vmem:[%s10188_s4 + $0x3f4] ss:$8 sps:$4 sm:$0xff]  }
 0x46e   : > { %3911 = vmatpush1.bf16.msra.mxu1 %v7958_v23  ;;  %v8014_v23 = vld [vmem:[%s10188_s4 + $0x3f0] ss:$8 sps:$4 sm:$0xff]  }
 0x46f   : > { %3912 = vmatprep.subr.bf16.mxu1 %v7963_v24 }
 0x472   : > { %3913 = vmatpush1.bf16.msra.mxu1 %v7961_v25 }
 0x473   : > { %3914 = vmatprep.subr.bf16.mxu1 %v7966_v26 }
 0x476   : > { %3915 = vmatpush1.bf16.msra.mxu1 %v7964_v27 }
 0x477   : > { %3959 = vmatprep.subr.bf16.mxu1 %v9073_v21 }
 0x4c4   : > { %v3400_v28 = vpop.f32.mrb[20].mxu1 }
 0x4c5   : > { %v3402_v29 = vpop.f32.mrb[21].mxu1 }
 0x4c6   : > { %v3404_v30 = vpop.f32.mrb[22].mxu1 }
 0x4c7   : > { %v3405_v31 = vpop.f32.mrb[23].mxu1 }
 0x504   : > { %v3611_v32 = vpop.f32.mrb[24].mxu1 }
 0x505   : > { %v9446_v33 = vadd.f32 %v3611_v32, %v3400_v28  ;;  %v3613_v36 = vpop.f32.mrb[25].mxu1 }
 0x506   : > { %v9448_v37 = vadd.f32 %v3613_v36, %v3402_v29  ;;  %v3615_v38 = vpop.f32.mrb[26].mxu1 }
 0x507   : > { %v3616_v39 = vpop.f32.mrb[27].mxu1 }
 0x50c   : > { %v3670_v40 = vpop.f32.mrb[28].mxu1 }
 0x50d   : > { %v3672_v41 = vpop.f32.mrb[29].mxu1 }
 0x50e   : > { %v3674_v42 = vpop.f32.mrb[30].mxu1 }
 0x50f   : > { %v3687_v43 = vpack.c.bf16 %v3674_v42, %v3670_v40  ;;  %v3676_v44 = vpop.f32.mrb[31].mxu1 }
 0x510   : > { %v3688_v46 = vpack.c.bf16 %v3676_v44, %v3672_v41 }
 0x512   : > { %3916 = vmatprep.mubr.bf16.mxu1 %v3688_v46 }
 0x513   : > { %3917 = vmatmul.mubr.bf16.vlgmr.msra.gmra.mrb[16].mxu1 %v3687_v43 }
 0x514   : > { %3960 = vmatpush1.bf16.msra.mxu1 %v9071_v20  ;;  %v3680_v21 = vpop.f32.mrb[32].mxu1  ;;  %v7971_v20 = vld [vmem:[%s10188_s4 + $0x304] ss:$8 sps:$4 sm:$0xff]  }
 0x515   : > { %3961 = vmatprep.subr.bf16.mxu1 %v9079_v35  ;;  %v3682_v51 = vpop.f32.mrb[33].mxu1  ;;  %v3689_v50 = vpack.c.bf16 %v3680_v21, %v3680_v21  ;;  %v7967_v35 = vld [vmem:[%s10187_s3 + $0x24] sm:$0xff]  }
 0x516   : > { %v3690_v52 = vpack.c.bf16 %v3682_v51, %v3682_v51  ;;  %v3684_v45 = vpop.f32.mrb[34].mxu1 }
 0x517   : > { %v3685_v47 = vpop.f32.mrb[35].mxu1 }
 0x518   : > { %3962 = vmatpush1.bf16.msra.mxu1 %v9077_v34  ;;  %3926 = vmatprep.mubr.bf16.mxu1 %v3690_v52  ;;  %v7969_v34 = vld [vmem:[%s10188_s4 + $0x300] ss:$8 sps:$4 sm:$0xff]  }
 0x519   : > { %3963 = vmatprep.subr.bf16.mxu1 %v9085_v49  ;;  %v7972_v49 = vld [vmem:[%s10188_s4 + $0x310] ss:$8 sps:$4 sm:$0xff]  }
 0x51b   : > { %3927 = vmatmul.mubr.bf16.gmra.mrb[36].mxu1 %v3689_v50 }
 0x51c   : > { %3964 = vmatpush1.bf16.msra.mxu1 %v9083_v48  ;;  %3991 = vmatprep.mubr.bf16.mxu1 %v8137_v0  ;;  %v7974_v48 = vld [vmem:[%s10188_s4 + $0x314] ss:$8 sps:$4 sm:$0xff]  }
 0x51d   : > { %3965 = vmatprep.subr.bf16.mxu1 %v9091_v63  ;;  %v7968_v63 = vld [vmem:[%s10187_s3 + $0x2c] ss:$0 sps:$4 sm:$0xff]  }
 0x520   : > { %3966 = vmatpush1.bf16.msra.mxu1 %v9089_v62  ;;  %v7977_v62 = vld [vmem:[%s10188_s4 + $0x324] ss:$8 sps:$4 sm:$0xff]  }
 0x521   : > { %4207 = vmatprep.subr.bf16.mxu1 %v7971_v20 }
 0x523   : > { %6811 = vmatmul.mubr.msk.bf16.vlgmr.msra.gmra.mrb[40].mxu1 %vm2996_vm0, %v7967_v35 }
 0x524   : > { %4001 = vmatprep.mubr.bf16.mxu1 %v8137_v0  ;;  %4208 = vmatpush1.bf16.msra.mxu1 %v7969_v34 }
 0x525   : > { %4209 = vmatprep.subr.bf16.mxu1 %v7974_v48 }
 0x528   : > { %4210 = vmatpush1.bf16.msra.mxu1 %v7972_v49 }
 0x529   : > { %4211 = vmatprep.subr.bf16.mxu1 %v7977_v62 }
 0x52b   : > { %6812 = vmatmul.mubr.msk.bf16.gmra.mrb[44].mxu1 %vm2996_vm0, %v7968_v63 }
 0x52c   : > { %4212 = vmatpush1.bf16.msra.mxu1 %v7975_v53 }
 0x52d   : > { %4213 = vmatprep.subr.bf16.mxu1 %v7980_v54 }
 0x530   : > { %4214 = vmatpush1.bf16.msra.mxu1 %v7978_v55 }
 0x531   : > { %4215 = vmatprep.subr.bf16.mxu1 %v7983_v56 }
 0x534   : > { %4216 = vmatpush1.bf16.msra.mxu1 %v7981_v57 }
 0x535   : > { %4217 = vmatprep.subr.bf16.mxu1 %v7986_v58 }
 0x538   : > { %4218 = vmatpush1.bf16.msra.mxu1 %v7984_v59 }
 0x539   : > { %4219 = vmatprep.subr.bf16.mxu1 %v7989_v60 }
 0x53c   : > { %4220 = vmatpush1.bf16.msra.mxu1 %v7987_v61 }
 0x53d   : > { %4221 = vmatprep.subr.bf16.mxu1 %v7992_v1 }
 0x540   : > { %4222 = vmatpush1.bf16.msra.mxu1 %v7990_v4 }
 0x541   : > { %4223 = vmatprep.subr.bf16.mxu1 %v7995_v6 }
 0x544   : > { %4224 = vmatpush1.bf16.msra.mxu1 %v7993_v7 }
 0x545   : > { %4225 = vmatprep.subr.bf16.mxu1 %v7998_v8 }
 0x548   : > { %4226 = vmatpush1.bf16.msra.mxu1 %v7996_v9 }
 0x549   : > { %4227 = vmatprep.subr.bf16.mxu1 %v8001_v10  ;;  %v4292_v10 = vld [vmem:[%s10190_s6] sm:$0xf] }
 0x54c   : > { %4228 = vmatpush1.bf16.msra.mxu1 %v7999_v11  ;;  %v8017_v11 = vld [vmem:[%s10191_s7 + $0xc0] sm:$0xff]  }
 0x54d   : > { %4229 = vmatprep.subr.bf16.mxu1 %v8004_v12  ;;  %v6879_v12 = vld [vmem:[%s10190_s6 + $0x4] sm:$0xf] }
 0x550   : > { %4230 = vmatpush1.bf16.msra.mxu1 %v8002_v13  ;;  %v8018_v13 = vld [vmem:[%s10191_s7 + $0x80] sm:$0xff]  }
 0x551   : > { %4231 = vmatprep.subr.bf16.mxu1 %v8007_v14  ;;  %v8019_v14 = vld [vmem:[%s10191_s7 + $0xc8] sm:$0xff]  }
 0x554   : > { %4232 = vmatpush1.bf16.msra.mxu1 %v8005_v15  ;;  %v8020_v15 = vld [vmem:[%s10191_s7 + $0x88] sm:$0xff]  }
 0x555   : > { %4233 = vmatprep.subr.bf16.mxu1 %v8010_v16  ;;  %v8021_v16 = vld [vmem:[%s10191_s7 + $0xd0] sm:$0xff]  }
 0x558   : > { %4234 = vmatpush1.bf16.msra.mxu1 %v8008_v17  ;;  %v8022_v17 = vld [vmem:[%s10191_s7 + $0x90] sm:$0xff]  }
 0x559   : > { %4235 = vmatprep.subr.bf16.mxu1 %v8013_v18  ;;  %v8023_v18 = vld [vmem:[%s10191_s7 + $0xd8] sm:$0xff]  }
 0x55c   : > { %4236 = vmatpush1.bf16.msra.mxu1 %v8011_v19  ;;  %v8024_v19 = vld [vmem:[%s10191_s7 + $0x98] sm:$0xff]  }
 0x55d   : > { %4237 = vmatprep.subr.bf16.mxu1 %v8016_v22  ;;  %v8025_v22 = vld [vmem:[%s10191_s7 + $0xe0] sm:$0xff]  }
 0x560   : > { %4238 = vmatpush1.bf16.msra.mxu1 %v8014_v23  ;;  %v8026_v23 = vld [vmem:[%s10191_s7 + $0xa0] sm:$0xff]  }
 0x5ee   : > { %v3928_v24 = vpop.f32.mrb[36].mxu1 }
 0x5ef   : > { %v3939_v25 = vadd.f32 %v3928_v24, %v9446_v33  ;;  %v3930_v26 = vpop.f32.mrb[37].mxu1  ;;  %v8027_v24 = vld [vmem:[%s10191_s7 + $0xe8] sm:$0xff]  }
 0x5f0   : > { %v3940_v27 = vadd.f32 %v3930_v26, %v9448_v37  ;;  %v3932_v28 = vpop.f32.mrb[38].mxu1  ;;  %v4264_v37 = vld [vmem:[%s10189_s5] sm:$0x3]  ;;  %v8029_v26 = vld [vmem:[%s10191_s7 + $0xf0] sm:$0xff]  }
 0x5f1   : > { %v3933_v29 = vpop.f32.mrb[39].mxu1  ;;  %v4269_v46 = vrot.slane %v4264_v37, %v9061_v3  ;;  %v4273_v21 = vrot.slane %v4264_v37, %v9067_v5  ;;  %v8031_v28 = vld [vmem:[%s10191_s7 + $0xf8] sm:$0xff]   ;;  %v8035_v37 = vld [vmem:[%s10191_s7 + $0x48] sm:$0xff]  }
 0x5f2   : > { %v8032_v29 = vld [vmem:[%s10191_s7 + $0xb8] sm:$0xff]  }
 0x5f6   : > { %v3993_v30 = vpop.f32.mrb[40].mxu1 }
 0x5f7   : > { %v3995_v31 = vpop.f32.mrb[41].mxu1 }
 0x5f8   : > { %v3997_v32 = vpop.f32.mrb[42].mxu1 }
 0x5f9   : > { %v4010_v36 = vpack.c.bf16 %v3997_v32, %v3993_v30  ;;  %v3999_v38 = vpop.f32.mrb[43].mxu1  ;;  %v8033_v30 = vld [vmem:[%s10191_s7 + $0x40] sm:$0xff]  }
 0x5fa   : > { %v4011_v39 = vpack.c.bf16 %v3999_v38, %v3995_v31 }
 0x5fc   : > { %4239 = vmatprep.mubr.bf16.mxu1 %v4011_v39 }
 0x5fd   : > { %4240 = vmatmul.mubr.bf16.vlgmr.msra.gmra.mrb[16].mxu1 %v4010_v36 }
 0x5fe   : > { %v4003_v40 = vpop.f32.mrb[44].mxu1 }
 0x5ff   : > { %v4005_v41 = vpop.f32.mrb[45].mxu1  ;;  %v4012_v33 = vpack.c.bf16 %v4003_v40, %v4003_v40 }
 0x600   : > { %v4013_v42 = vpack.c.bf16 %v4005_v41, %v4005_v41  ;;  %v4007_v43 = vpop.f32.mrb[46].mxu1 }
 0x601   : > { %v4008_v44 = vpop.f32.mrb[47].mxu1  ;;  %v8034_v43 = vld [vmem:[%s10191_s7] sm:$0xff]  }
 0x602   : > { %4249 = vmatprep.mubr.bf16.mxu1 %v4013_v42 }
 0x605   : > { %4250 = vmatmul.mubr.bf16.gmra.mrb[48].mxu1 %v4012_v33 }
 0x606   : > { %4336 = vmatprep.mubr.bf16.mxu1 %v8137_v0 }
 0x6d0   : > { %v4241_v51 = vpop.f32.mrb[16].mxu1 }
 0x6d1   : > { %v4276_v52 = vadd.f32 %v4269_v46, %v4241_v51  ;;  %v4243_v45 = vpop.f32.mrb[17].mxu1  ;;  %v8037_v51 = vld [vmem:[%s10191_s7 + $0x50] sm:$0xff]  }
 0x6d2   : > { %v4277_v47 = vadd.f32 %v4273_v21, %v4243_v45  ;;  %v4245_v50 = vpop.f32.mrb[18].mxu1  ;;  %v8039_v45 = vld [vmem:[%s10191_s7 + $0x58] sm:$0xff]  }
 0x6d3   : > { %v4278_v20 = vadd.f32 %v4269_v46, %v4245_v50  ;;  %v4247_v35 = vpop.f32.mrb[19].mxu1  ;;  %v4282_v48 = vmax.f32 %v4276_v52, 0.0  ;;  %v8038_v52 = vld [vmem:[%s10191_s7 + $0x10] sm:$0xff]   ;;  %v8041_v50 = vld [vmem:[%s10191_s7 + $0x60] sm:$0xff]  }
 0x6d4   : > { %v4279_v34 = vadd.f32 %v4273_v21, %v4247_v35  ;;  %v4283_v62 = vmax.f32 %v4277_v47, 0.0  ;;  %v8040_v47 = vld [vmem:[%s10191_s7 + $0x18] sm:$0xff]   ;;  %v8043_v35 = vld [vmem:[%s10191_s7 + $0x68] sm:$0xff]  }
 0x6d5   : > { %v4284_v49 = vmax.f32 %v4278_v20, 0.0  ;;  %v8042_v20 = vld [vmem:[%s10191_s7 + $0x20] sm:$0xff]  }
 0x6d6   : > { %v4285_v63 = vmax.f32 %v4279_v34, 0.0  ;;  %v8044_v34 = vld [vmem:[%s10191_s7 + $0x28] sm:$0xff]  }
 0x6d7   : > { %v9571_v53 = vpack.c.bf16 %v4284_v49, %v4282_v48  ;;  %v8045_v48 = vld [vmem:[%s10191_s7 + $0x70] sm:$0xff]  }
 0x6d8   : > { %v9573_v54 = vpack.c.bf16 %v4285_v63, %v4283_v62  ;;  %v4251_v55 = vpop.f32.mrb[48].mxu1  ;;  %v8046_v49 = vld [vmem:[%s10191_s7 + $0x30] sm:$0xff]   ;;  %v8047_v62 = vld [vmem:[%s10191_s7 + $0x78] sm:$0xff]  }
 0x6d9   : > { %v4262_v56 = vadd.f32 %v4251_v55, %v3939_v25  ;;  %v4253_v57 = vpop.f32.mrb[49].mxu1  ;;  %v8028_v25 = vld [vmem:[%s10191_s7 + $0xa8] sm:$0xff]   ;;  %v8048_v63 = vld [vmem:[%s10191_s7 + $0x38] sm:$0xff]  }
 0x6da   : > { %v4263_v58 = vadd.f32 %v4253_v57, %v3940_v27  ;;  %v4255_v59 = vpop.f32.mrb[50].mxu1  ;;  %4304 = vmatprep.subr.bf16.mxu1 %v9573_v54  ;;  %v8030_v27 = vld [vmem:[%s10191_s7 + $0xb0] sm:$0xff]   ;;  %v8051_v57 = vld [vmem:[%s10191_s7 + $0x148] sm:$0xff]  }
 0x6db   : > { %v4280_v60 = vadd.f32 %v4269_v46, %v4262_v56  ;;  %v4256_v61 = vpop.f32.mrb[51].mxu1  ;;  %4305 = vmatpush1.bf16.msra.mxu1 %v9571_v53  ;;  %v6946_v56 = vld [vmem:[%s10190_s6 + $0x8] sm:$0xf]  ;;  %v8053_v59 = vld [vmem:[%s10191_s7 + $0x150] sm:$0xff]  }
 0x6dc   : > { %v4281_v1 = vadd.f32 %v4273_v21, %v4263_v58  ;;  %v8036_v21 = vld [vmem:[%s10191_s7 + $0x8] sm:$0xff]   ;;  %v8055_v61 = vld [vmem:[%s10191_s7 + $0x158] sm:$0xff]  }
 0x6dd   : > { %v4286_v4 = vmax.f32 %v4280_v60, 0.0  ;;  %v8052_v58 = vld [vmem:[%s10191_s7 + $0x108] sm:$0xff]   ;;  %v8054_v60 = vld [vmem:[%s10191_s7 + $0x110] sm:$0xff]  }
 0x6de   : > { %v4287_v6 = vmax.f32 %v4281_v1, 0.0  ;;  %v8056_v1 = vld [vmem:[%s10191_s7 + $0x118] sm:$0xff]  }
 0x6df   : > { %v4290_v7 = vpack.c.bf16 %v4286_v4, %v4286_v4  ;;  %v8057_v4 = vld [vmem:[%s10191_s7 + $0x160] sm:$0xff]  }
 0x6e0   : > { %v9577_v8 = vpack.c.bf16 %v4287_v6, %v4287_v6  ;;  %v8058_v6 = vld [vmem:[%s10191_s7 + $0x120] sm:$0xff]  }
 0x6e1   : > { %v9580_v9 = vsel %vm4297_vm1, %v4290_v7, 0  ;;  %v8059_v7 = vld [vmem:[%s10191_s7 + $0x168] sm:$0xff]  }
 0x6e2   : > { %6877 = vmatprep.subr.msk.bf16.mxu1 %vm4297_vm1, %v9577_v8 }
 0x6e3   : > { %4307 = vmatpush1.bf16.msra.mxu1 %v9580_v9 }
 0x6e4   : > { %4384 = vmatprep.subr.bf16.mxu1 %v9573_v54 }
 0x6e6   : > { %6878 = vmatmul.mubr.msk.bf16.vlgmr.msra.gmra.mrb[52].mxu1 %vm4293_vm2, %v4292_v10  ;;  %v8062_v10 = vld [vmem:[%s10191_s7 + $0x130] sm:$0xff]  }
 0x6e7   : > { %4385 = vmatpush1.bf16.msra.mxu1 %v9571_v53  ;;  %4416 = vmatprep.mubr.bf16.mxu1 %v8137_v0 }
 0x6e8   : > { %6880 = vmatprep.subr.msk.bf16.mxu1 %vm4297_vm1, %v9577_v8 }
 0x6eb   : > { %4387 = vmatpush1.bf16.msra.mxu1 %v9580_v9 }
 0x6ec   : > { %7130 = vmatprep.subr.bf16.mxu1 %v8017_v11  ;;  %v8063_v11 = vld [vmem:[%s10191_s7 + $0x178] sm:$0xff]  }
 0x6ee   : > { %6881 = vmatmul.mubr.msk.bf16.vlgmr.msra.gmra.mrb[56].mxu1 %vm4293_vm2, %v6879_v12  ;;  %v8064_v12 = vld [vmem:[%s10191_s7 + $0x138] sm:$0xff]  }
 0x6ef   : > { %7131 = vmatpush3.bf16.msra.mxu1 %v8018_v13  ;;  %v4960_v13 = vld [vmem:[%s10193_s9] sm:$0xff] }
 0x6f0   : > { %7132 = vmatprep.subr.bf16.mxu1 %v8019_v14  ;;  %v4964_v14 = vld [vmem:[%s10193_s9 + $0x20] sm:$0xff] }
 0x6f3   : > { %7133 = vmatpush3.bf16.msra.mxu1 %v8020_v15  ;;  %v6998_v15 = vcombine.low %v4960_v13, %v4964_v14 }
 0x6f4   : > { %7134 = vmatprep.subr.bf16.mxu1 %v8021_v16  ;;  %v6999_v16 = vcombine.high %v4960_v13, %v4964_v14  ;;  %v5002_v14 = vld [vmem:[%s10193_s9 + $0x150] sm:$0xff] }
 0x6f7   : > { %7135 = vmatpush3.bf16.msra.mxu1 %v8022_v17  ;;  %v4962_v17 = vld [vmem:[%s10193_s9 + $0x10] sm:$0xff] }
 0x6f8   : > { %7136 = vmatprep.subr.bf16.mxu1 %v8023_v18  ;;  %v4966_v18 = vld [vmem:[%s10193_s9 + $0x30] sm:$0xff] }
 0x6fb   : > { %7137 = vmatpush3.bf16.msra.mxu1 %v8024_v19  ;;  %v7002_v19 = vcombine.low %v4962_v17, %v4966_v18 }
 0x6fc   : > { %7138 = vmatprep.subr.bf16.mxu1 %v8025_v22  ;;  %v7003_v22 = vcombine.high %v4962_v17, %v4966_v18  ;;  %v5008_v18 = vld [vmem:[%s10193_s9 + $0x180] sm:$0xff] }
 0x6fe   : > { %5468 = vmatprep.subr.bf16.mxu0 %v7003_v22 }
 0x6ff   : > { %7139 = vmatpush3.bf16.msra.mxu1 %v8026_v23  ;;  %5469 = vmatpush1.bf16.msra.mxu0 %v7002_v19  ;;  %v4970_v23 = vld [vmem:[%s10193_s9 + $0x50] sm:$0xff]  ;;  %v5012_v19 = vld [vmem:[%s10193_s9 + $0x1a0] sm:$0xff] }
 0x700   : > { %7140 = vmatprep.subr.bf16.mxu1 %v8027_v24  ;;  %v4974_v24 = vld [vmem:[%s10193_s9 + $0x70] sm:$0xff]  ;;  %v7047_v22 = vcombine.high %v5008_v18, %v5012_v19 }
 0x703   : > { %7141 = vmatpush3.bf16.msra.mxu1 %v8028_v25  ;;  %v7010_v25 = vcombine.low %v4970_v23, %v4974_v24 }
 0x704   : > { %7142 = vmatprep.subr.bf16.mxu1 %v8029_v26  ;;  %v7011_v26 = vcombine.high %v4970_v23, %v4974_v24  ;;  %v5010_v23 = vld [vmem:[%s10193_s9 + $0x190] sm:$0xff] }
 0x705   : > { %v5014_v24 = vld [vmem:[%s10193_s9 + $0x1b0] sm:$0xff] }
 0x706   : > { %5470 = vmatprep.subr.bf16.mxu0 %v7011_v26  ;;  %v7051_v26 = vcombine.high %v5010_v23, %v5014_v24 }
 0x707   : > { %7143 = vmatpush3.bf16.msra.mxu1 %v8030_v27  ;;  %5471 = vmatpush1.bf16.msra.mxu0 %v7010_v25  ;;  %v4978_v27 = vld [vmem:[%s10193_s9 + $0x90] sm:$0xff]  ;;  %v7046_v25 = vcombine.low %v5008_v18, %v5012_v19  ;;  %v5013_v18 = vld [vmem:[%s10193_s9 + $0x1a8] sm:$0xff] }
 0x708   : > { %7144 = vmatprep.subr.bf16.mxu1 %v8031_v28  ;;  %v4982_v28 = vld [vmem:[%s10193_s9 + $0xb0] sm:$0xff]  ;;  %v8075_v19 = vld [vmem:[%s10195_s11 + $0x68] sm:$0xff]  }
 0x70b   : > { %7145 = vmatpush3.bf16.msra.mxu1 %v8032_v29  ;;  %v7018_v29 = vcombine.low %v4978_v27, %v4982_v28 }
 0x70c   : > { %7152 = vmatprep.subr.bf16.mxu1 %v8033_v30  ;;  %v7019_v30 = vcombine.high %v4978_v27, %v4982_v28  ;;  %v7050_v27 = vcombine.low %v5010_v23, %v5014_v24  ;;  %v5016_v28 = vld [vmem:[%s10193_s9 + $0x1c0] sm:$0xff]  ;;  %v8076_v24 = vld [vmem:[%s10195_s11 + $0x28] sm:$0xff]  }
 0x70e   : > { %5472 = vmatprep.subr.bf16.mxu0 %v7019_v30 }
 0x70f   : > { %5473 = vmatpush1.bf16.msra.mxu0 %v7018_v29  ;;  %v5020_v29 = vld [vmem:[%s10193_s9 + $0x1e0] sm:$0xff] }
 0x710   : > { %v7055_v30 = vcombine.high %v5016_v28, %v5020_v29 }
 0x7b9   : > { %v4338_v31 = vpop.f32.mrb[52].mxu1 }
 0x7ba   : > { %v4340_v32 = vpop.f32.mrb[53].mxu1  ;;  %v4345_v55 = vpack.c.bf16 %v4338_v31, %v4338_v31  ;;  %v4986_v31 = vld [vmem:[%s10193_s9 + $0xd0] sm:$0xff] }
 0x7bb   : > { %v4342_v36 = vpop.f32.mrb[54].mxu1  ;;  %v4346_v46 = vpack.c.bf16 %v4340_v32, %v4340_v32  ;;  %v4990_v32 = vld [vmem:[%s10193_s9 + $0xf0] sm:$0xff] }
 0x7bc   : > { %v4343_v38 = vpop.f32.mrb[55].mxu1  ;;  %v7026_v36 = vcombine.low %v4986_v31, %v4990_v32 }
 0x7bd   : > { %v7027_v38 = vcombine.high %v4986_v31, %v4990_v32  ;;  %v5018_v31 = vld [vmem:[%s10193_s9 + $0x1d0] sm:$0xff] }
 0x7be   : > { %v5022_v32 = vld [vmem:[%s10193_s9 + $0x1f0] sm:$0xff] }
 0x7bf   : > { %5474 = vmatprep.subr.bf16.mxu0 %v7027_v38  ;;  %v7059_v38 = vcombine.high %v5018_v31, %v5022_v32 }
 0x7c0   : > { %5475 = vmatpush1.bf16.msra.mxu0 %v7026_v36  ;;  %v7054_v36 = vcombine.low %v5016_v28, %v5020_v29  ;;  %v4963_v29 = vld [vmem:[%s10193_s9 + $0x18] sm:$0xff] }
 0x7c1   : > { %v4418_v39 = vpop.f32.mrb[56].mxu1 }
 0x7c2   : > { %v4420_v40 = vpop.f32.mrb[57].mxu1  ;;  %v4425_v44 = vpack.c.bf16 %v4418_v39, %v4418_v39  ;;  %v4994_v39 = vld [vmem:[%s10193_s9 + $0x110] sm:$0xff] }
 0x7c3   : > { %v4426_v41 = vpack.c.bf16 %v4420_v40, %v4420_v40  ;;  %v4422_v42 = vpop.f32.mrb[58].mxu1  ;;  %v4998_v40 = vld [vmem:[%s10193_s9 + $0x130] sm:$0xff] }
 0x7c4   : > { %v4423_v33 = vpop.f32.mrb[59].mxu1  ;;  %v7035_v42 = vcombine.high %v4994_v39, %v4998_v40 }
 0x7c5   : > { %4588 = vmatprep.mubr.bf16.mxu1 %v4426_v41  ;;  %v7034_v41 = vcombine.low %v4994_v39, %v4998_v40  ;;  %v7058_v39 = vcombine.low %v5018_v31, %v5022_v32  ;;  %v4961_v40 = vld [vmem:[%s10193_s9 + $0x8] sm:$0xff] }
 0x7c6   : > { %4589 = vmatmul.mubr.bf16.vlgmr.msra.gmra.mrb[60].mxu1 %v4425_v44  ;;  %5476 = vmatprep.subr.bf16.mxu0 %v7035_v42 }
 0x7c7   : > { %7153 = vmatpush3.bf16.msra.mxu1 %v8034_v43  ;;  %4724 = vmatprep.mubr.bf16.mxu1 %v4346_v46 }
 0x7c8   : > { %7154 = vmatprep.subr.bf16.mxu1 %v8035_v37  ;;  %5477 = vmatpush1.bf16.msra.mxu0 %v7034_v41  ;;  %v4965_v41 = vld [vmem:[%s10193_s9 + $0x28] sm:$0xff] }
 0x7c9   : > { %v7001_v42 = vcombine.high %v4961_v40, %v4965_v41 }
 0x7cb   : > { %7155 = vmatpush3.bf16.msra.mxu1 %v8036_v21 }
 0x7cc   : > { %7156 = vmatprep.subr.bf16.mxu1 %v8037_v51 }
 0x7cf   : > { %7157 = vmatpush3.bf16.msra.mxu1 %v8038_v52 }
 0x7d0   : > { %7158 = vmatprep.subr.bf16.mxu1 %v8039_v45 }
 0x7d3   : > { %7159 = vmatpush3.bf16.msra.mxu1 %v8040_v47 }
 0x7d4   : > { %7160 = vmatprep.subr.bf16.mxu1 %v8041_v50 }
 0x7d7   : > { %7161 = vmatpush3.bf16.msra.mxu1 %v8042_v20 }
 0x7d8   : > { %7162 = vmatprep.subr.bf16.mxu1 %v8043_v35  ;;  %v4968_v35 = vld [vmem:[%s10193_s9 + $0x40] sm:$0xff] }
 0x7db   : > { %7163 = vmatpush3.bf16.msra.mxu1 %v8044_v34  ;;  %v4972_v34 = vld [vmem:[%s10193_s9 + $0x60] sm:$0xff] }
 0x7dc   : > { %7164 = vmatprep.subr.bf16.mxu1 %v8045_v48 }
 0x7df   : > { %7165 = vmatpush3.bf16.msra.mxu1 %v8046_v49 }
 0x7e0   : > { %7166 = vmatprep.subr.bf16.mxu1 %v8047_v62 }
 0x7e3   : > { %7167 = vmatpush3.bf16.msra.mxu1 %v8048_v63 }
 0x7e4   : > { %4737 = vmatprep.subr.bf16.mxu1 %v9573_v54  ;;  %v8049_v54 = vld [vmem:[%s10191_s7 + $0x140] sm:$0xff]  }
 0x7e6   : > { %4725 = vmatmul.mubr.bf16.vlgmr.msra.gmra.mrb[64].mxu1 %v4345_v55 }
 0x7e7   : > { %4738 = vmatpush1.bf16.msra.mxu1 %v9571_v53  ;;  %4769 = vmatprep.mubr.bf16.mxu1 %v8137_v0  ;;  %v8050_v53 = vld [vmem:[%s10191_s7 + $0x100] sm:$0xff]  }
 0x7e8   : > { %6947 = vmatprep.subr.msk.bf16.mxu1 %vm4297_vm1, %v9577_v8  ;;  %v8060_v8 = vld [vmem:[%s10191_s7 + $0x128] sm:$0xff]  }
 0x7eb   : > { %4740 = vmatpush1.bf16.msra.mxu1 %v9580_v9  ;;  %v8061_v9 = vld [vmem:[%s10191_s7 + $0x170] sm:$0xff]  }
 0x7ec   : > { %7174 = vmatprep.subr.bf16.mxu1 %v8049_v54  ;;  %v4976_v54 = vld [vmem:[%s10193_s9 + $0x80] sm:$0xff] }
 0x7ee   : > { %6948 = vmatmul.mubr.msk.bf16.vlgmr.msra.gmra.mrb[68].mxu1 %vm4293_vm2, %v6946_v56  ;;  %v7007_v56 = vcombine.high %v4968_v35, %v4972_v34 }
 0x7ef   : > { %7175 = vmatpush3.bf16.msra.mxu1 %v8050_v53  ;;  %v4980_v53 = vld [vmem:[%s10193_s9 + $0xa0] sm:$0xff] }
 0x7f0   : > { %7176 = vmatprep.subr.bf16.mxu1 %v8051_v57  ;;  %v7006_v57 = vcombine.low %v4968_v35, %v4972_v34  ;;  %v4973_v35 = vld [vmem:[%s10193_s9 + $0x68] sm:$0xff] }
 0x7f3   : > { %7177 = vmatpush3.bf16.msra.mxu1 %v8052_v58  ;;  %v7015_v58 = vcombine.high %v4976_v54, %v4980_v53 }
 0x7f4   : > { %7178 = vmatprep.subr.bf16.mxu1 %v8053_v59  ;;  %v4984_v59 = vld [vmem:[%s10193_s9 + $0xc0] sm:$0xff] }
 0x7f7   : > { %7179 = vmatpush3.bf16.msra.mxu1 %v8054_v60  ;;  %v4988_v60 = vld [vmem:[%s10193_s9 + $0xe0] sm:$0xff] }
 0x7f8   : > { %7180 = vmatprep.subr.bf16.mxu1 %v8055_v61  ;;  %v7014_v61 = vcombine.low %v4976_v54, %v4980_v53  ;;  %v8068_v53 = vld [vmem:[%s10195_s11 + $0x8] sm:$0xff]  }
 0x7fb   : > { %7181 = vmatpush3.bf16.msra.mxu1 %v8056_v1  ;;  %v7023_v1 = vcombine.high %v4984_v59, %v4988_v60 }
 0x7fc   : > { %7182 = vmatprep.subr.bf16.mxu1 %v8057_v4  ;;  %v4992_v4 = vld [vmem:[%s10193_s9 + $0x100] sm:$0xff] }
 0x7ff   : > { %7183 = vmatpush3.bf16.msra.mxu1 %v8058_v6  ;;  %v4996_v6 = vld [vmem:[%s10193_s9 + $0x120] sm:$0xff] }
 0x800   : > { %7184 = vmatprep.subr.bf16.mxu1 %v8059_v7  ;;  %v7022_v7 = vcombine.low %v4984_v59, %v4988_v60  ;;  %v8069_v59 = vld [vmem:[%s10195_s11 + $0x50] sm:$0xff]  }
 0x803   : > { %7185 = vmatpush3.bf16.msra.mxu1 %v8060_v8  ;;  %v7031_v8 = vcombine.high %v4992_v4, %v4996_v6 }
 0x804   : > { %7186 = vmatprep.subr.bf16.mxu1 %v8061_v9  ;;  %v5000_v9 = vld [vmem:[%s10193_s9 + $0x140] sm:$0xff] }
 0x807   : > { %7187 = vmatpush3.bf16.msra.mxu1 %v8062_v10  ;;  %v5004_v10 = vld [vmem:[%s10193_s9 + $0x160] sm:$0xff] }
 0x808   : > { %7188 = vmatprep.subr.bf16.mxu1 %v8063_v11  ;;  %v7030_v11 = vcombine.low %v4992_v4, %v4996_v6  ;;  %v7038_v13 = vcombine.low %v5000_v9, %v5004_v10  ;;  %v4993_v4 = vld [vmem:[%s10193_s9 + $0x108] sm:$0xff] }
 0x809   : > { %v4997_v6 = vld [vmem:[%s10193_s9 + $0x128] sm:$0xff] }
 0x80b   : > { %7189 = vmatpush3.bf16.msra.mxu1 %v8064_v12  ;;  %v7039_v12 = vcombine.high %v5000_v9, %v5004_v10  ;;  %v7033_v9 = vcombine.high %v4993_v4, %v4997_v6  ;;  %v8072_v10 = vld [vmem:[%s10195_s11 + $0x18] sm:$0xff]  }
 0x80c   : > { %5386 = vmatprep.subr.bf16.mxu1 %v6999_v16 }
 0x899   : > { %v7146_v43 = vpop.f32.mrb[60].mxu1 }
 0x89a   : > { %v7147_v44 = vpop.f32.mrb[61].mxu1 }
 0x89b   : > { %v7148_v33 = vadd.f32 %v7147_v44, %v7146_v43  ;;  %v7149_v37 = vpop.f32.mrb[62].mxu1  ;;  %v7000_v43 = vcombine.low %v4961_v40, %v4965_v41  ;;  %v8065_v44 = vld [vmem:[%s10195_s11 + $0x40] sm:$0xff]   ;;  %v4979_v41 = vld [vmem:[%s10193_s9 + $0x98] sm:$0xff] }
 0x89c   : > { %v7150_v46 = vpop.f32.mrb[63].mxu1 }
 0x8b9   : > { %v7168_v21 = vpop.f32.mrb[64].mxu1 }
 0x8ba   : > { %v7169_v51 = vpop.f32.mrb[65].mxu1 }
 0x8bb   : > { %v7170_v52 = vadd.f32 %v7169_v51, %v7168_v21  ;;  %v7171_v45 = vpop.f32.mrb[66].mxu1  ;;  %v6997_v51 = vld [vmem:[%s10192_s8] ss:$0 sm:$0xff] }
 0x8bc   : > { %v7172_v47 = vpop.f32.mrb[67].mxu1 }
 0x8bd   : > { %v9789_v50 = vadd.f32 %v7170_v52, %v7148_v33 }
 0x8c1   : > { %v4771_v20 = vpop.f32.mrb[68].mxu1 }
 0x8c2   : > { %v4773_v48 = vpop.f32.mrb[69].mxu1  ;;  %v4778_v63 = vpack.c.bf16 %v4771_v20, %v4771_v20  ;;  %v4969_v20 = vld [vmem:[%s10193_s9 + $0x48] sm:$0xff] }
 0x8c3   : > { %v4779_v49 = vpack.c.bf16 %v4773_v48, %v4773_v48  ;;  %v4775_v62 = vpop.f32.mrb[70].mxu1 }
 0x8c4   : > { %v4776_v55 = vpop.f32.mrb[71].mxu1  ;;  %v8066_v62 = vld [vmem:[%s10195_s11] sm:$0xff]  }
 0x8c5   : > { %4941 = vmatprep.mubr.bf16.mxu1 %v4779_v49  ;;  %v7009_v49 = vcombine.high %v4969_v20, %v4973_v35  ;;  %v8067_v55 = vld [vmem:[%s10195_s11 + $0x48] sm:$0xff]  }
 0x8c6   : > { %4942 = vmatmul.mubr.bf16.vlgmr.msra.gmra.mrb[72].mxu1 %v4778_v63  ;;  %v4981_v63 = vld [vmem:[%s10193_s9 + $0xa8] sm:$0xff] }
 0x8c7   : > { %5387 = vmatpush1.bf16.msra.mxu1 %v6998_v15  ;;  %5418 = vmatprep.mubr.bf16.mxu1 %v8137_v0  ;;  %v5006_v15 = vld [vmem:[%s10193_s9 + $0x170] sm:$0xff] }
 0x8c8   : > { %5388 = vmatprep.subr.bf16.mxu1 %v7007_v56  ;;  %v7043_v16 = vcombine.high %v5002_v14, %v5006_v15  ;;  %v7042_v17 = vcombine.low %v5002_v14, %v5006_v15  ;;  %v7008_v56 = vcombine.low %v4969_v20, %v4973_v35  ;;  %v7032_v14 = vcombine.low %v4993_v4, %v4997_v6  ;;  %v5007_v20 = vld [vmem:[%s10193_s9 + $0x178] sm:$0xff]  ;;  %v8083_v4 = vld [vmem:[%s10195_s11 + $0x80] sm:$0xff]   ;;  %v8085_v6 = vld [vmem:[%s10195_s11 + $0xc8] sm:$0xff]  }
 0x8ca   : > { %5478 = vmatprep.subr.bf16.mxu0 %v7043_v16  ;;  %v8074_v16 = vld [vmem:[%s10195_s11 + $0x20] sm:$0xff]  }
 0x8cb   : > { %5389 = vmatpush1.bf16.msra.mxu1 %v7006_v57  ;;  %5479 = vmatpush1.bf16.msra.mxu0 %v7042_v17  ;;  %v4985_v57 = vld [vmem:[%s10193_s9 + $0xc8] sm:$0xff] }
 0x8cc   : > { %5390 = vmatprep.subr.bf16.mxu1 %v7015_v58  ;;  %5480 = vmatprep.subr.bf16.mxu0 %v7051_v26  ;;  %v4989_v58 = vld [vmem:[%s10193_s9 + $0xe8] sm:$0xff] }
 0x8cd   : > { %v5009_v17 = vld [vmem:[%s10193_s9 + $0x188] sm:$0xff] }
 0x8ce   : > { %v7049_v23 = vcombine.high %v5009_v17, %v5013_v18  ;;  %v5021_v26 = vld [vmem:[%s10193_s9 + $0x1e8] sm:$0xff] }
 0x8cf   : > { %5391 = vmatpush1.bf16.msra.mxu1 %v7014_v61  ;;  %5481 = vmatpush1.bf16.msra.mxu0 %v7050_v27  ;;  %v7025_v61 = vcombine.high %v4985_v57, %v4989_v58  ;;  %v7048_v27 = vcombine.low %v5009_v17, %v5013_v18  ;;  %v8107_v17 = vld [vmem:[%s10195_s11 + $0xb0] sm:$0xff]   ;;  %v8109_v18 = vld [vmem:[%s10195_s11 + $0xf8] sm:$0xff]  }
 0x8d0   : > { %5392 = vmatprep.subr.bf16.mxu1 %v7023_v1  ;;  %5482 = vmatprep.subr.bf16.mxu0 %v7059_v38  ;;  %v8070_v1 = vld [vmem:[%s10195_s11 + $0x10] sm:$0xff]   ;;  %v4975_v38 = vld [vmem:[%s10193_s9 + $0x78] sm:$0xff] }
 0x8d3   : > { %5393 = vmatpush1.bf16.msra.mxu1 %v7022_v7  ;;  %5483 = vmatpush1.bf16.msra.mxu0 %v7058_v39  ;;  %v8071_v7 = vld [vmem:[%s10195_s11 + $0x58] sm:$0xff]  }
 0x8d4   : > { %5394 = vmatprep.subr.bf16.mxu1 %v7031_v8  ;;  %7196 = vmatprep.subr.bf16.mxu0 %v8065_v44  ;;  %v7024_v8 = vcombine.low %v4985_v57, %v4989_v58  ;;  %v8077_v58 = vld [vmem:[%s10195_s11 + $0x70] sm:$0xff]  }
 0x8d7   : > { %5395 = vmatpush1.bf16.msra.mxu1 %v7030_v11  ;;  %v5001_v11 = vld [vmem:[%s10193_s9 + $0x148] sm:$0xff] }
 0x8d8   : > { %5396 = vmatprep.subr.bf16.mxu1 %v7039_v12  ;;  %v5005_v12 = vld [vmem:[%s10193_s9 + $0x168] sm:$0xff] }
 0x8d9   : > { %v7041_v15 = vcombine.high %v5001_v11, %v5005_v12 }
 0x8db   : > { %5397 = vmatpush1.bf16.msra.mxu1 %v7038_v13  ;;  %v8073_v13 = vld [vmem:[%s10195_s11 + $0x60] sm:$0xff]  }
 0x8dc   : > { %5398 = vmatprep.subr.bf16.mxu1 %v7047_v22  ;;  %v7040_v22 = vcombine.low %v5001_v11, %v5005_v12  ;;  %v8095_v11 = vld [vmem:[%s10195_s11 + $0x98] sm:$0xff]   ;;  %v8097_v12 = vld [vmem:[%s10195_s11 + $0xe0] sm:$0xff]  }
 0x8df   : > { %5399 = vmatpush1.bf16.msra.mxu1 %v7046_v25  ;;  %v5017_v25 = vld [vmem:[%s10193_s9 + $0x1c8] sm:$0xff] }
 0x8e0   : > { %5400 = vmatprep.subr.bf16.mxu1 %v7055_v30  ;;  %v7057_v28 = vcombine.high %v5017_v25, %v5021_v26  ;;  %v4967_v30 = vld [vmem:[%s10193_s9 + $0x38] sm:$0xff]  ;;  %v7056_v31 = vcombine.low %v5017_v25, %v5021_v26 }
 0x8e1   : > { %v7005_v32 = vcombine.high %v4963_v29, %v4967_v30  ;;  %v7004_v39 = vcombine.low %v4963_v29, %v4967_v30 }
 0x8e3   : > { %5401 = vmatpush1.bf16.msra.mxu1 %v7054_v36  ;;  %v4971_v36 = vld [vmem:[%s10193_s9 + $0x58] sm:$0xff] }
 0x8e4   : > { %5427 = vmatprep.subr.bf16.mxu1 %v7001_v42  ;;  %v7013_v40 = vcombine.high %v4971_v36, %v4975_v38  ;;  %v4983_v42 = vld [vmem:[%s10193_s9 + $0xb8] sm:$0xff] }
 0x8e5   : > { %v7021_v44 = vcombine.high %v4979_v41, %v4983_v42 }
 0x999   : > { %v7190_v33 = vpop.f32.mrb[72].mxu1 }
 0x99a   : > { %v7191_v37 = vpop.f32.mrb[73].mxu1 }
 0x99b   : > { %v7192_v46 = vadd.f32 %v7191_v37, %v7190_v33  ;;  %v7193_v21 = vpop.f32.mrb[74].mxu1  ;;  %v4987_v33 = vld [vmem:[%s10193_s9 + $0xd8] sm:$0xff] }
 0x99c   : > { %v7194_v52 = vpop.f32.mrb[75].mxu1  ;;  %v4991_v37 = vld [vmem:[%s10193_s9 + $0xf8] sm:$0xff] }
 0x99d   : > { %v4949_v45 = vadd.f32 %v7192_v46, %v9789_v50  ;;  %v4977_v50 = vld [vmem:[%s10193_s9 + $0x88] sm:$0xff]  ;;  %v7020_v46 = vcombine.low %v4979_v41, %v4983_v42  ;;  %v7029_v21 = vcombine.high %v4987_v33, %v4991_v37  ;;  %v7028_v52 = vcombine.low %v4987_v33, %v4991_v37 }
 0x99e   : > { %v7017_v54 = vcombine.high %v4977_v50, %v4981_v63  ;;  %v7016_v60 = vcombine.low %v4977_v50, %v4981_v63 }
 0x99f   : > { %v4957_v47 = vadd.f32 %v6997_v51, %v4949_v45  ;;  %v4995_v51 = vld [vmem:[%s10193_s9 + $0x118] sm:$0xff] }
 0x9a1   : > { %v4958_v34 = vmax.f32 %v4957_v47, 0.0  ;;  %v5003_v47 = vld [vmem:[%s10193_s9 + $0x158] sm:$0xff] }
 0x9a2   : > { %v7044_v50 = vcombine.low %v5003_v47, %v5007_v20 }
 0x9a3   : > { %v9871_v48 = vpack.c.bf16 %v4958_v34, %v4958_v34  ;;  %v7045_v34 = vcombine.high %v5003_v47, %v5007_v20  ;;  %v8096_v47 = vld [vmem:[%s10195_s11 + $0x118] sm:$0xff]   ;;  %v8098_v20 = vld [vmem:[%s10195_s11 + $0x160] sm:$0xff]  }
 0x9a5   : > { %5419 = vmatmul.mubr.bf16.vlgmr.msra.gmra.mrb[76].mxu1 %v9871_v48  ;;  %5501 = vmatmul.mubr.bf16.vlgmr.msra.gmra.mrb[16].mxu0 %v9871_v48 }
 0x9a6   : > { %5428 = vmatpush1.bf16.msra.mxu1 %v7000_v43  ;;  %5459 = vmatprep.mubr.bf16.mxu1 %v8137_v0  ;;  %v7012_v43 = vcombine.low %v4971_v36, %v4975_v38 }
 0x9a7   : > { %5429 = vmatprep.subr.bf16.mxu1 %v7009_v49  ;;  %7197 = vmatpush3.bf16.msra.mxu0 %v8066_v62  ;;  %v5011_v49 = vld [vmem:[%s10193_s9 + $0x198] sm:$0xff] }
 0x9a8   : > { %7198 = vmatprep.subr.bf16.mxu0 %v8067_v55  ;;  %v5015_v62 = vld [vmem:[%s10193_s9 + $0x1b8] sm:$0xff] }
 0x9a9   : > { %v7053_v63 = vcombine.high %v5011_v49, %v5015_v62  ;;  %v5019_v55 = vld [vmem:[%s10193_s9 + $0x1d8] sm:$0xff] }
 0x9aa   : > { %5430 = vmatpush1.bf16.msra.mxu1 %v7008_v56  ;;  %v5023_v56 = vld [vmem:[%s10193_s9 + $0x1f8] sm:$0xff] }
 0x9ab   : > { %5431 = vmatprep.subr.bf16.mxu1 %v7017_v54  ;;  %7199 = vmatpush3.bf16.msra.mxu0 %v8068_v53  ;;  %v7052_v54 = vcombine.low %v5011_v49, %v5015_v62  ;;  %v7061_v53 = vcombine.high %v5019_v55, %v5023_v56  ;;  %v7060_v57 = vcombine.low %v5019_v55, %v5023_v56  ;;  %v8102_v49 = vld [vmem:[%s10195_s11 + $0x168] sm:$0xff]   ;;  %v5036_v62 = vsub.s32 2, %v9058_v2  ;;  %v8106_v56 = vld [vmem:[%s10195_s11 + $0x170] sm:$0xff]  }
 0x9ac   : > { %7200 = vmatprep.subr.bf16.mxu0 %v8069_v59  ;;  %v8078_v59 = vld [vmem:[%s10195_s11 + $0x30] sm:$0xff]  }
 0x9ae   : > { %5432 = vmatpush1.bf16.msra.mxu1 %v7016_v60  ;;  %v8079_v60 = vld [vmem:[%s10195_s11 + $0x78] sm:$0xff]  }
 0x9af   : > { %5433 = vmatprep.subr.bf16.mxu1 %v7025_v61  ;;  %7201 = vmatpush3.bf16.msra.mxu0 %v8070_v1  ;;  %v8080_v61 = vld [vmem:[%s10195_s11 + $0x38] sm:$0xff]   ;;  %v8082_v1 = vld [vmem:[%s10195_s11 + $0x140] sm:$0xff]  }
 0x9b0   : > { %7202 = vmatprep.subr.bf16.mxu0 %v8071_v7  ;;  %v8087_v7 = vld [vmem:[%s10195_s11 + $0x88] sm:$0xff]  }
 0x9b2   : > { %5434 = vmatpush1.bf16.msra.mxu1 %v7024_v8  ;;  %v8089_v8 = vld [vmem:[%s10195_s11 + $0xd0] sm:$0xff]  }
 0x9b3   : > { %5435 = vmatprep.subr.bf16.mxu1 %v7033_v9  ;;  %7203 = vmatpush3.bf16.msra.mxu0 %v8072_v10  ;;  %v8091_v9 = vld [vmem:[%s10195_s11 + $0x90] sm:$0xff]   ;;  %v8093_v10 = vld [vmem:[%s10195_s11 + $0xd8] sm:$0xff]  }
 0x9b4   : > { %7204 = vmatprep.subr.bf16.mxu0 %v8073_v13  ;;  %v8099_v13 = vld [vmem:[%s10195_s11 + $0xa0] sm:$0xff]  }
 0x9b6   : > { %5436 = vmatpush1.bf16.msra.mxu1 %v7032_v14  ;;  %v8101_v14 = vld [vmem:[%s10195_s11 + $0xe8] sm:$0xff]  }
 0x9b7   : > { %5437 = vmatprep.subr.bf16.mxu1 %v7041_v15  ;;  %7205 = vmatpush3.bf16.msra.mxu0 %v8074_v16  ;;  %v8103_v15 = vld [vmem:[%s10195_s11 + $0xa8] sm:$0xff]   ;;  %v8105_v16 = vld [vmem:[%s10195_s11 + $0xf0] sm:$0xff]  }
 0x9b8   : > { %7206 = vmatprep.subr.bf16.mxu0 %v8075_v19  ;;  %v8111_v19 = vld [vmem:[%s10195_s11 + $0xb8] sm:$0xff]  }
 0x9ba   : > { %5438 = vmatpush1.bf16.msra.mxu1 %v7040_v22  ;;  %v8113_v22 = vld [vmem:[%s10195_s11 + $0x1c0] sm:$0xff]  }
 0x9bb   : > { %5439 = vmatprep.subr.bf16.mxu1 %v7049_v23  ;;  %7207 = vmatpush3.bf16.msra.mxu0 %v8076_v24  ;;  %v10065_v23 = vld [vmem:[%s10194_s10] sm:$0xff]  ;;  %v5048_v24 = vsub.s32 5, %v9058_v2 }
 0x9bc   : > { %7208 = vmatprep.subr.bf16.mxu0 %v8077_v58  ;;  %v5029_v25 = vrot.slane %v10065_v23, %v9061_v3  ;;  %v5033_v26 = vrot.slane %v10065_v23, %v9067_v5  ;;  %v8084_v5 = vld [vmem:[%s10195_s11 + $0x100] sm:$0xff]  }
 0x9be   : > { %5440 = vmatpush1.bf16.msra.mxu1 %v7048_v27  ;;  %v5049_v27 = vrot.slane %v10065_v23, %v5048_v24  ;;  %v8121_v24 = vld [vmem:[%s10195_s11 + $0x1e0] sm:$0xff]  }
 0x9bf   : > { %5441 = vmatprep.subr.bf16.mxu1 %v7057_v28  ;;  %7209 = vmatpush3.bf16.msra.mxu0 %v8078_v59  ;;  %v8110_v59 = vld [vmem:[%s10195_s11 + $0x178] sm:$0xff]  }
 0x9c0   : > { %7210 = vmatprep.subr.bf16.mxu0 %v8079_v60 }
 0x9c2   : > { %5442 = vmatpush1.bf16.msra.mxu1 %v7056_v31 }
 0x9c3   : > { %5509 = vmatprep.subr.bf16.mxu1 %v7005_v32  ;;  %7211 = vmatpush3.bf16.msra.mxu0 %v8080_v61 }
 0x9c4   : > { %7240 = vmatprep.subr.bf16.mxu0 %v8082_v1 }
 0x9c5   : > { %5460 = vmatmul.mubr.bf16.vlgmr.msra.gmra.mrb[80].mxu1 %v9871_v48 }
 0x9c6   : > { %5510 = vmatpush1.bf16.msra.mxu1 %v7004_v39  ;;  %5541 = vmatprep.mubr.bf16.mxu1 %v8137_v0  ;;  %v4999_v0 = vld [vmem:[%s10193_s9 + $0x138] sm:$0xff] }
 0x9c7   : > { %5511 = vmatprep.subr.bf16.mxu1 %v7013_v40  ;;  %v7037_v45 = vcombine.high %v4995_v51, %v4999_v0  ;;  %v7036_v35 = vcombine.low %v4995_v51, %v4999_v0  ;;  %v8088_v51 = vld [vmem:[%s10195_s11 + $0x108] sm:$0xff]   ;;  %v8090_v0 = vld [vmem:[%s10195_s11 + $0x150] sm:$0xff]  }
 0x9ca   : > { %5512 = vmatpush1.bf16.msra.mxu1 %v7012_v43 }
 0x9cb   : > { %5513 = vmatprep.subr.bf16.mxu1 %v7021_v44 }
 0x9ce   : > { %5514 = vmatpush1.bf16.msra.mxu1 %v7020_v46  ;;  %v8086_v46 = vld [vmem:[%s10195_s11 + $0x148] sm:$0xff]  }
 0x9cf   : > { %5515 = vmatprep.subr.bf16.mxu1 %v7029_v21 }
 0x9d2   : > { %5516 = vmatpush1.bf16.msra.mxu1 %v7028_v52  ;;  %v8092_v52 = vld [vmem:[%s10195_s11 + $0x110] sm:$0xff]  }
 0x9d3   : > { %5517 = vmatprep.subr.bf16.mxu1 %v7037_v45  ;;  %v8094_v45 = vld [vmem:[%s10195_s11 + $0x158] sm:$0xff]  }
 0x9d6   : > { %5518 = vmatpush1.bf16.msra.mxu1 %v7036_v35  ;;  %v8100_v35 = vld [vmem:[%s10195_s11 + $0x120] sm:$0xff]  }
 0x9d7   : > { %5519 = vmatprep.subr.bf16.mxu1 %v7045_v34  ;;  %v5044_v34 = vsub.s32 4, %v9058_v2 }
 0x9d9   : > { %v5045_v55 = vrot.slane %v10065_v23, %v5044_v34 }
 0x9da   : > { %5520 = vmatpush1.bf16.msra.mxu1 %v7044_v50  ;;  %v8104_v50 = vld [vmem:[%s10195_s11 + $0x128] sm:$0xff]  }
 0x9db   : > { %5521 = vmatprep.subr.bf16.mxu1 %v7053_v63  ;;  %v5040_v63 = vsub.s32 3, %v9058_v2 }
 0x9de   : > { %5522 = vmatpush1.bf16.msra.mxu1 %v7052_v54  ;;  %v5037_v54 = vrot.slane %v10065_v23, %v5036_v62 }
 0x9df   : > { %5523 = vmatprep.subr.bf16.mxu1 %v7061_v53  ;;  %v5041_v53 = vrot.slane %v10065_v23, %v5040_v63 }
 0x9e2   : > { %5524 = vmatpush1.bf16.msra.mxu1 %v7060_v57  ;;  %v8108_v57 = vld [vmem:[%s10195_s11 + $0x130] sm:$0xff]  }
 0x9e5   : > { %5542 = vmatmul.mubr.bf16.vlgmr.msra.gmra.mrb[84].mxu1 %v9871_v48  ;;  %v8081_v48 = vld [vmem:[%s10195_s11 + $0xc0] sm:$0xff]  }
 0x9e6   : > { %7218 = vmatprep.subr.bf16.mxu1 %v8081_v48 }
 0x9e7   : > { %7219 = vmatpush3.bf16.msra.mxu1 %v8083_v4 }
 0x9e8   : > { %7220 = vmatprep.subr.bf16.mxu1 %v8085_v6  ;;  %v8112_v6 = vld [vmem:[%s10195_s11 + $0x138] sm:$0xff]  }
 0x9eb   : > { %7221 = vmatpush3.bf16.msra.mxu1 %v8087_v7 }
 0x9ec   : > { %7222 = vmatprep.subr.bf16.mxu1 %v8089_v8 }
 0x9ef   : > { %7223 = vmatpush3.bf16.msra.mxu1 %v8091_v9 }
 0x9f0   : > { %7224 = vmatprep.subr.bf16.mxu1 %v8093_v10 }
 0x9f3   : > { %7225 = vmatpush3.bf16.msra.mxu1 %v8095_v11 }
 0x9f4   : > { %7226 = vmatprep.subr.bf16.mxu1 %v8097_v12  ;;  %v8114_v12 = vld [vmem:[%s10195_s11 + $0x180] sm:$0xff]  }
 0x9f7   : > { %7227 = vmatpush3.bf16.msra.mxu1 %v8099_v13 }
 0x9f8   : > { %7228 = vmatprep.subr.bf16.mxu1 %v8101_v14 }
 0x9fb   : > { %7229 = vmatpush3.bf16.msra.mxu1 %v8103_v15  ;;  %v8115_v15 = vld [vmem:[%s10195_s11 + $0x1c8] sm:$0xff]  }
 0x9fc   : > { %7230 = vmatprep.subr.bf16.mxu1 %v8105_v16  ;;  %v8116_v16 = vld [vmem:[%s10195_s11 + $0x188] sm:$0xff]  }
 0x9ff   : > { %7231 = vmatpush3.bf16.msra.mxu1 %v8107_v17  ;;  %v8117_v17 = vld [vmem:[%s10195_s11 + $0x1d0] sm:$0xff]  }
 0xa00   : > { %7232 = vmatprep.subr.bf16.mxu1 %v8109_v18  ;;  %v8118_v18 = vld [vmem:[%s10195_s11 + $0x190] sm:$0xff]  }
 0xa03   : > { %7233 = vmatpush3.bf16.msra.mxu1 %v8111_v19  ;;  %v8119_v19 = vld [vmem:[%s10195_s11 + $0x1d8] sm:$0xff]  }
 0xa04   : > { %7262 = vmatprep.subr.bf16.mxu1 %v8113_v22  ;;  %v8120_v22 = vld [vmem:[%s10195_s11 + $0x198] sm:$0xff]  }
 0xa78   : > { %v5420_v28 = vpop.f32.mrb[76].mxu1  ;;  %v5502_v29 = vpop.f32.mrb[16].mxu0 }
 0xa79   : > { %v5421_v30 = vadd.f32 %v5420_v28, %v5029_v25  ;;  %v5422_v31 = vpop.f32.mrb[77].mxu1  ;;  %v5504_v32 = vpop.f32.mrb[17].mxu0  ;;  %v5503_v58 = vadd.f32 %v5502_v29, %v5045_v55  ;;  %v8122_v25 = vld [vmem:[%s10195_s11 + $0x1a0] sm:$0xff]   ;;  %v8124_v28 = vld [vmem:[%s10195_s11 + $0x1a8] sm:$0xff]   ;;  %v5056_v29 = vsub.s32 7, %v9058_v2 }
 0xa7a   : > { %v5423_v36 = vadd.f32 %v5422_v31, %v5033_v26  ;;  %v5505_v38 = vadd.f32 %v5504_v32, %v5049_v27  ;;  %v5424_v39 = vpop.f32.mrb[78].mxu1  ;;  %v5506_v40 = vpop.f32.mrb[18].mxu0  ;;  %v8123_v26 = vld [vmem:[%s10195_s11 + $0x1e8] sm:$0xff]   ;;  %v5052_v27 = vsub.s32 6, %v9058_v2 }
 0xa7b   : > { %v5550_v41 = vmax.f32 %v5421_v30, 0.0  ;;  %v5425_v42 = vpop.f32.mrb[79].mxu1  ;;  %v5507_v43 = vpop.f32.mrb[19].mxu0  ;;  %v5554_v7 = vmax.f32 %v5503_v58, 0.0  ;;  %v8125_v30 = vld [vmem:[%s10195_s11 + $0x1f0] sm:$0xff]   ;;  %v5057_v32 = vrot.slane %v10065_v23, %v5056_v29 }
 0xa7c   : > { %v5551_v44 = vmax.f32 %v5423_v36, 0.0  ;;  %v5555_v33 = vmax.f32 %v5505_v38, 0.0  ;;  %v5053_v31 = vrot.slane %v10065_v23, %v5052_v27  ;;  %v8126_v36 = vld [vmem:[%s10195_s11 + $0x1b0] sm:$0xff]   ;;  %v8127_v38 = vld [vmem:[%s10195_s11 + $0x1f8] sm:$0xff]  }
 0xa7d   : > { %v5558_v37 = vpack.c.bf16 %v5550_v41, %v5550_v41  ;;  %v5562_v13 = vpack.c.bf16 %v5554_v7, %v5554_v7  ;;  %v8128_v43 = vld [vmem:[%s10195_s11 + $0x1b8] sm:$0xff]  }
 0xa7e   : > { %v5559_v3 = vpack.c.bf16 %v5551_v44, %v5551_v44  ;;  %v5563_v21 = vpack.c.bf16 %v5555_v33, %v5555_v33 }
 0xa80   : > { %6117 = vmatprep.mubr.bf16.mxu0 %v5559_v3 }
 0xa81   : > { %6118 = vmatmul.mubr.bf16.vlgmr.msra.gmra.mrb[20].mxu0 %v5558_v37 }
 0xa82   : > { %7241 = vmatpush3.bf16.msra.mxu0 %v8084_v5  ;;  %6197 = vmatprep.mubr.bf16.mxu0 %v5563_v21 }
 0xa83   : > { %7242 = vmatprep.subr.bf16.mxu0 %v8086_v46 }
 0xa86   : > { %7243 = vmatpush3.bf16.msra.mxu0 %v8088_v51 }
 0xa87   : > { %7244 = vmatprep.subr.bf16.mxu0 %v8090_v0 }
 0xa8a   : > { %7245 = vmatpush3.bf16.msra.mxu0 %v8092_v52  ;;  %v7062_v52 = vld [vmem:[%s10196_s12] ss:$0 sm:$0xff] }
 0xa8b   : > { %7246 = vmatprep.subr.bf16.mxu0 %v8094_v45 }
 0xa8e   : > { %7247 = vmatpush3.bf16.msra.mxu0 %v8096_v47 }
 0xa8f   : > { %7248 = vmatprep.subr.bf16.mxu0 %v8098_v20 }
 0xa92   : > { %7249 = vmatpush3.bf16.msra.mxu0 %v8100_v35 }
 0xa93   : > { %7250 = vmatprep.subr.bf16.mxu0 %v8102_v49 }
 0xa96   : > { %7251 = vmatpush3.bf16.msra.mxu0 %v8104_v50 }
 0xa97   : > { %7252 = vmatprep.subr.bf16.mxu0 %v8106_v56 }
 0xa98   : > { %v5461_v60 = vpop.f32.mrb[80].mxu1 }
 0xa99   : > { %v5462_v61 = vadd.f32 %v5461_v60, %v5037_v54  ;;  %v5463_v48 = vpop.f32.mrb[81].mxu1 }
 0xa9a   : > { %v5464_v1 = vadd.f32 %v5463_v48, %v5041_v53  ;;  %v5465_v4 = vpop.f32.mrb[82].mxu1  ;;  %7253 = vmatpush3.bf16.msra.mxu0 %v8108_v57 }
 0xa9b   : > { %v5552_v8 = vmax.f32 %v5462_v61, 0.0  ;;  %v5466_v9 = vpop.f32.mrb[83].mxu1  ;;  %7254 = vmatprep.subr.bf16.mxu0 %v8110_v59 }
 0xa9c   : > { %v5553_v10 = vmax.f32 %v5464_v1, 0.0 }
 0xa9d   : > { %v5560_v14 = vpack.c.bf16 %v5552_v8, %v5552_v8 }
 0xa9e   : > { %v5561_v11 = vpack.c.bf16 %v5553_v10, %v5553_v10  ;;  %7255 = vmatpush3.bf16.msra.mxu0 %v8112_v6 }
 0xaa0   : > { %6157 = vmatprep.mubr.bf16.mxu1 %v5561_v11 }
 0xaa1   : > { %6158 = vmatmul.mubr.bf16.vlgmr.msra.gmra.mrb[88].mxu1 %v5560_v14  ;;  %6198 = vmatmul.mubr.bf16.vlgmr.msra.gmra.mrb[24].mxu0 %v5562_v13 }
 0xaa2   : > { %7263 = vmatpush3.bf16.msra.mxu1 %v8114_v12 }
 0xaa3   : > { %7264 = vmatprep.subr.bf16.mxu1 %v8115_v15 }
 0xaa6   : > { %7265 = vmatpush3.bf16.msra.mxu1 %v8116_v16 }
 0xaa7   : > { %7266 = vmatprep.subr.bf16.mxu1 %v8117_v17 }
 0xaaa   : > { %7267 = vmatpush3.bf16.msra.mxu1 %v8118_v18 }
 0xaab   : > { %7268 = vmatprep.subr.bf16.mxu1 %v8119_v19 }
 0xaae   : > { %7269 = vmatpush3.bf16.msra.mxu1 %v8120_v22 }
 0xaaf   : > { %7270 = vmatprep.subr.bf16.mxu1 %v8121_v24 }
 0xab2   : > { %7271 = vmatpush3.bf16.msra.mxu1 %v8122_v25 }
 0xab3   : > { %7272 = vmatprep.subr.bf16.mxu1 %v8123_v26 }
 0xab6   : > { %7273 = vmatpush3.bf16.msra.mxu1 %v8124_v28 }
 0xab7   : > { %7274 = vmatprep.subr.bf16.mxu1 %v8125_v30 }
 0xab8   : > { %v5543_v2 = vpop.f32.mrb[84].mxu1 }
 0xab9   : > { %v5544_v39 = vadd.f32 %v5543_v2, %v5053_v31  ;;  %v5545_v40 = vpop.f32.mrb[85].mxu1 }
 0xaba   : > { %v5546_v41 = vadd.f32 %v5545_v40, %v5057_v32  ;;  %v5547_v42 = vpop.f32.mrb[86].mxu1  ;;  %7275 = vmatpush3.bf16.msra.mxu1 %v8126_v36 }
 0xabb   : > { %v5556_v23 = vmax.f32 %v5544_v39, 0.0  ;;  %v5548_v44 = vpop.f32.mrb[87].mxu1  ;;  %7276 = vmatprep.subr.bf16.mxu1 %v8127_v38 }
 0xabc   : > { %v5557_v33 = vmax.f32 %v5546_v41, 0.0 }
 0xabd   : > { %v5564_v5 = vpack.c.bf16 %v5556_v23, %v5556_v23 }
 0xabe   : > { %v5565_v3 = vpack.c.bf16 %v5557_v33, %v5557_v33  ;;  %7277 = vmatpush3.bf16.msra.mxu1 %v8128_v43 }
 0xac0   : > { %6237 = vmatprep.mubr.bf16.mxu1 %v5565_v3 }
 0xac1   : > { %6238 = vmatmul.mubr.bf16.vlgmr.msra.gmra.mrb[92].mxu1 %v5564_v5 }
 0xb54   : > { %v7212_v37 = vpop.f32.mrb[20].mxu0 }
 0xb55   : > { %v7213_v46 = vpop.f32.mrb[21].mxu0 }
 0xb56   : > { %v7214_v21 = vadd.f32 %v7213_v46, %v7212_v37  ;;  %v7215_v51 = vpop.f32.mrb[22].mxu0 }
 0xb57   : > { %v7216_v0 = vpop.f32.mrb[23].mxu0 }
 0xb58   : > { %v6120_v34 = vadd.f32 %v7214_v21, %v7062_v52 }
 0xb74   : > { %v7234_v45 = vpop.f32.mrb[88].mxu1  ;;  %v7256_v47 = vpop.f32.mrb[24].mxu0 }
 0xb75   : > { %v7235_v20 = vpop.f32.mrb[89].mxu1  ;;  %v7257_v35 = vpop.f32.mrb[25].mxu0 }
 0xb76   : > { %v7236_v49 = vadd.f32 %v7235_v20, %v7234_v45  ;;  %v7258_v62 = vadd.f32 %v7257_v35, %v7256_v47  ;;  %v7237_v50 = vpop.f32.mrb[90].mxu1  ;;  %v7259_v63 = vpop.f32.mrb[26].mxu0 }
 0xb77   : > { %v7238_v55 = vpop.f32.mrb[91].mxu1  ;;  %v7260_v56 = vpop.f32.mrb[27].mxu0 }
 0xb78   : > { %v6160_v54 = vadd.f32 %v7236_v49, %v6120_v34 }
 0xb7a   : > { %v6200_v53 = vadd.f32 %v7258_v62, %v6160_v54 }
 0xb94   : > { %v7278_v57 = vpop.f32.mrb[92].mxu1 }
 0xb95   : > { %v7279_v58 = vpop.f32.mrb[93].mxu1 }
 0xb96   : > { %v7280_v59 = vadd.f32 %v7279_v58, %v7278_v57  ;;  %v7281_v60 = vpop.f32.mrb[94].mxu1 }
 0xb97   : > { %v7282_v61 = vpop.f32.mrb[95].mxu1 }
 0xb98   : > { %v6240_v48 = vadd.f32 %v7280_v59, %v6200_v53 }
 0xb9a   : > { %6245 = vst [vmem:[%s443_s19] sm:$0xff] %v6240_v48 }
 0xb9b PF: > { %s23_s25 = sadd.s32 1, %s8135_s25  }
 0xb9c   : > { %p20_p5 = scmp.ge.s32.totalorder %s23_s25, 4  }
 0xb9e   :  { %22 = sbr.rel (!%p20_p5) target bundleno = 1 (0x1), region = 112 }

</bundles_post_ra>
